<compile_context>
chip_gen: v5e
topology: v5e:2x2
jax: 0.10.0
libtpu: 0.0.40
codegen_flags: <defaults>
</compile_context>

<pallas_src>
import math
import jax
import jax.numpy as jnp
from jax.experimental import pallas as pl
from jax.experimental.pallas import tpu as pltpu

# ----- MPNNModel constructor args (chosen small) -----
ATOM_DIM = 16
BOND_DIM = 8
BOND_ANGLE_DIM = 6
DIHEDRAL_ANGLE_DIM = 4
BATCH_SIZE = 4            # molecules per batch (PartitionPadding batch_size)
MESSAGE_UNITS = 64        # embed_dim
MESSAGE_STEPS = 2
NUM_HEADS = 8
HEAD_DIM = MESSAGE_UNITS // NUM_HEADS
DENSE_UNITS = 128

D_PAD = 128               # padded working width for message passing
E_PAD = 128               # padded embed dim for the attention readout
MXU_DTYPE = jnp.bfloat16  # MXU operands; accumulation stays f32


def _mxu(a, b):
    """bf16-operand, f32-accumulate MXU matmul."""
    return jnp.dot(a.astype(MXU_DTYPE), b.astype(MXU_DTYPE),
                   preferred_element_type=jnp.float32)


def _vmem_spec():
    return pl.BlockSpec(memory_space=pltpu.MemorySpace.VMEM)


# ---------------------------------------------------------------------------
# Fused message-passing kernel: (Edge -> BondAngle -> Dihedral -> GRU) x steps
# ---------------------------------------------------------------------------
def _fused_message_passing_kernel(
        h0_ref,
        e_feat_ref, e_gat_ref, e_sct_ref, e_w_ref,
        b_feat_ref, b_gat_ref, b_sct_ref, b_w_ref,
        d_feat_ref, d_gat_ref, d_sct_ref, d_w_ref,
        wih_ref, whh_ref, bih_ref, bhh_ref,
        out_ref):
    dp = D_PAD

    def message(h, feat_ref, gat_ref, sct_ref, w_ref):
        # gather(atom_features, 0, pair[:, 1]) as one-hot matmul          -> [E, DP]
        nbr = _mxu(gat_ref[...], h)
        # All per-feature candidate messages (plus the bias block) in ONE matmul:
        #   cand[:, f*DP:(f+1)*DP] = nbr @ W_f^T   (last block = nbr @ B^T)
        cand = _mxu(nbr, w_ref[...])                       # [E, (F+1)*DP]
        feat = feat_ref[...]                               # [E, F+1] f32 (last col = 1)
        nf = feat.shape[1]
        msg = feat[:, 0:1] * cand[:, 0:dp]
        for f in range(1, nf):                             # static unroll, F+1 <= 9
            msg = msg + feat[:, f:f + 1] * cand[:, f * dp:(f + 1) * dp]
        # scatter_add to pair[:, 0] via the PRE-TRANSPOSED one-hot        -> [N, DP]
        return _mxu(sct_ref[...], msg)

    def step(_, h):
        a1 = message(h, e_feat_ref, e_gat_ref, e_sct_ref, e_w_ref)
        a2 = message(a1, b_feat_ref, b_gat_ref, b_sct_ref, b_w_ref)
        a3 = message(a2, d_feat_ref, d_gat_ref, d_sct_ref, d_w_ref)
        # PyTorch GRUCell (gate order r, z, n); gate blocks 128-lane aligned.
        gi = _mxu(a3, wih_ref[...]) + bih_ref[...]         # [N, 3*DP]
        gh = _mxu(h, whh_ref[...]) + bhh_ref[...]          # [N, 3*DP]
        r = jax.nn.sigmoid(gi[:, 0:dp] + gh[:, 0:dp])
        z = jax.nn.sigmoid(gi[:, dp:2 * dp] + gh[:, dp:2 * dp])
        n = jnp.tanh(gi[:, 2 * dp:3 * dp] + r * gh[:, 2 * dp:3 * dp])
        return (1.0 - z) * n + z * h

    out_ref[...] = jax.lax.fori_loop(0, MESSAGE_STEPS, step, h0_ref[...],
                                     unroll=True)


def message_passing(atom_features, bond_features, pair_indices,
                    bond_angle_features, bond_angle_pair_indices,
                    dihedral_angle_features, dihedral_angle_pair_indices, params):
    n_atoms = atom_features.shape[0]
    n_pad = ((n_atoms + 7) // 8) * 8
    # F.pad(atom_features, (0, units - atom_dim)) plus the perf pad to 128 lanes.
    h0 = jnp.zeros((n_pad, D_PAD), jnp.float32)
    h0 = h0.at[:n_atoms, :atom_features.shape[1]].set(atom_features)

    def onehot(pair):
        cols = jnp.arange(n_pad, dtype=jnp.int32)
        gat = (pair[:, 1][:, None] == cols[None, :]).astype(MXU_DTYPE)     # [E, N]
        sct_t = (cols[:, None] == pair[:, 0][None, :]).astype(MXU_DTYPE)   # [N, E]
        return gat, sct_t

    def aug(feat):   # append constant-1 column so the bias block folds into W_all
        return jnp.concatenate(
            [feat, jnp.ones((feat.shape[0], 1), feat.dtype)], axis=1)

    e_gat, e_sct = onehot(pair_indices)
    b_gat, b_sct = onehot(bond_angle_pair_indices)
    d_gat, d_sct = onehot(dihedral_angle_pair_indices)

    args = (h0,
            aug(bond_features), e_gat, e_sct, params['edge_w'],
            aug(bond_angle_features), b_gat, b_sct, params['ba_w'],
            aug(dihedral_angle_features), d_gat, d_sct, params['da_w'],
            params['gru_wih'], params['gru_whh'], params['gru_bih'], params['gru_bhh'])

    return pl.pallas_call(
        _fused_message_passing_kernel,
        out_shape=jax.ShapeDtypeStruct((n_pad, D_PAD), jnp.float32),
        in_specs=[_vmem_spec() for _ in args],
        out_specs=_vmem_spec(),
    )(*args)


# ---------------------------------------------------------------------------
# Fused transformer readout kernel: MHA + out_proj + Linear/ReLU/Linear.
# All atom slots processed in one call on flattened [A*M, E] rows; the per-slot
# [M, M] attention batches are realized via a block-diagonal additive mask.
# ---------------------------------------------------------------------------
def _readout_kernel(x_ref, mask_ref, hmask_ref, wqkv_ref, bqkv_ref,
                    wo_ref, bo_ref, w1_ref, b1_ref, w2_ref, b2_ref, out_ref):
    ep = E_PAD
    scale = 1.0 / math.sqrt(HEAD_DIM)

    x = x_ref[...]                                       # [A*M, EP] f32
    qkv = _mxu(x, wqkv_ref[...]) + bqkv_ref[...]         # fused QKV, [A*M, 3*EP]
    q = qkv[:, 0:ep] * scale
    k16 = qkv[:, ep:2 * ep].astype(MXU_DTYPE)
    v16 = qkv[:, 2 * ep:3 * ep].astype(MXU_DTYPE)
    mask = mask_ref[...]                                 # [A*M, A*M] additive mask

    attn = jnp.zeros(x.shape, jnp.float32)
    for h in range(NUM_HEADS):                           # static unroll
        hm = hmask_ref[h:h + 1, :]                       # [1, EP] hoisted lane mask
        s = jax.lax.dot_general((q * hm).astype(MXU_DTYPE), k16,
                                (((1,), (1,)), ((), ())),
                                preferred_element_type=jnp.float32)   # [A*M, A*M]
        s = s + mask
        s = s - jnp.max(s, axis=-1, keepdims=True)
        p = jnp.exp(s)
        p = p * pl.reciprocal(jnp.sum(p, axis=-1, keepdims=True), approx=True)
        pv = jnp.dot(p.astype(MXU_DTYPE), v16,
                     preferred_element_type=jnp.float32)              # [A*M, EP]
        attn = attn + pv * hm                            # head output in its own lanes
    a = _mxu(attn, wo_ref[...]) + bo_ref[...]            # out_proj
    hid = jnp.maximum(_mxu(a, w1_ref[...]) + b1_ref[...], 0.0)
    out_ref[...] = _mxu(hid, w2_ref[...]) + b2_ref[...]  # lane-dense [A*M, 128] store


def transformer_readout(x2d, big_mask, params):
    am = x2d.shape[0]
    args = (x2d, big_mask, params['head_mask'],
            params['wqkv'], params['bqkv'], params['wo'], params['bo'],
            params['w1'], params['b1'], params['w2'], params['b2'])
    return pl.pallas_call(
        _readout_kernel,
        out_shape=jax.ShapeDtypeStruct((am, DENSE_UNITS), jnp.float32),
        in_specs=[_vmem_spec() for _ in args],
        out_specs=_vmem_spec(),
    )(*args)


# ---------------------------------------------------------------------------
# Full forward (one jit): message passing -> on-device PartitionPadding -> readout
# ---------------------------------------------------------------------------
def build_forward(n_atoms, max_atoms):
    @jax.jit
    def forward(atom_features, bond_features, pair_indices, molecule_indicator,
                bond_angle_features, bond_angle_pair_indices,
                dihedral_angle_features, dihedral_angle_pair_indices, params):
        h = message_passing(atom_features, bond_features, pair_indices,
                            bond_angle_features, bond_angle_pair_indices,
                            dihedral_angle_features, dihedral_angle_pair_indices,
                            params)[:n_atoms]                       # [n_atoms, D_PAD]

        # --- PartitionPadding on device (static max_atoms bound) ---
        # TODO(synk): the reference drops all-zero molecules (data-dependent shape);
        # here all BATCH_SIZE molecules are assumed non-empty.
        mol = molecule_indicator.astype(jnp.int32)
        idx = jnp.arange(n_atoms, dtype=jnp.int32)
        slot = jnp.sum(((mol[None, :] == mol[:, None]) &
                        (idx[None, :] < idx[:, None])).astype(jnp.int32), axis=1)
        row = slot * BATCH_SIZE + mol                # flat row index = slot*M + molecule
        am = max_atoms * BATCH_SIZE
        part = (jnp.arange(am, dtype=jnp.int32)[:, None] ==
                row[None, :]).astype(jnp.float32)                   # [A*M, n_atoms]
        x2d = part @ h                                              # [A*M, D_PAD]

        # Combined additive attention mask:
        #   same atom slot      -> PyTorch float key_padding_mask (+1 valid / +0 padded,
        #                          exactly as the reference ADDS the float mask)
        #   different atom slot -> -1e9 (separate attention "batch" rows)
        key_mask = (jnp.sum(x2d, axis=-1) != 0).astype(jnp.float32)     # [A*M]
        row_slot = jnp.arange(am, dtype=jnp.int32) // BATCH_SIZE
        same_slot = row_slot[:, None] == row_slot[None, :]
        big_mask = jnp.where(same_slot, key_mask[None, :], jnp.float32(-1e9))

        out2d = transformer_readout(x2d, big_mask, params)          # [A*M, DENSE]
        # back to PyTorch (molecule, atom_slot, dense) layout
        return out2d.reshape(max_atoms, BATCH_SIZE, DENSE_UNITS).transpose(1, 0, 2)
    return forward


# ---------------------------------------------------------------------------
# Deterministic parameter init (shapes from the module __init__), pre-packed
# into kernel layout (transposed + zero-padded 128-lane blocks, bf16 MXU weights).
# ---------------------------------------------------------------------------
def init_params(key):
    d = MESSAGE_UNITS
    dp = D_PAD
    e = MESSAGE_UNITS
    ep = E_PAD
    ks = jax.random.split(key, 16)

    def xavier(k, shape):
        bound = math.sqrt(6.0 / (shape[0] + shape[1]))
        return jax.random.uniform(k, shape, jnp.float32, -bound, bound)

    def uni(k, shape, bound):
        return jax.random.uniform(k, shape, jnp.float32, -bound, bound)

    def pad2(w, rows, cols):
        return jnp.pad(w, ((0, rows - w.shape[0]), (0, cols - w.shape[1])))

    def msg_net(k, feat_dim):
        # PyTorch: kernel [F, D*D], bias [D*D]; per-edge transform is
        #   (feat @ kernel + bias).view(-1, D, D) @ nbr
        # Kernel computes msg = sum_f feat_aug[:, f] * (nbr @ W_f^T) with the bias block
        # appended as "feature" F, so stack transposed zero-padded blocks column-wise.
        w = xavier(k, (feat_dim, d * d))
        b = jnp.zeros((d * d,), jnp.float32)
        wt = w.reshape(feat_dim, d, d).transpose(0, 2, 1)
        blocks = [pad2(wt[f], dp, dp) for f in range(feat_dim)]
        blocks.append(pad2(b.reshape(d, d).T, dp, dp))
        return jnp.concatenate(blocks, axis=1).astype(MXU_DTYPE)    # [DP, (F+1)*DP]

    p = {}
    p['edge_w'] = msg_net(ks[0], BOND_DIM)
    p['ba_w'] = msg_net(ks[1], BOND_ANGLE_DIM)
    p['da_w'] = msg_net(ks[2], DIHEDRAL_ANGLE_DIM)

    # PyTorch GRUCell: weight_ih / weight_hh [3D, D] with gate row blocks (r, z, n).
    kb = 1.0 / math.sqrt(d)

    def pack_gru_w(w):           # [3D, D] -> [DP, 3*DP], 128-aligned gate blocks
        wt = w.T                 # [D, 3D] gate column blocks (r | z | n)
        return jnp.concatenate(
            [pad2(wt[:, g * d:(g + 1) * d], dp, dp) for g in range(3)],
            axis=1).astype(MXU_DTYPE)

    def pack_gru_b(b):           # [3D] -> [1, 3*DP] f32
        return jnp.concatenate(
            [jnp.pad(b[g * d:(g + 1) * d], (0, dp - d)) for g in range(3)])[None, :]

    p['gru_wih'] = pack_gru_w(uni(ks[3], (3 * d, d), kb))
    p['gru_whh'] = pack_gru_w(uni(ks[4], (3 * d, d), kb))
    p['gru_bih'] = pack_gru_b(uni(ks[5], (3 * d,), kb))
    p['gru_bhh'] = pack_gru_b(uni(ks[6], (3 * d,), kb))

    # nn.MultiheadAttention: in_proj_weight [3E, E] rows (q|k|v); biases init to 0.
    ipw = xavier(ks[7], (3 * e, e))
    p['wqkv'] = jnp.concatenate(
        [pad2(ipw[g * e:(g + 1) * e].T, ep, ep) for g in range(3)],
        axis=1).astype(MXU_DTYPE)                                   # [EP, 3*EP]
    p['bqkv'] = jnp.zeros((1, 3 * ep), jnp.float32)
    ko = 1.0 / math.sqrt(e)
    p['wo'] = pad2(uni(ks[8], (e, e), ko).T, ep, ep).astype(MXU_DTYPE)
    p['bo'] = jnp.zeros((1, ep), jnp.float32)
    # dense_proj: Linear(E, DENSE) -> ReLU -> Linear(DENSE, DENSE)
    p['w1'] = pad2(uni(ks[9], (DENSE_UNITS, e), ko).T, ep, DENSE_UNITS).astype(MXU_DTYPE)
    p['b1'] = uni(ks[10], (1, DENSE_UNITS), ko)
    k2 = 1.0 / math.sqrt(DENSE_UNITS)
    p['w2'] = uni(ks[11], (DENSE_UNITS, DENSE_UNITS), k2).T.astype(MXU_DTYPE)
    p['b2'] = uni(ks[12], (1, DENSE_UNITS), k2)

    # Hoisted per-head lane masks (head h occupies lanes [h*HD, (h+1)*HD) of the real E).
    lane = jnp.arange(ep)
    head = jnp.arange(NUM_HEADS)[:, None]
    p['head_mask'] = ((lane[None, :] >= head * HEAD_DIM) &
                      (lane[None, :] < (head + 1) * HEAD_DIM)).astype(jnp.float32)
    return p


# ---------------------------------------------------------------------------
if __name__ == "__main__":
    key = jax.random.PRNGKey(0)
    kd = jax.random.split(key, 8)

    N_ATOMS = 12
    E_BOND, E_BA, E_DA = 16, 16, 8

    atom_features = jax.random.normal(kd[0], (N_ATOMS, ATOM_DIM), jnp.float32)
    bond_features = jax.random.normal(kd[1], (E_BOND, BOND_DIM), jnp.float32)
    pair_indices = jax.random.randint(kd[2], (E_BOND, 2), 0, N_ATOMS, jnp.int32)
    bond_angle_features = jax.random.normal(kd[3], (E_BA, BOND_ANGLE_DIM), jnp.float32)
    bond_angle_pair_indices = jax.random.randint(kd[4], (E_BA, 2), 0, N_ATOMS, jnp.int32)
    dihedral_angle_features = jax.random.normal(kd[5], (E_DA, DIHEDRAL_ANGLE_DIM), jnp.float32)
    dihedral_angle_pair_indices = jax.random.randint(kd[6], (E_DA, 2), 0, N_ATOMS, jnp.int32)

    mol_list = [0, 0, 0, 1, 1, 1, 1, 2, 2, 2, 3, 3]
    molecule_indicator = jnp.array(mol_list, jnp.int32)
    max_atoms = max(mol_list.count(i) for i in range(BATCH_SIZE))   # static bound (host)

    params = init_params(jax.random.PRNGKey(42))
    forward = build_forward(N_ATOMS, max_atoms)

    out = forward(atom_features, bond_features, pair_indices, molecule_indicator,
                  bond_angle_features, bond_angle_pair_indices,
                  dihedral_angle_features, dihedral_angle_pair_indices, params)
    out = jax.block_until_ready(out)

    assert out.shape == (BATCH_SIZE, max_atoms, DENSE_UNITS)
    assert bool(jnp.all(jnp.isfinite(out)))
    print("KERNEL_OK")
</pallas_src>

<mosaic_0001>
module attributes {stable_mosaic.version = 11 : i64} {
  func.func @_fused_message_passing_kernel(%arg0: memref<16x128xf32, #tpu.memory_space<vmem>>, %arg1: memref<16x9xf32, #tpu.memory_space<vmem>>, %arg2: memref<16x16xbf16, #tpu.memory_space<vmem>>, %arg3: memref<16x16xbf16, #tpu.memory_space<vmem>>, %arg4: memref<128x1152xbf16, #tpu.memory_space<vmem>>, %arg5: memref<16x7xf32, #tpu.memory_space<vmem>>, %arg6: memref<16x16xbf16, #tpu.memory_space<vmem>>, %arg7: memref<16x16xbf16, #tpu.memory_space<vmem>>, %arg8: memref<128x896xbf16, #tpu.memory_space<vmem>>, %arg9: memref<8x5xf32, #tpu.memory_space<vmem>>, %arg10: memref<8x16xbf16, #tpu.memory_space<vmem>>, %arg11: memref<16x8xbf16, #tpu.memory_space<vmem>>, %arg12: memref<128x640xbf16, #tpu.memory_space<vmem>>, %arg13: memref<128x384xbf16, #tpu.memory_space<vmem>>, %arg14: memref<128x384xbf16, #tpu.memory_space<vmem>>, %arg15: memref<1x384xf32, #tpu.memory_space<vmem>>, %arg16: memref<1x384xf32, #tpu.memory_space<vmem>>, %arg17: memref<16x128xf32, #tpu.memory_space<vmem>>) attributes {dimension_semantics = [], scalar_prefetch = 0 : i64, scratch_operands = 0 : i64, tpu.core_type = #tpu.core_type<tc>} {
    %c0 = arith.constant 0 : index
    %c0_0 = arith.constant 0 : index
    %0 = vector.load %arg0[%c0, %c0_0] : memref<16x128xf32, #tpu.memory_space<vmem>>, vector<16x128xf32>
    %c0_i32 = arith.constant 0 : i32
    %c0_1 = arith.constant 0 : index
    %c0_2 = arith.constant 0 : index
    %1 = vector.load %arg2[%c0_1, %c0_2] : memref<16x16xbf16, #tpu.memory_space<vmem>>, vector<16x16xbf16>
    %2 = arith.truncf %0 : vector<16x128xf32> to vector<16x128xbf16>
    %cst = arith.constant dense<0.000000e+00> : vector<16x128xf32>
    %3 = tpu.matmul %1, %2, %cst {dimension_numbers = #tpu.dot_dimension_numbers<[1], [0], [0], [1], [0, 0, 1, 1], [], []>} : vector<16x16xbf16>, vector<16x128xbf16>, vector<16x128xf32> -> vector<16x128xf32>
    %c0_3 = arith.constant 0 : index
    %c0_4 = arith.constant 0 : index
    %4 = vector.load %arg4[%c0_3, %c0_4] : memref<128x1152xbf16, #tpu.memory_space<vmem>>, vector<128x1152xbf16>
    %5 = arith.truncf %3 : vector<16x128xf32> to vector<16x128xbf16>
    %cst_5 = arith.constant dense<0.000000e+00> : vector<16x1152xf32>
    %6 = tpu.matmul %5, %4, %cst_5 {dimension_numbers = #tpu.dot_dimension_numbers<[1], [0], [0], [1], [0, 0, 1, 1], [], []>} : vector<16x128xbf16>, vector<128x1152xbf16>, vector<16x1152xf32> -> vector<16x1152xf32>
    %c0_6 = arith.constant 0 : index
    %c0_7 = arith.constant 0 : index
    %7 = vector.load %arg1[%c0_6, %c0_7] : memref<16x9xf32, #tpu.memory_space<vmem>>, vector<16x9xf32>
    %8 = vector.extract_strided_slice %7 {offsets = [0, 0], sizes = [16, 1], strides = [1, 1]} : vector<16x9xf32> to vector<16x1xf32>
    %9 = vector.extract_strided_slice %6 {offsets = [0, 0], sizes = [16, 128], strides = [1, 1]} : vector<16x1152xf32> to vector<16x128xf32>
    %10 = vector.broadcast %8 : vector<16x1xf32> to vector<16x128xf32>
    %11 = arith.mulf %10, %9 : vector<16x128xf32>
    %12 = vector.extract_strided_slice %7 {offsets = [0, 1], sizes = [16, 1], strides = [1, 1]} : vector<16x9xf32> to vector<16x1xf32>
    %13 = vector.extract_strided_slice %6 {offsets = [0, 128], sizes = [16, 128], strides = [1, 1]} : vector<16x1152xf32> to vector<16x128xf32>
    %14 = vector.broadcast %12 : vector<16x1xf32> to vector<16x128xf32>
    %15 = arith.mulf %14, %13 : vector<16x128xf32>
    %16 = arith.addf %11, %15 : vector<16x128xf32>
    %17 = vector.extract_strided_slice %7 {offsets = [0, 2], sizes = [16, 1], strides = [1, 1]} : vector<16x9xf32> to vector<16x1xf32>
    %18 = vector.extract_strided_slice %6 {offsets = [0, 256], sizes = [16, 128], strides = [1, 1]} : vector<16x1152xf32> to vector<16x128xf32>
    %19 = vector.broadcast %17 : vector<16x1xf32> to vector<16x128xf32>
    %20 = arith.mulf %19, %18 : vector<16x128xf32>
    %21 = arith.addf %16, %20 : vector<16x128xf32>
    %22 = vector.extract_strided_slice %7 {offsets = [0, 3], sizes = [16, 1], strides = [1, 1]} : vector<16x9xf32> to vector<16x1xf32>
    %23 = vector.extract_strided_slice %6 {offsets = [0, 384], sizes = [16, 128], strides = [1, 1]} : vector<16x1152xf32> to vector<16x128xf32>
    %24 = vector.broadcast %22 : vector<16x1xf32> to vector<16x128xf32>
    %25 = arith.mulf %24, %23 : vector<16x128xf32>
    %26 = arith.addf %21, %25 : vector<16x128xf32>
    %27 = vector.extract_strided_slice %7 {offsets = [0, 4], sizes = [16, 1], strides = [1, 1]} : vector<16x9xf32> to vector<16x1xf32>
    %28 = vector.extract_strided_slice %6 {offsets = [0, 512], sizes = [16, 128], strides = [1, 1]} : vector<16x1152xf32> to vector<16x128xf32>
    %29 = vector.broadcast %27 : vector<16x1xf32> to vector<16x128xf32>
    %30 = arith.mulf %29, %28 : vector<16x128xf32>
    %31 = arith.addf %26, %30 : vector<16x128xf32>
    %32 = vector.extract_strided_slice %7 {offsets = [0, 5], sizes = [16, 1], strides = [1, 1]} : vector<16x9xf32> to vector<16x1xf32>
    %33 = vector.extract_strided_slice %6 {offsets = [0, 640], sizes = [16, 128], strides = [1, 1]} : vector<16x1152xf32> to vector<16x128xf32>
    %34 = vector.broadcast %32 : vector<16x1xf32> to vector<16x128xf32>
    %35 = arith.mulf %34, %33 : vector<16x128xf32>
    %36 = arith.addf %31, %35 : vector<16x128xf32>
    %37 = vector.extract_strided_slice %7 {offsets = [0, 6], sizes = [16, 1], strides = [1, 1]} : vector<16x9xf32> to vector<16x1xf32>
    %38 = vector.extract_strided_slice %6 {offsets = [0, 768], sizes = [16, 128], strides = [1, 1]} : vector<16x1152xf32> to vector<16x128xf32>
    %39 = vector.broadcast %37 : vector<16x1xf32> to vector<16x128xf32>
    %40 = arith.mulf %39, %38 : vector<16x128xf32>
    %41 = arith.addf %36, %40 : vector<16x128xf32>
    %42 = vector.extract_strided_slice %7 {offsets = [0, 7], sizes = [16, 1], strides = [1, 1]} : vector<16x9xf32> to vector<16x1xf32>
    %43 = vector.extract_strided_slice %6 {offsets = [0, 896], sizes = [16, 128], strides = [1, 1]} : vector<16x1152xf32> to vector<16x128xf32>
    %44 = vector.broadcast %42 : vector<16x1xf32> to vector<16x128xf32>
    %45 = arith.mulf %44, %43 : vector<16x128xf32>
    %46 = arith.addf %41, %45 : vector<16x128xf32>
    %47 = vector.extract_strided_slice %7 {offsets = [0, 8], sizes = [16, 1], strides = [1, 1]} : vector<16x9xf32> to vector<16x1xf32>
    %48 = vector.extract_strided_slice %6 {offsets = [0, 1024], sizes = [16, 128], strides = [1, 1]} : vector<16x1152xf32> to vector<16x128xf32>
    %49 = vector.broadcast %47 : vector<16x1xf32> to vector<16x128xf32>
    %50 = arith.mulf %49, %48 : vector<16x128xf32>
    %51 = arith.addf %46, %50 : vector<16x128xf32>
    %c0_8 = arith.constant 0 : index
    %c0_9 = arith.constant 0 : index
    %52 = vector.load %arg3[%c0_8, %c0_9] : memref<16x16xbf16, #tpu.memory_space<vmem>>, vector<16x16xbf16>
    %53 = arith.truncf %51 : vector<16x128xf32> to vector<16x128xbf16>
    %cst_10 = arith.constant dense<0.000000e+00> : vector<16x128xf32>
    %54 = tpu.matmul %52, %53, %cst_10 {dimension_numbers = #tpu.dot_dimension_numbers<[1], [0], [0], [1], [0, 0, 1, 1], [], []>} : vector<16x16xbf16>, vector<16x128xbf16>, vector<16x128xf32> -> vector<16x128xf32>
    %c0_11 = arith.constant 0 : index
    %c0_12 = arith.constant 0 : index
    %55 = vector.load %arg6[%c0_11, %c0_12] : memref<16x16xbf16, #tpu.memory_space<vmem>>, vector<16x16xbf16>
    %56 = arith.truncf %54 : vector<16x128xf32> to vector<16x128xbf16>
    %cst_13 = arith.constant dense<0.000000e+00> : vector<16x128xf32>
    %57 = tpu.matmul %55, %56, %cst_13 {dimension_numbers = #tpu.dot_dimension_numbers<[1], [0], [0], [1], [0, 0, 1, 1], [], []>} : vector<16x16xbf16>, vector<16x128xbf16>, vector<16x128xf32> -> vector<16x128xf32>
    %c0_14 = arith.constant 0 : index
    %c0_15 = arith.constant 0 : index
    %58 = vector.load %arg8[%c0_14, %c0_15] : memref<128x896xbf16, #tpu.memory_space<vmem>>, vector<128x896xbf16>
    %59 = arith.truncf %57 : vector<16x128xf32> to vector<16x128xbf16>
    %cst_16 = arith.constant dense<0.000000e+00> : vector<16x896xf32>
    %60 = tpu.matmul %59, %58, %cst_16 {dimension_numbers = #tpu.dot_dimension_numbers<[1], [0], [0], [1], [0, 0, 1, 1], [], []>} : vector<16x128xbf16>, vector<128x896xbf16>, vector<16x896xf32> -> vector<16x896xf32>
    %c0_17 = arith.constant 0 : index
    %c0_18 = arith.constant 0 : index
    %61 = vector.load %arg5[%c0_17, %c0_18] : memref<16x7xf32, #tpu.memory_space<vmem>>, vector<16x7xf32>
    %62 = vector.extract_strided_slice %61 {offsets = [0, 0], sizes = [16, 1], strides = [1, 1]} : vector<16x7xf32> to vector<16x1xf32>
    %63 = vector.extract_strided_slice %60 {offsets = [0, 0], sizes = [16, 128], strides = [1, 1]} : vector<16x896xf32> to vector<16x128xf32>
    %64 = vector.broadcast %62 : vector<16x1xf32> to vector<16x128xf32>
    %65 = arith.mulf %64, %63 : vector<16x128xf32>
    %66 = vector.extract_strided_slice %61 {offsets = [0, 1], sizes = [16, 1], strides = [1, 1]} : vector<16x7xf32> to vector<16x1xf32>
    %67 = vector.extract_strided_slice %60 {offsets = [0, 128], sizes = [16, 128], strides = [1, 1]} : vector<16x896xf32> to vector<16x128xf32>
    %68 = vector.broadcast %66 : vector<16x1xf32> to vector<16x128xf32>
    %69 = arith.mulf %68, %67 : vector<16x128xf32>
    %70 = arith.addf %65, %69 : vector<16x128xf32>
    %71 = vector.extract_strided_slice %61 {offsets = [0, 2], sizes = [16, 1], strides = [1, 1]} : vector<16x7xf32> to vector<16x1xf32>
    %72 = vector.extract_strided_slice %60 {offsets = [0, 256], sizes = [16, 128], strides = [1, 1]} : vector<16x896xf32> to vector<16x128xf32>
    %73 = vector.broadcast %71 : vector<16x1xf32> to vector<16x128xf32>
    %74 = arith.mulf %73, %72 : vector<16x128xf32>
    %75 = arith.addf %70, %74 : vector<16x128xf32>
    %76 = vector.extract_strided_slice %61 {offsets = [0, 3], sizes = [16, 1], strides = [1, 1]} : vector<16x7xf32> to vector<16x1xf32>
    %77 = vector.extract_strided_slice %60 {offsets = [0, 384], sizes = [16, 128], strides = [1, 1]} : vector<16x896xf32> to vector<16x128xf32>
    %78 = vector.broadcast %76 : vector<16x1xf32> to vector<16x128xf32>
    %79 = arith.mulf %78, %77 : vector<16x128xf32>
    %80 = arith.addf %75, %79 : vector<16x128xf32>
    %81 = vector.extract_strided_slice %61 {offsets = [0, 4], sizes = [16, 1], strides = [1, 1]} : vector<16x7xf32> to vector<16x1xf32>
    %82 = vector.extract_strided_slice %60 {offsets = [0, 512], sizes = [16, 128], strides = [1, 1]} : vector<16x896xf32> to vector<16x128xf32>
    %83 = vector.broadcast %81 : vector<16x1xf32> to vector<16x128xf32>
    %84 = arith.mulf %83, %82 : vector<16x128xf32>
    %85 = arith.addf %80, %84 : vector<16x128xf32>
    %86 = vector.extract_strided_slice %61 {offsets = [0, 5], sizes = [16, 1], strides = [1, 1]} : vector<16x7xf32> to vector<16x1xf32>
    %87 = vector.extract_strided_slice %60 {offsets = [0, 640], sizes = [16, 128], strides = [1, 1]} : vector<16x896xf32> to vector<16x128xf32>
    %88 = vector.broadcast %86 : vector<16x1xf32> to vector<16x128xf32>
    %89 = arith.mulf %88, %87 : vector<16x128xf32>
    %90 = arith.addf %85, %89 : vector<16x128xf32>
    %91 = vector.extract_strided_slice %61 {offsets = [0, 6], sizes = [16, 1], strides = [1, 1]} : vector<16x7xf32> to vector<16x1xf32>
    %92 = vector.extract_strided_slice %60 {offsets = [0, 768], sizes = [16, 128], strides = [1, 1]} : vector<16x896xf32> to vector<16x128xf32>
    %93 = vector.broadcast %91 : vector<16x1xf32> to vector<16x128xf32>
    %94 = arith.mulf %93, %92 : vector<16x128xf32>
    %95 = arith.addf %90, %94 : vector<16x128xf32>
    %c0_19 = arith.constant 0 : index
    %c0_20 = arith.constant 0 : index
    %96 = vector.load %arg7[%c0_19, %c0_20] : memref<16x16xbf16, #tpu.memory_space<vmem>>, vector<16x16xbf16>
    %97 = arith.truncf %95 : vector<16x128xf32> to vector<16x128xbf16>
    %cst_21 = arith.constant dense<0.000000e+00> : vector<16x128xf32>
    %98 = tpu.matmul %96, %97, %cst_21 {dimension_numbers = #tpu.dot_dimension_numbers<[1], [0], [0], [1], [0, 0, 1, 1], [], []>} : vector<16x16xbf16>, vector<16x128xbf16>, vector<16x128xf32> -> vector<16x128xf32>
    %c0_22 = arith.constant 0 : index
    %c0_23 = arith.constant 0 : index
    %99 = vector.load %arg10[%c0_22, %c0_23] : memref<8x16xbf16, #tpu.memory_space<vmem>>, vector<8x16xbf16>
    %100 = arith.truncf %98 : vector<16x128xf32> to vector<16x128xbf16>
    %cst_24 = arith.constant dense<0.000000e+00> : vector<8x128xf32>
    %101 = tpu.matmul %99, %100, %cst_24 {dimension_numbers = #tpu.dot_dimension_numbers<[1], [0], [0], [1], [0, 0, 1, 1], [], []>} : vector<8x16xbf16>, vector<16x128xbf16>, vector<8x128xf32> -> vector<8x128xf32>
    %c0_25 = arith.constant 0 : index
    %c0_26 = arith.constant 0 : index
    %102 = vector.load %arg12[%c0_25, %c0_26] : memref<128x640xbf16, #tpu.memory_space<vmem>>, vector<128x640xbf16>
    %103 = arith.truncf %101 : vector<8x128xf32> to vector<8x128xbf16>
    %cst_27 = arith.constant dense<0.000000e+00> : vector<8x640xf32>
    %104 = tpu.matmul %103, %102, %cst_27 {dimension_numbers = #tpu.dot_dimension_numbers<[1], [0], [0], [1], [0, 0, 1, 1], [], []>} : vector<8x128xbf16>, vector<128x640xbf16>, vector<8x640xf32> -> vector<8x640xf32>
    %c0_28 = arith.constant 0 : index
    %c0_29 = arith.constant 0 : index
    %105 = vector.load %arg9[%c0_28, %c0_29] : memref<8x5xf32, #tpu.memory_space<vmem>>, vector<8x5xf32>
    %106 = vector.extract_strided_slice %105 {offsets = [0, 0], sizes = [8, 1], strides = [1, 1]} : vector<8x5xf32> to vector<8x1xf32>
    %107 = vector.extract_strided_slice %104 {offsets = [0, 0], sizes = [8, 128], strides = [1, 1]} : vector<8x640xf32> to vector<8x128xf32>
    %108 = vector.broadcast %106 : vector<8x1xf32> to vector<8x128xf32>
    %109 = arith.mulf %108, %107 : vector<8x128xf32>
    %110 = vector.extract_strided_slice %105 {offsets = [0, 1], sizes = [8, 1], strides = [1, 1]} : vector<8x5xf32> to vector<8x1xf32>
    %111 = vector.extract_strided_slice %104 {offsets = [0, 128], sizes = [8, 128], strides = [1, 1]} : vector<8x640xf32> to vector<8x128xf32>
    %112 = vector.broadcast %110 : vector<8x1xf32> to vector<8x128xf32>
    %113 = arith.mulf %112, %111 : vector<8x128xf32>
    %114 = arith.addf %109, %113 : vector<8x128xf32>
    %115 = vector.extract_strided_slice %105 {offsets = [0, 2], sizes = [8, 1], strides = [1, 1]} : vector<8x5xf32> to vector<8x1xf32>
    %116 = vector.extract_strided_slice %104 {offsets = [0, 256], sizes = [8, 128], strides = [1, 1]} : vector<8x640xf32> to vector<8x128xf32>
    %117 = vector.broadcast %115 : vector<8x1xf32> to vector<8x128xf32>
    %118 = arith.mulf %117, %116 : vector<8x128xf32>
    %119 = arith.addf %114, %118 : vector<8x128xf32>
    %120 = vector.extract_strided_slice %105 {offsets = [0, 3], sizes = [8, 1], strides = [1, 1]} : vector<8x5xf32> to vector<8x1xf32>
    %121 = vector.extract_strided_slice %104 {offsets = [0, 384], sizes = [8, 128], strides = [1, 1]} : vector<8x640xf32> to vector<8x128xf32>
    %122 = vector.broadcast %120 : vector<8x1xf32> to vector<8x128xf32>
    %123 = arith.mulf %122, %121 : vector<8x128xf32>
    %124 = arith.addf %119, %123 : vector<8x128xf32>
    %125 = vector.extract_strided_slice %105 {offsets = [0, 4], sizes = [8, 1], strides = [1, 1]} : vector<8x5xf32> to vector<8x1xf32>
    %126 = vector.extract_strided_slice %104 {offsets = [0, 512], sizes = [8, 128], strides = [1, 1]} : vector<8x640xf32> to vector<8x128xf32>
    %127 = vector.broadcast %125 : vector<8x1xf32> to vector<8x128xf32>
    %128 = arith.mulf %127, %126 : vector<8x128xf32>
    %129 = arith.addf %124, %128 : vector<8x128xf32>
    %c0_30 = arith.constant 0 : index
    %c0_31 = arith.constant 0 : index
    %130 = vector.load %arg11[%c0_30, %c0_31] : memref<16x8xbf16, #tpu.memory_space<vmem>>, vector<16x8xbf16>
    %131 = arith.truncf %129 : vector<8x128xf32> to vector<8x128xbf16>
    %cst_32 = arith.constant dense<0.000000e+00> : vector<16x128xf32>
    %132 = tpu.matmul %130, %131, %cst_32 {dimension_numbers = #tpu.dot_dimension_numbers<[1], [0], [0], [1], [0, 0, 1, 1], [], []>} : vector<16x8xbf16>, vector<8x128xbf16>, vector<16x128xf32> -> vector<16x128xf32>
    %c0_33 = arith.constant 0 : index
    %c0_34 = arith.constant 0 : index
    %133 = vector.load %arg13[%c0_33, %c0_34] : memref<128x384xbf16, #tpu.memory_space<vmem>>, vector<128x384xbf16>
    %134 = arith.truncf %132 : vector<16x128xf32> to vector<16x128xbf16>
    %cst_35 = arith.constant dense<0.000000e+00> : vector<16x384xf32>
    %135 = tpu.matmul %134, %133, %cst_35 {dimension_numbers = #tpu.dot_dimension_numbers<[1], [0], [0], [1], [0, 0, 1, 1], [], []>} : vector<16x128xbf16>, vector<128x384xbf16>, vector<16x384xf32> -> vector<16x384xf32>
    %c0_36 = arith.constant 0 : index
    %c0_37 = arith.constant 0 : index
    %136 = vector.load %arg15[%c0_36, %c0_37] : memref<1x384xf32, #tpu.memory_space<vmem>>, vector<1x384xf32>
    %137 = vector.broadcast %136 : vector<1x384xf32> to vector<16x384xf32>
    %138 = arith.addf %135, %137 : vector<16x384xf32>
    %c0_38 = arith.constant 0 : index
    %c0_39 = arith.constant 0 : index
    %139 = vector.load %arg14[%c0_38, %c0_39] : memref<128x384xbf16, #tpu.memory_space<vmem>>, vector<128x384xbf16>
    %140 = arith.truncf %0 : vector<16x128xf32> to vector<16x128xbf16>
    %cst_40 = arith.constant dense<0.000000e+00> : vector<16x384xf32>
    %141 = tpu.matmul %140, %139, %cst_40 {dimension_numbers = #tpu.dot_dimension_numbers<[1], [0], [0], [1], [0, 0, 1, 1], [], []>} : vector<16x128xbf16>, vector<128x384xbf16>, vector<16x384xf32> -> vector<16x384xf32>
    %c0_41 = arith.constant 0 : index
    %c0_42 = arith.constant 0 : index
    %142 = vector.load %arg16[%c0_41, %c0_42] : memref<1x384xf32, #tpu.memory_space<vmem>>, vector<1x384xf32>
    %143 = vector.broadcast %142 : vector<1x384xf32> to vector<16x384xf32>
    %144 = arith.addf %141, %143 : vector<16x384xf32>
    %145 = vector.extract_strided_slice %138 {offsets = [0, 0], sizes = [16, 128], strides = [1, 1]} : vector<16x384xf32> to vector<16x128xf32>
    %146 = vector.extract_strided_slice %144 {offsets = [0, 0], sizes = [16, 128], strides = [1, 1]} : vector<16x384xf32> to vector<16x128xf32>
    %147 = arith.addf %145, %146 : vector<16x128xf32>
    %148 = arith.negf %147 : vector<16x128xf32>
    %149 = math.exp %148 : vector<16x128xf32>
    %cst_43 = arith.constant 1.000000e+00 : f32
    %150 = vector.broadcast %cst_43 : f32 to vector<16x128xf32>
    %151 = arith.addf %150, %149 : vector<16x128xf32>
    %152 = arith.divf %150, %151 : vector<16x128xf32>
    %153 = vector.extract_strided_slice %138 {offsets = [0, 128], sizes = [16, 128], strides = [1, 1]} : vector<16x384xf32> to vector<16x128xf32>
    %154 = vector.extract_strided_slice %144 {offsets = [0, 128], sizes = [16, 128], strides = [1, 1]} : vector<16x384xf32> to vector<16x128xf32>
    %155 = arith.addf %153, %154 : vector<16x128xf32>
    %156 = arith.negf %155 : vector<16x128xf32>
    %157 = math.exp %156 : vector<16x128xf32>
    %cst_44 = arith.constant 1.000000e+00 : f32
    %158 = vector.broadcast %cst_44 : f32 to vector<16x128xf32>
    %159 = arith.addf %158, %157 : vector<16x128xf32>
    %160 = arith.divf %158, %159 : vector<16x128xf32>
    %161 = vector.extract_strided_slice %138 {offsets = [0, 256], sizes = [16, 128], strides = [1, 1]} : vector<16x384xf32> to vector<16x128xf32>
    %162 = vector.extract_strided_slice %144 {offsets = [0, 256], sizes = [16, 128], strides = [1, 1]} : vector<16x384xf32> to vector<16x128xf32>
    %163 = arith.mulf %152, %162 : vector<16x128xf32>
    %164 = arith.addf %161, %163 : vector<16x128xf32>
    %165 = math.tanh %164 : vector<16x128xf32>
    %cst_45 = arith.constant 1.000000e+00 : f32
    %166 = vector.broadcast %cst_45 : f32 to vector<16x128xf32>
    %167 = arith.subf %166, %160 : vector<16x128xf32>
    %168 = arith.mulf %167, %165 : vector<16x128xf32>
    %169 = arith.mulf %160, %0 : vector<16x128xf32>
    %170 = arith.addf %168, %169 : vector<16x128xf32>
    %c1_i32 = arith.constant 1 : i32
    %c0_46 = arith.constant 0 : index
    %c0_47 = arith.constant 0 : index
    %171 = vector.load %arg2[%c0_46, %c0_47] : memref<16x16xbf16, #tpu.memory_space<vmem>>, vector<16x16xbf16>
    %172 = arith.truncf %170 : vector<16x128xf32> to vector<16x128xbf16>
    %cst_48 = arith.constant dense<0.000000e+00> : vector<16x128xf32>
    %173 = tpu.matmul %171, %172, %cst_48 {dimension_numbers = #tpu.dot_dimension_numbers<[1], [0], [0], [1], [0, 0, 1, 1], [], []>} : vector<16x16xbf16>, vector<16x128xbf16>, vector<16x128xf32> -> vector<16x128xf32>
    %c0_49 = arith.constant 0 : index
    %c0_50 = arith.constant 0 : index
    %174 = vector.load %arg4[%c0_49, %c0_50] : memref<128x1152xbf16, #tpu.memory_space<vmem>>, vector<128x1152xbf16>
    %175 = arith.truncf %173 : vector<16x128xf32> to vector<16x128xbf16>
    %cst_51 = arith.constant dense<0.000000e+00> : vector<16x1152xf32>
    %176 = tpu.matmul %175, %174, %cst_51 {dimension_numbers = #tpu.dot_dimension_numbers<[1], [0], [0], [1], [0, 0, 1, 1], [], []>} : vector<16x128xbf16>, vector<128x1152xbf16>, vector<16x1152xf32> -> vector<16x1152xf32>
    %c0_52 = arith.constant 0 : index
    %c0_53 = arith.constant 0 : index
    %177 = vector.load %arg1[%c0_52, %c0_53] : memref<16x9xf32, #tpu.memory_space<vmem>>, vector<16x9xf32>
    %178 = vector.extract_strided_slice %177 {offsets = [0, 0], sizes = [16, 1], strides = [1, 1]} : vector<16x9xf32> to vector<16x1xf32>
    %179 = vector.extract_strided_slice %176 {offsets = [0, 0], sizes = [16, 128], strides = [1, 1]} : vector<16x1152xf32> to vector<16x128xf32>
    %180 = vector.broadcast %178 : vector<16x1xf32> to vector<16x128xf32>
    %181 = arith.mulf %180, %179 : vector<16x128xf32>
    %182 = vector.extract_strided_slice %177 {offsets = [0, 1], sizes = [16, 1], strides = [1, 1]} : vector<16x9xf32> to vector<16x1xf32>
    %183 = vector.extract_strided_slice %176 {offsets = [0, 128], sizes = [16, 128], strides = [1, 1]} : vector<16x1152xf32> to vector<16x128xf32>
    %184 = vector.broadcast %182 : vector<16x1xf32> to vector<16x128xf32>
    %185 = arith.mulf %184, %183 : vector<16x128xf32>
    %186 = arith.addf %181, %185 : vector<16x128xf32>
    %187 = vector.extract_strided_slice %177 {offsets = [0, 2], sizes = [16, 1], strides = [1, 1]} : vector<16x9xf32> to vector<16x1xf32>
    %188 = vector.extract_strided_slice %176 {offsets = [0, 256], sizes = [16, 128], strides = [1, 1]} : vector<16x1152xf32> to vector<16x128xf32>
    %189 = vector.broadcast %187 : vector<16x1xf32> to vector<16x128xf32>
    %190 = arith.mulf %189, %188 : vector<16x128xf32>
    %191 = arith.addf %186, %190 : vector<16x128xf32>
    %192 = vector.extract_strided_slice %177 {offsets = [0, 3], sizes = [16, 1], strides = [1, 1]} : vector<16x9xf32> to vector<16x1xf32>
    %193 = vector.extract_strided_slice %176 {offsets = [0, 384], sizes = [16, 128], strides = [1, 1]} : vector<16x1152xf32> to vector<16x128xf32>
    %194 = vector.broadcast %192 : vector<16x1xf32> to vector<16x128xf32>
    %195 = arith.mulf %194, %193 : vector<16x128xf32>
    %196 = arith.addf %191, %195 : vector<16x128xf32>
    %197 = vector.extract_strided_slice %177 {offsets = [0, 4], sizes = [16, 1], strides = [1, 1]} : vector<16x9xf32> to vector<16x1xf32>
    %198 = vector.extract_strided_slice %176 {offsets = [0, 512], sizes = [16, 128], strides = [1, 1]} : vector<16x1152xf32> to vector<16x128xf32>
    %199 = vector.broadcast %197 : vector<16x1xf32> to vector<16x128xf32>
    %200 = arith.mulf %199, %198 : vector<16x128xf32>
    %201 = arith.addf %196, %200 : vector<16x128xf32>
    %202 = vector.extract_strided_slice %177 {offsets = [0, 5], sizes = [16, 1], strides = [1, 1]} : vector<16x9xf32> to vector<16x1xf32>
    %203 = vector.extract_strided_slice %176 {offsets = [0, 640], sizes = [16, 128], strides = [1, 1]} : vector<16x1152xf32> to vector<16x128xf32>
    %204 = vector.broadcast %202 : vector<16x1xf32> to vector<16x128xf32>
    %205 = arith.mulf %204, %203 : vector<16x128xf32>
    %206 = arith.addf %201, %205 : vector<16x128xf32>
    %207 = vector.extract_strided_slice %177 {offsets = [0, 6], sizes = [16, 1], strides = [1, 1]} : vector<16x9xf32> to vector<16x1xf32>
    %208 = vector.extract_strided_slice %176 {offsets = [0, 768], sizes = [16, 128], strides = [1, 1]} : vector<16x1152xf32> to vector<16x128xf32>
    %209 = vector.broadcast %207 : vector<16x1xf32> to vector<16x128xf32>
    %210 = arith.mulf %209, %208 : vector<16x128xf32>
    %211 = arith.addf %206, %210 : vector<16x128xf32>
    %212 = vector.extract_strided_slice %177 {offsets = [0, 7], sizes = [16, 1], strides = [1, 1]} : vector<16x9xf32> to vector<16x1xf32>
    %213 = vector.extract_strided_slice %176 {offsets = [0, 896], sizes = [16, 128], strides = [1, 1]} : vector<16x1152xf32> to vector<16x128xf32>
    %214 = vector.broadcast %212 : vector<16x1xf32> to vector<16x128xf32>
    %215 = arith.mulf %214, %213 : vector<16x128xf32>
    %216 = arith.addf %211, %215 : vector<16x128xf32>
    %217 = vector.extract_strided_slice %177 {offsets = [0, 8], sizes = [16, 1], strides = [1, 1]} : vector<16x9xf32> to vector<16x1xf32>
    %218 = vector.extract_strided_slice %176 {offsets = [0, 1024], sizes = [16, 128], strides = [1, 1]} : vector<16x1152xf32> to vector<16x128xf32>
    %219 = vector.broadcast %217 : vector<16x1xf32> to vector<16x128xf32>
    %220 = arith.mulf %219, %218 : vector<16x128xf32>
    %221 = arith.addf %216, %220 : vector<16x128xf32>
    %c0_54 = arith.constant 0 : index
    %c0_55 = arith.constant 0 : index
    %222 = vector.load %arg3[%c0_54, %c0_55] : memref<16x16xbf16, #tpu.memory_space<vmem>>, vector<16x16xbf16>
    %223 = arith.truncf %221 : vector<16x128xf32> to vector<16x128xbf16>
    %cst_56 = arith.constant dense<0.000000e+00> : vector<16x128xf32>
    %224 = tpu.matmul %222, %223, %cst_56 {dimension_numbers = #tpu.dot_dimension_numbers<[1], [0], [0], [1], [0, 0, 1, 1], [], []>} : vector<16x16xbf16>, vector<16x128xbf16>, vector<16x128xf32> -> vector<16x128xf32>
    %c0_57 = arith.constant 0 : index
    %c0_58 = arith.constant 0 : index
    %225 = vector.load %arg6[%c0_57, %c0_58] : memref<16x16xbf16, #tpu.memory_space<vmem>>, vector<16x16xbf16>
    %226 = arith.truncf %224 : vector<16x128xf32> to vector<16x128xbf16>
    %cst_59 = arith.constant dense<0.000000e+00> : vector<16x128xf32>
    %227 = tpu.matmul %225, %226, %cst_59 {dimension_numbers = #tpu.dot_dimension_numbers<[1], [0], [0], [1], [0, 0, 1, 1], [], []>} : vector<16x16xbf16>, vector<16x128xbf16>, vector<16x128xf32> -> vector<16x128xf32>
    %c0_60 = arith.constant 0 : index
    %c0_61 = arith.constant 0 : index
    %228 = vector.load %arg8[%c0_60, %c0_61] : memref<128x896xbf16, #tpu.memory_space<vmem>>, vector<128x896xbf16>
    %229 = arith.truncf %227 : vector<16x128xf32> to vector<16x128xbf16>
    %cst_62 = arith.constant dense<0.000000e+00> : vector<16x896xf32>
    %230 = tpu.matmul %229, %228, %cst_62 {dimension_numbers = #tpu.dot_dimension_numbers<[1], [0], [0], [1], [0, 0, 1, 1], [], []>} : vector<16x128xbf16>, vector<128x896xbf16>, vector<16x896xf32> -> vector<16x896xf32>
    %c0_63 = arith.constant 0 : index
    %c0_64 = arith.constant 0 : index
    %231 = vector.load %arg5[%c0_63, %c0_64] : memref<16x7xf32, #tpu.memory_space<vmem>>, vector<16x7xf32>
    %232 = vector.extract_strided_slice %231 {offsets = [0, 0], sizes = [16, 1], strides = [1, 1]} : vector<16x7xf32> to vector<16x1xf32>
    %233 = vector.extract_strided_slice %230 {offsets = [0, 0], sizes = [16, 128], strides = [1, 1]} : vector<16x896xf32> to vector<16x128xf32>
    %234 = vector.broadcast %232 : vector<16x1xf32> to vector<16x128xf32>
    %235 = arith.mulf %234, %233 : vector<16x128xf32>
    %236 = vector.extract_strided_slice %231 {offsets = [0, 1], sizes = [16, 1], strides = [1, 1]} : vector<16x7xf32> to vector<16x1xf32>
    %237 = vector.extract_strided_slice %230 {offsets = [0, 128], sizes = [16, 128], strides = [1, 1]} : vector<16x896xf32> to vector<16x128xf32>
    %238 = vector.broadcast %236 : vector<16x1xf32> to vector<16x128xf32>
    %239 = arith.mulf %238, %237 : vector<16x128xf32>
    %240 = arith.addf %235, %239 : vector<16x128xf32>
    %241 = vector.extract_strided_slice %231 {offsets = [0, 2], sizes = [16, 1], strides = [1, 1]} : vector<16x7xf32> to vector<16x1xf32>
    %242 = vector.extract_strided_slice %230 {offsets = [0, 256], sizes = [16, 128], strides = [1, 1]} : vector<16x896xf32> to vector<16x128xf32>
    %243 = vector.broadcast %241 : vector<16x1xf32> to vector<16x128xf32>
    %244 = arith.mulf %243, %242 : vector<16x128xf32>
    %245 = arith.addf %240, %244 : vector<16x128xf32>
    %246 = vector.extract_strided_slice %231 {offsets = [0, 3], sizes = [16, 1], strides = [1, 1]} : vector<16x7xf32> to vector<16x1xf32>
    %247 = vector.extract_strided_slice %230 {offsets = [0, 384], sizes = [16, 128], strides = [1, 1]} : vector<16x896xf32> to vector<16x128xf32>
    %248 = vector.broadcast %246 : vector<16x1xf32> to vector<16x128xf32>
    %249 = arith.mulf %248, %247 : vector<16x128xf32>
    %250 = arith.addf %245, %249 : vector<16x128xf32>
    %251 = vector.extract_strided_slice %231 {offsets = [0, 4], sizes = [16, 1], strides = [1, 1]} : vector<16x7xf32> to vector<16x1xf32>
    %252 = vector.extract_strided_slice %230 {offsets = [0, 512], sizes = [16, 128], strides = [1, 1]} : vector<16x896xf32> to vector<16x128xf32>
    %253 = vector.broadcast %251 : vector<16x1xf32> to vector<16x128xf32>
    %254 = arith.mulf %253, %252 : vector<16x128xf32>
    %255 = arith.addf %250, %254 : vector<16x128xf32>
    %256 = vector.extract_strided_slice %231 {offsets = [0, 5], sizes = [16, 1], strides = [1, 1]} : vector<16x7xf32> to vector<16x1xf32>
    %257 = vector.extract_strided_slice %230 {offsets = [0, 640], sizes = [16, 128], strides = [1, 1]} : vector<16x896xf32> to vector<16x128xf32>
    %258 = vector.broadcast %256 : vector<16x1xf32> to vector<16x128xf32>
    %259 = arith.mulf %258, %257 : vector<16x128xf32>
    %260 = arith.addf %255, %259 : vector<16x128xf32>
    %261 = vector.extract_strided_slice %231 {offsets = [0, 6], sizes = [16, 1], strides = [1, 1]} : vector<16x7xf32> to vector<16x1xf32>
    %262 = vector.extract_strided_slice %230 {offsets = [0, 768], sizes = [16, 128], strides = [1, 1]} : vector<16x896xf32> to vector<16x128xf32>
    %263 = vector.broadcast %261 : vector<16x1xf32> to vector<16x128xf32>
    %264 = arith.mulf %263, %262 : vector<16x128xf32>
    %265 = arith.addf %260, %264 : vector<16x128xf32>
    %c0_65 = arith.constant 0 : index
    %c0_66 = arith.constant 0 : index
    %266 = vector.load %arg7[%c0_65, %c0_66] : memref<16x16xbf16, #tpu.memory_space<vmem>>, vector<16x16xbf16>
    %267 = arith.truncf %265 : vector<16x128xf32> to vector<16x128xbf16>
    %cst_67 = arith.constant dense<0.000000e+00> : vector<16x128xf32>
    %268 = tpu.matmul %266, %267, %cst_67 {dimension_numbers = #tpu.dot_dimension_numbers<[1], [0], [0], [1], [0, 0, 1, 1], [], []>} : vector<16x16xbf16>, vector<16x128xbf16>, vector<16x128xf32> -> vector<16x128xf32>
    %c0_68 = arith.constant 0 : index
    %c0_69 = arith.constant 0 : index
    %269 = vector.load %arg10[%c0_68, %c0_69] : memref<8x16xbf16, #tpu.memory_space<vmem>>, vector<8x16xbf16>
    %270 = arith.truncf %268 : vector<16x128xf32> to vector<16x128xbf16>
    %cst_70 = arith.constant dense<0.000000e+00> : vector<8x128xf32>
    %271 = tpu.matmul %269, %270, %cst_70 {dimension_numbers = #tpu.dot_dimension_numbers<[1], [0], [0], [1], [0, 0, 1, 1], [], []>} : vector<8x16xbf16>, vector<16x128xbf16>, vector<8x128xf32> -> vector<8x128xf32>
    %c0_71 = arith.constant 0 : index
    %c0_72 = arith.constant 0 : index
    %272 = vector.load %arg12[%c0_71, %c0_72] : memref<128x640xbf16, #tpu.memory_space<vmem>>, vector<128x640xbf16>
    %273 = arith.truncf %271 : vector<8x128xf32> to vector<8x128xbf16>
    %cst_73 = arith.constant dense<0.000000e+00> : vector<8x640xf32>
    %274 = tpu.matmul %273, %272, %cst_73 {dimension_numbers = #tpu.dot_dimension_numbers<[1], [0], [0], [1], [0, 0, 1, 1], [], []>} : vector<8x128xbf16>, vector<128x640xbf16>, vector<8x640xf32> -> vector<8x640xf32>
    %c0_74 = arith.constant 0 : index
    %c0_75 = arith.constant 0 : index
    %275 = vector.load %arg9[%c0_74, %c0_75] : memref<8x5xf32, #tpu.memory_space<vmem>>, vector<8x5xf32>
    %276 = vector.extract_strided_slice %275 {offsets = [0, 0], sizes = [8, 1], strides = [1, 1]} : vector<8x5xf32> to vector<8x1xf32>
    %277 = vector.extract_strided_slice %274 {offsets = [0, 0], sizes = [8, 128], strides = [1, 1]} : vector<8x640xf32> to vector<8x128xf32>
    %278 = vector.broadcast %276 : vector<8x1xf32> to vector<8x128xf32>
    %279 = arith.mulf %278, %277 : vector<8x128xf32>
    %280 = vector.extract_strided_slice %275 {offsets = [0, 1], sizes = [8, 1], strides = [1, 1]} : vector<8x5xf32> to vector<8x1xf32>
    %281 = vector.extract_strided_slice %274 {offsets = [0, 128], sizes = [8, 128], strides = [1, 1]} : vector<8x640xf32> to vector<8x128xf32>
    %282 = vector.broadcast %280 : vector<8x1xf32> to vector<8x128xf32>
    %283 = arith.mulf %282, %281 : vector<8x128xf32>
    %284 = arith.addf %279, %283 : vector<8x128xf32>
    %285 = vector.extract_strided_slice %275 {offsets = [0, 2], sizes = [8, 1], strides = [1, 1]} : vector<8x5xf32> to vector<8x1xf32>
    %286 = vector.extract_strided_slice %274 {offsets = [0, 256], sizes = [8, 128], strides = [1, 1]} : vector<8x640xf32> to vector<8x128xf32>
    %287 = vector.broadcast %285 : vector<8x1xf32> to vector<8x128xf32>
    %288 = arith.mulf %287, %286 : vector<8x128xf32>
    %289 = arith.addf %284, %288 : vector<8x128xf32>
    %290 = vector.extract_strided_slice %275 {offsets = [0, 3], sizes = [8, 1], strides = [1, 1]} : vector<8x5xf32> to vector<8x1xf32>
    %291 = vector.extract_strided_slice %274 {offsets = [0, 384], sizes = [8, 128], strides = [1, 1]} : vector<8x640xf32> to vector<8x128xf32>
    %292 = vector.broadcast %290 : vector<8x1xf32> to vector<8x128xf32>
    %293 = arith.mulf %292, %291 : vector<8x128xf32>
    %294 = arith.addf %289, %293 : vector<8x128xf32>
    %295 = vector.extract_strided_slice %275 {offsets = [0, 4], sizes = [8, 1], strides = [1, 1]} : vector<8x5xf32> to vector<8x1xf32>
    %296 = vector.extract_strided_slice %274 {offsets = [0, 512], sizes = [8, 128], strides = [1, 1]} : vector<8x640xf32> to vector<8x128xf32>
    %297 = vector.broadcast %295 : vector<8x1xf32> to vector<8x128xf32>
    %298 = arith.mulf %297, %296 : vector<8x128xf32>
    %299 = arith.addf %294, %298 : vector<8x128xf32>
    %c0_76 = arith.constant 0 : index
    %c0_77 = arith.constant 0 : index
    %300 = vector.load %arg11[%c0_76, %c0_77] : memref<16x8xbf16, #tpu.memory_space<vmem>>, vector<16x8xbf16>
    %301 = arith.truncf %299 : vector<8x128xf32> to vector<8x128xbf16>
    %cst_78 = arith.constant dense<0.000000e+00> : vector<16x128xf32>
    %302 = tpu.matmul %300, %301, %cst_78 {dimension_numbers = #tpu.dot_dimension_numbers<[1], [0], [0], [1], [0, 0, 1, 1], [], []>} : vector<16x8xbf16>, vector<8x128xbf16>, vector<16x128xf32> -> vector<16x128xf32>
    %c0_79 = arith.constant 0 : index
    %c0_80 = arith.constant 0 : index
    %303 = vector.load %arg13[%c0_79, %c0_80] : memref<128x384xbf16, #tpu.memory_space<vmem>>, vector<128x384xbf16>
    %304 = arith.truncf %302 : vector<16x128xf32> to vector<16x128xbf16>
    %cst_81 = arith.constant dense<0.000000e+00> : vector<16x384xf32>
    %305 = tpu.matmul %304, %303, %cst_81 {dimension_numbers = #tpu.dot_dimension_numbers<[1], [0], [0], [1], [0, 0, 1, 1], [], []>} : vector<16x128xbf16>, vector<128x384xbf16>, vector<16x384xf32> -> vector<16x384xf32>
    %c0_82 = arith.constant 0 : index
    %c0_83 = arith.constant 0 : index
    %306 = vector.load %arg15[%c0_82, %c0_83] : memref<1x384xf32, #tpu.memory_space<vmem>>, vector<1x384xf32>
    %307 = vector.broadcast %306 : vector<1x384xf32> to vector<16x384xf32>
    %308 = arith.addf %305, %307 : vector<16x384xf32>
    %c0_84 = arith.constant 0 : index
    %c0_85 = arith.constant 0 : index
    %309 = vector.load %arg14[%c0_84, %c0_85] : memref<128x384xbf16, #tpu.memory_space<vmem>>, vector<128x384xbf16>
    %310 = arith.truncf %170 : vector<16x128xf32> to vector<16x128xbf16>
    %cst_86 = arith.constant dense<0.000000e+00> : vector<16x384xf32>
    %311 = tpu.matmul %310, %309, %cst_86 {dimension_numbers = #tpu.dot_dimension_numbers<[1], [0], [0], [1], [0, 0, 1, 1], [], []>} : vector<16x128xbf16>, vector<128x384xbf16>, vector<16x384xf32> -> vector<16x384xf32>
    %c0_87 = arith.constant 0 : index
    %c0_88 = arith.constant 0 : index
    %312 = vector.load %arg16[%c0_87, %c0_88] : memref<1x384xf32, #tpu.memory_space<vmem>>, vector<1x384xf32>
    %313 = vector.broadcast %312 : vector<1x384xf32> to vector<16x384xf32>
    %314 = arith.addf %311, %313 : vector<16x384xf32>
    %315 = vector.extract_strided_slice %308 {offsets = [0, 0], sizes = [16, 128], strides = [1, 1]} : vector<16x384xf32> to vector<16x128xf32>
    %316 = vector.extract_strided_slice %314 {offsets = [0, 0], sizes = [16, 128], strides = [1, 1]} : vector<16x384xf32> to vector<16x128xf32>
    %317 = arith.addf %315, %316 : vector<16x128xf32>
    %318 = arith.negf %317 : vector<16x128xf32>
    %319 = math.exp %318 : vector<16x128xf32>
    %cst_89 = arith.constant 1.000000e+00 : f32
    %320 = vector.broadcast %cst_89 : f32 to vector<16x128xf32>
    %321 = arith.addf %320, %319 : vector<16x128xf32>
    %322 = arith.divf %320, %321 : vector<16x128xf32>
    %323 = vector.extract_strided_slice %308 {offsets = [0, 128], sizes = [16, 128], strides = [1, 1]} : vector<16x384xf32> to vector<16x128xf32>
    %324 = vector.extract_strided_slice %314 {offsets = [0, 128], sizes = [16, 128], strides = [1, 1]} : vector<16x384xf32> to vector<16x128xf32>
    %325 = arith.addf %323, %324 : vector<16x128xf32>
    %326 = arith.negf %325 : vector<16x128xf32>
    %327 = math.exp %326 : vector<16x128xf32>
    %cst_90 = arith.constant 1.000000e+00 : f32
    %328 = vector.broadcast %cst_90 : f32 to vector<16x128xf32>
    %329 = arith.addf %328, %327 : vector<16x128xf32>
    %330 = arith.divf %328, %329 : vector<16x128xf32>
    %331 = vector.extract_strided_slice %308 {offsets = [0, 256], sizes = [16, 128], strides = [1, 1]} : vector<16x384xf32> to vector<16x128xf32>
    %332 = vector.extract_strided_slice %314 {offsets = [0, 256], sizes = [16, 128], strides = [1, 1]} : vector<16x384xf32> to vector<16x128xf32>
    %333 = arith.mulf %322, %332 : vector<16x128xf32>
    %334 = arith.addf %331, %333 : vector<16x128xf32>
    %335 = math.tanh %334 : vector<16x128xf32>
    %cst_91 = arith.constant 1.000000e+00 : f32
    %336 = vector.broadcast %cst_91 : f32 to vector<16x128xf32>
    %337 = arith.subf %336, %330 : vector<16x128xf32>
    %338 = arith.mulf %337, %335 : vector<16x128xf32>
    %339 = arith.mulf %330, %170 : vector<16x128xf32>
    %340 = arith.addf %338, %339 : vector<16x128xf32>
    %c0_92 = arith.constant 0 : index
    %c0_93 = arith.constant 0 : index
    %341 = vector.load %arg17[%c0_92, %c0_93] : memref<16x128xf32, #tpu.memory_space<vmem>>, vector<16x128xf32>
    tpu.vector_store %arg17[%c0_92, %c0_93], %340 {strides = array<i32>} : memref<16x128xf32, #tpu.memory_space<vmem>>, vector<16x128xf32>,
    return
  }
}

module attributes {stable_mosaic.version = 11 : i64} {
  func.func @_readout_kernel(%arg0: memref<16x128xf32, #tpu.memory_space<vmem>>, %arg1: memref<16x16xf32, #tpu.memory_space<vmem>>, %arg2: memref<8x128xf32, #tpu.memory_space<vmem>>, %arg3: memref<128x384xbf16, #tpu.memory_space<vmem>>, %arg4: memref<1x384xf32, #tpu.memory_space<vmem>>, %arg5: memref<128x128xbf16, #tpu.memory_space<vmem>>, %arg6: memref<1x128xf32, #tpu.memory_space<vmem>>, %arg7: memref<128x128xbf16, #tpu.memory_space<vmem>>, %arg8: memref<1x128xf32, #tpu.memory_space<vmem>>, %arg9: memref<128x128xbf16, #tpu.memory_space<vmem>>, %arg10: memref<1x128xf32, #tpu.memory_space<vmem>>, %arg11: memref<16x128xf32, #tpu.memory_space<vmem>>) attributes {dimension_semantics = [], scalar_prefetch = 0 : i64, scratch_operands = 0 : i64, tpu.core_type = #tpu.core_type<tc>} {
    %c0 = arith.constant 0 : index
    %c0_0 = arith.constant 0 : index
    %0 = vector.load %arg0[%c0, %c0_0] : memref<16x128xf32, #tpu.memory_space<vmem>>, vector<16x128xf32>
    %c0_1 = arith.constant 0 : index
    %c0_2 = arith.constant 0 : index
    %1 = vector.load %arg3[%c0_1, %c0_2] : memref<128x384xbf16, #tpu.memory_space<vmem>>, vector<128x384xbf16>
    %2 = arith.truncf %0 : vector<16x128xf32> to vector<16x128xbf16>
    %cst = arith.constant dense<0.000000e+00> : vector<16x384xf32>
    %3 = tpu.matmul %2, %1, %cst {dimension_numbers = #tpu.dot_dimension_numbers<[1], [0], [0], [1], [0, 0, 1, 1], [], []>} : vector<16x128xbf16>, vector<128x384xbf16>, vector<16x384xf32> -> vector<16x384xf32>
    %c0_3 = arith.constant 0 : index
    %c0_4 = arith.constant 0 : index
    %4 = vector.load %arg4[%c0_3, %c0_4] : memref<1x384xf32, #tpu.memory_space<vmem>>, vector<1x384xf32>
    %5 = vector.broadcast %4 : vector<1x384xf32> to vector<16x384xf32>
    %6 = arith.addf %3, %5 : vector<16x384xf32>
    %7 = vector.extract_strided_slice %6 {offsets = [0, 0], sizes = [16, 128], strides = [1, 1]} : vector<16x384xf32> to vector<16x128xf32>
    %cst_5 = arith.constant 0.353553385 : f32
    %8 = vector.broadcast %cst_5 : f32 to vector<16x128xf32>
    %9 = arith.mulf %7, %8 : vector<16x128xf32>
    %10 = vector.extract_strided_slice %6 {offsets = [0, 128], sizes = [16, 128], strides = [1, 1]} : vector<16x384xf32> to vector<16x128xf32>
    %11 = arith.truncf %10 : vector<16x128xf32> to vector<16x128xbf16>
    %12 = vector.extract_strided_slice %6 {offsets = [0, 256], sizes = [16, 128], strides = [1, 1]} : vector<16x384xf32> to vector<16x128xf32>
    %13 = arith.truncf %12 : vector<16x128xf32> to vector<16x128xbf16>
    %c0_6 = arith.constant 0 : index
    %c0_7 = arith.constant 0 : index
    %14 = vector.load %arg1[%c0_6, %c0_7] : memref<16x16xf32, #tpu.memory_space<vmem>>, vector<16x16xf32>
    %cst_8 = arith.constant 0.000000e+00 : f32
    %15 = vector.broadcast %cst_8 : f32 to vector<16x128xf32>
    %c0_9 = arith.constant 0 : index
    %c0_10 = arith.constant 0 : index
    %16 = vector.load %arg2[%c0_9, %c0_10] : memref<8x128xf32, #tpu.memory_space<vmem>>, vector<1x128xf32>
    %17 = vector.broadcast %16 : vector<1x128xf32> to vector<16x128xf32>
    %18 = arith.mulf %9, %17 : vector<16x128xf32>
    %19 = arith.truncf %18 : vector<16x128xf32> to vector<16x128xbf16>
    %cst_11 = arith.constant dense<0.000000e+00> : vector<16x16xf32>
    %20 = tpu.matmul %19, %11, %cst_11 {dimension_numbers = #tpu.dot_dimension_numbers<[1], [1], [0], [0], [0, 0, 1, 0], [], []>} : vector<16x128xbf16>, vector<16x128xbf16>, vector<16x16xf32> -> vector<16x16xf32>
    %21 = arith.addf %20, %14 : vector<16x16xf32>
    %cst_12 = arith.constant dense<0xFF800000> : vector<16xf32>
    %22 = vector.multi_reduction <maximumf>, %21, %cst_12 [1] : vector<16x16xf32> to vector<16xf32>
    %23 = vector.shape_cast %22 : vector<16xf32> to vector<16x1xf32>
    %24 = vector.broadcast %23 : vector<16x1xf32> to vector<16x16xf32>
    %25 = arith.subf %21, %24 : vector<16x16xf32>
    %26 = math.exp %25 : vector<16x16xf32>
    %cst_13 = arith.constant dense<0.000000e+00> : vector<16xf32>
    %27 = vector.multi_reduction <add>, %26, %cst_13 [1] : vector<16x16xf32> to vector<16xf32>
    %28 = vector.shape_cast %27 : vector<16xf32> to vector<16x1xf32>
    %29 = tpu.reciprocal %28 {approx = true} : vector<16x1xf32> -> vector<16x1xf32>
    %30 = vector.broadcast %29 : vector<16x1xf32> to vector<16x16xf32>
    %31 = arith.mulf %26, %30 : vector<16x16xf32>
    %32 = arith.truncf %31 : vector<16x16xf32> to vector<16x16xbf16>
    %cst_14 = arith.constant dense<0.000000e+00> : vector<16x128xf32>
    %33 = tpu.matmul %32, %13, %cst_14 {dimension_numbers = #tpu.dot_dimension_numbers<[1], [0], [0], [1], [0, 0, 1, 1], [], []>} : vector<16x16xbf16>, vector<16x128xbf16>, vector<16x128xf32> -> vector<16x128xf32>
    %34 = vector.broadcast %16 : vector<1x128xf32> to vector<16x128xf32>
    %35 = arith.mulf %33, %34 : vector<16x128xf32>
    %36 = arith.addf %15, %35 : vector<16x128xf32>
    %c1 = arith.constant 1 : index
    %c0_15 = arith.constant 0 : index
    %37 = vector.load %arg2[%c1, %c0_15] : memref<8x128xf32, #tpu.memory_space<vmem>>, vector<1x128xf32>
    %38 = vector.broadcast %37 : vector<1x128xf32> to vector<16x128xf32>
    %39 = arith.mulf %9, %38 : vector<16x128xf32>
    %40 = arith.truncf %39 : vector<16x128xf32> to vector<16x128xbf16>
    %cst_16 = arith.constant dense<0.000000e+00> : vector<16x16xf32>
    %41 = tpu.matmul %40, %11, %cst_16 {dimension_numbers = #tpu.dot_dimension_numbers<[1], [1], [0], [0], [0, 0, 1, 0], [], []>} : vector<16x128xbf16>, vector<16x128xbf16>, vector<16x16xf32> -> vector<16x16xf32>
    %42 = arith.addf %41, %14 : vector<16x16xf32>
    %cst_17 = arith.constant dense<0xFF800000> : vector<16xf32>
    %43 = vector.multi_reduction <maximumf>, %42, %cst_17 [1] : vector<16x16xf32> to vector<16xf32>
    %44 = vector.shape_cast %43 : vector<16xf32> to vector<16x1xf32>
    %45 = vector.broadcast %44 : vector<16x1xf32> to vector<16x16xf32>
    %46 = arith.subf %42, %45 : vector<16x16xf32>
    %47 = math.exp %46 : vector<16x16xf32>
    %cst_18 = arith.constant dense<0.000000e+00> : vector<16xf32>
    %48 = vector.multi_reduction <add>, %47, %cst_18 [1] : vector<16x16xf32> to vector<16xf32>
    %49 = vector.shape_cast %48 : vector<16xf32> to vector<16x1xf32>
    %50 = tpu.reciprocal %49 {approx = true} : vector<16x1xf32> -> vector<16x1xf32>
    %51 = vector.broadcast %50 : vector<16x1xf32> to vector<16x16xf32>
    %52 = arith.mulf %47, %51 : vector<16x16xf32>
    %53 = arith.truncf %52 : vector<16x16xf32> to vector<16x16xbf16>
    %cst_19 = arith.constant dense<0.000000e+00> : vector<16x128xf32>
    %54 = tpu.matmul %53, %13, %cst_19 {dimension_numbers = #tpu.dot_dimension_numbers<[1], [0], [0], [1], [0, 0, 1, 1], [], []>} : vector<16x16xbf16>, vector<16x128xbf16>, vector<16x128xf32> -> vector<16x128xf32>
    %55 = vector.broadcast %37 : vector<1x128xf32> to vector<16x128xf32>
    %56 = arith.mulf %54, %55 : vector<16x128xf32>
    %57 = arith.addf %36, %56 : vector<16x128xf32>
    %c2 = arith.constant 2 : index
    %c0_20 = arith.constant 0 : index
    %58 = vector.load %arg2[%c2, %c0_20] : memref<8x128xf32, #tpu.memory_space<vmem>>, vector<1x128xf32>
    %59 = vector.broadcast %58 : vector<1x128xf32> to vector<16x128xf32>
    %60 = arith.mulf %9, %59 : vector<16x128xf32>
    %61 = arith.truncf %60 : vector<16x128xf32> to vector<16x128xbf16>
    %cst_21 = arith.constant dense<0.000000e+00> : vector<16x16xf32>
    %62 = tpu.matmul %61, %11, %cst_21 {dimension_numbers = #tpu.dot_dimension_numbers<[1], [1], [0], [0], [0, 0, 1, 0], [], []>} : vector<16x128xbf16>, vector<16x128xbf16>, vector<16x16xf32> -> vector<16x16xf32>
    %63 = arith.addf %62, %14 : vector<16x16xf32>
    %cst_22 = arith.constant dense<0xFF800000> : vector<16xf32>
    %64 = vector.multi_reduction <maximumf>, %63, %cst_22 [1] : vector<16x16xf32> to vector<16xf32>
    %65 = vector.shape_cast %64 : vector<16xf32> to vector<16x1xf32>
    %66 = vector.broadcast %65 : vector<16x1xf32> to vector<16x16xf32>
    %67 = arith.subf %63, %66 : vector<16x16xf32>
    %68 = math.exp %67 : vector<16x16xf32>
    %cst_23 = arith.constant dense<0.000000e+00> : vector<16xf32>
    %69 = vector.multi_reduction <add>, %68, %cst_23 [1] : vector<16x16xf32> to vector<16xf32>
    %70 = vector.shape_cast %69 : vector<16xf32> to vector<16x1xf32>
    %71 = tpu.reciprocal %70 {approx = true} : vector<16x1xf32> -> vector<16x1xf32>
    %72 = vector.broadcast %71 : vector<16x1xf32> to vector<16x16xf32>
    %73 = arith.mulf %68, %72 : vector<16x16xf32>
    %74 = arith.truncf %73 : vector<16x16xf32> to vector<16x16xbf16>
    %cst_24 = arith.constant dense<0.000000e+00> : vector<16x128xf32>
    %75 = tpu.matmul %74, %13, %cst_24 {dimension_numbers = #tpu.dot_dimension_numbers<[1], [0], [0], [1], [0, 0, 1, 1], [], []>} : vector<16x16xbf16>, vector<16x128xbf16>, vector<16x128xf32> -> vector<16x128xf32>
    %76 = vector.broadcast %58 : vector<1x128xf32> to vector<16x128xf32>
    %77 = arith.mulf %75, %76 : vector<16x128xf32>
    %78 = arith.addf %57, %77 : vector<16x128xf32>
    %c3 = arith.constant 3 : index
    %c0_25 = arith.constant 0 : index
    %79 = vector.load %arg2[%c3, %c0_25] : memref<8x128xf32, #tpu.memory_space<vmem>>, vector<1x128xf32>
    %80 = vector.broadcast %79 : vector<1x128xf32> to vector<16x128xf32>
    %81 = arith.mulf %9, %80 : vector<16x128xf32>
    %82 = arith.truncf %81 : vector<16x128xf32> to vector<16x128xbf16>
    %cst_26 = arith.constant dense<0.000000e+00> : vector<16x16xf32>
    %83 = tpu.matmul %82, %11, %cst_26 {dimension_numbers = #tpu.dot_dimension_numbers<[1], [1], [0], [0], [0, 0, 1, 0], [], []>} : vector<16x128xbf16>, vector<16x128xbf16>, vector<16x16xf32> -> vector<16x16xf32>
    %84 = arith.addf %83, %14 : vector<16x16xf32>
    %cst_27 = arith.constant dense<0xFF800000> : vector<16xf32>
    %85 = vector.multi_reduction <maximumf>, %84, %cst_27 [1] : vector<16x16xf32> to vector<16xf32>
    %86 = vector.shape_cast %85 : vector<16xf32> to vector<16x1xf32>
    %87 = vector.broadcast %86 : vector<16x1xf32> to vector<16x16xf32>
    %88 = arith.subf %84, %87 : vector<16x16xf32>
    %89 = math.exp %88 : vector<16x16xf32>
    %cst_28 = arith.constant dense<0.000000e+00> : vector<16xf32>
    %90 = vector.multi_reduction <add>, %89, %cst_28 [1] : vector<16x16xf32> to vector<16xf32>
    %91 = vector.shape_cast %90 : vector<16xf32> to vector<16x1xf32>
    %92 = tpu.reciprocal %91 {approx = true} : vector<16x1xf32> -> vector<16x1xf32>
    %93 = vector.broadcast %92 : vector<16x1xf32> to vector<16x16xf32>
    %94 = arith.mulf %89, %93 : vector<16x16xf32>
    %95 = arith.truncf %94 : vector<16x16xf32> to vector<16x16xbf16>
    %cst_29 = arith.constant dense<0.000000e+00> : vector<16x128xf32>
    %96 = tpu.matmul %95, %13, %cst_29 {dimension_numbers = #tpu.dot_dimension_numbers<[1], [0], [0], [1], [0, 0, 1, 1], [], []>} : vector<16x16xbf16>, vector<16x128xbf16>, vector<16x128xf32> -> vector<16x128xf32>
    %97 = vector.broadcast %79 : vector<1x128xf32> to vector<16x128xf32>
    %98 = arith.mulf %96, %97 : vector<16x128xf32>
    %99 = arith.addf %78, %98 : vector<16x128xf32>
    %c4 = arith.constant 4 : index
    %c0_30 = arith.constant 0 : index
    %100 = vector.load %arg2[%c4, %c0_30] : memref<8x128xf32, #tpu.memory_space<vmem>>, vector<1x128xf32>
    %101 = vector.broadcast %100 : vector<1x128xf32> to vector<16x128xf32>
    %102 = arith.mulf %9, %101 : vector<16x128xf32>
    %103 = arith.truncf %102 : vector<16x128xf32> to vector<16x128xbf16>
    %cst_31 = arith.constant dense<0.000000e+00> : vector<16x16xf32>
    %104 = tpu.matmul %103, %11, %cst_31 {dimension_numbers = #tpu.dot_dimension_numbers<[1], [1], [0], [0], [0, 0, 1, 0], [], []>} : vector<16x128xbf16>, vector<16x128xbf16>, vector<16x16xf32> -> vector<16x16xf32>
    %105 = arith.addf %104, %14 : vector<16x16xf32>
    %cst_32 = arith.constant dense<0xFF800000> : vector<16xf32>
    %106 = vector.multi_reduction <maximumf>, %105, %cst_32 [1] : vector<16x16xf32> to vector<16xf32>
    %107 = vector.shape_cast %106 : vector<16xf32> to vector<16x1xf32>
    %108 = vector.broadcast %107 : vector<16x1xf32> to vector<16x16xf32>
    %109 = arith.subf %105, %108 : vector<16x16xf32>
    %110 = math.exp %109 : vector<16x16xf32>
    %cst_33 = arith.constant dense<0.000000e+00> : vector<16xf32>
    %111 = vector.multi_reduction <add>, %110, %cst_33 [1] : vector<16x16xf32> to vector<16xf32>
    %112 = vector.shape_cast %111 : vector<16xf32> to vector<16x1xf32>
    %113 = tpu.reciprocal %112 {approx = true} : vector<16x1xf32> -> vector<16x1xf32>
    %114 = vector.broadcast %113 : vector<16x1xf32> to vector<16x16xf32>
    %115 = arith.mulf %110, %114 : vector<16x16xf32>
    %116 = arith.truncf %115 : vector<16x16xf32> to vector<16x16xbf16>
    %cst_34 = arith.constant dense<0.000000e+00> : vector<16x128xf32>
    %117 = tpu.matmul %116, %13, %cst_34 {dimension_numbers = #tpu.dot_dimension_numbers<[1], [0], [0], [1], [0, 0, 1, 1], [], []>} : vector<16x16xbf16>, vector<16x128xbf16>, vector<16x128xf32> -> vector<16x128xf32>
    %118 = vector.broadcast %100 : vector<1x128xf32> to vector<16x128xf32>
    %119 = arith.mulf %117, %118 : vector<16x128xf32>
    %120 = arith.addf %99, %119 : vector<16x128xf32>
    %c5 = arith.constant 5 : index
    %c0_35 = arith.constant 0 : index
    %121 = vector.load %arg2[%c5, %c0_35] : memref<8x128xf32, #tpu.memory_space<vmem>>, vector<1x128xf32>
    %122 = vector.broadcast %121 : vector<1x128xf32> to vector<16x128xf32>
    %123 = arith.mulf %9, %122 : vector<16x128xf32>
    %124 = arith.truncf %123 : vector<16x128xf32> to vector<16x128xbf16>
    %cst_36 = arith.constant dense<0.000000e+00> : vector<16x16xf32>
    %125 = tpu.matmul %124, %11, %cst_36 {dimension_numbers = #tpu.dot_dimension_numbers<[1], [1], [0], [0], [0, 0, 1, 0], [], []>} : vector<16x128xbf16>, vector<16x128xbf16>, vector<16x16xf32> -> vector<16x16xf32>
    %126 = arith.addf %125, %14 : vector<16x16xf32>
    %cst_37 = arith.constant dense<0xFF800000> : vector<16xf32>
    %127 = vector.multi_reduction <maximumf>, %126, %cst_37 [1] : vector<16x16xf32> to vector<16xf32>
    %128 = vector.shape_cast %127 : vector<16xf32> to vector<16x1xf32>
    %129 = vector.broadcast %128 : vector<16x1xf32> to vector<16x16xf32>
    %130 = arith.subf %126, %129 : vector<16x16xf32>
    %131 = math.exp %130 : vector<16x16xf32>
    %cst_38 = arith.constant dense<0.000000e+00> : vector<16xf32>
    %132 = vector.multi_reduction <add>, %131, %cst_38 [1] : vector<16x16xf32> to vector<16xf32>
    %133 = vector.shape_cast %132 : vector<16xf32> to vector<16x1xf32>
    %134 = tpu.reciprocal %133 {approx = true} : vector<16x1xf32> -> vector<16x1xf32>
    %135 = vector.broadcast %134 : vector<16x1xf32> to vector<16x16xf32>
    %136 = arith.mulf %131, %135 : vector<16x16xf32>
    %137 = arith.truncf %136 : vector<16x16xf32> to vector<16x16xbf16>
    %cst_39 = arith.constant dense<0.000000e+00> : vector<16x128xf32>
    %138 = tpu.matmul %137, %13, %cst_39 {dimension_numbers = #tpu.dot_dimension_numbers<[1], [0], [0], [1], [0, 0, 1, 1], [], []>} : vector<16x16xbf16>, vector<16x128xbf16>, vector<16x128xf32> -> vector<16x128xf32>
    %139 = vector.broadcast %121 : vector<1x128xf32> to vector<16x128xf32>
    %140 = arith.mulf %138, %139 : vector<16x128xf32>
    %141 = arith.addf %120, %140 : vector<16x128xf32>
    %c6 = arith.constant 6 : index
    %c0_40 = arith.constant 0 : index
    %142 = vector.load %arg2[%c6, %c0_40] : memref<8x128xf32, #tpu.memory_space<vmem>>, vector<1x128xf32>
    %143 = vector.broadcast %142 : vector<1x128xf32> to vector<16x128xf32>
    %144 = arith.mulf %9, %143 : vector<16x128xf32>
    %145 = arith.truncf %144 : vector<16x128xf32> to vector<16x128xbf16>
    %cst_41 = arith.constant dense<0.000000e+00> : vector<16x16xf32>
    %146 = tpu.matmul %145, %11, %cst_41 {dimension_numbers = #tpu.dot_dimension_numbers<[1], [1], [0], [0], [0, 0, 1, 0], [], []>} : vector<16x128xbf16>, vector<16x128xbf16>, vector<16x16xf32> -> vector<16x16xf32>
    %147 = arith.addf %146, %14 : vector<16x16xf32>
    %cst_42 = arith.constant dense<0xFF800000> : vector<16xf32>
    %148 = vector.multi_reduction <maximumf>, %147, %cst_42 [1] : vector<16x16xf32> to vector<16xf32>
    %149 = vector.shape_cast %148 : vector<16xf32> to vector<16x1xf32>
    %150 = vector.broadcast %149 : vector<16x1xf32> to vector<16x16xf32>
    %151 = arith.subf %147, %150 : vector<16x16xf32>
    %152 = math.exp %151 : vector<16x16xf32>
    %cst_43 = arith.constant dense<0.000000e+00> : vector<16xf32>
    %153 = vector.multi_reduction <add>, %152, %cst_43 [1] : vector<16x16xf32> to vector<16xf32>
    %154 = vector.shape_cast %153 : vector<16xf32> to vector<16x1xf32>
    %155 = tpu.reciprocal %154 {approx = true} : vector<16x1xf32> -> vector<16x1xf32>
    %156 = vector.broadcast %155 : vector<16x1xf32> to vector<16x16xf32>
    %157 = arith.mulf %152, %156 : vector<16x16xf32>
    %158 = arith.truncf %157 : vector<16x16xf32> to vector<16x16xbf16>
    %cst_44 = arith.constant dense<0.000000e+00> : vector<16x128xf32>
    %159 = tpu.matmul %158, %13, %cst_44 {dimension_numbers = #tpu.dot_dimension_numbers<[1], [0], [0], [1], [0, 0, 1, 1], [], []>} : vector<16x16xbf16>, vector<16x128xbf16>, vector<16x128xf32> -> vector<16x128xf32>
    %160 = vector.broadcast %142 : vector<1x128xf32> to vector<16x128xf32>
    %161 = arith.mulf %159, %160 : vector<16x128xf32>
    %162 = arith.addf %141, %161 : vector<16x128xf32>
    %c7 = arith.constant 7 : index
    %c0_45 = arith.constant 0 : index
    %163 = vector.load %arg2[%c7, %c0_45] : memref<8x128xf32, #tpu.memory_space<vmem>>, vector<1x128xf32>
    %164 = vector.broadcast %163 : vector<1x128xf32> to vector<16x128xf32>
    %165 = arith.mulf %9, %164 : vector<16x128xf32>
    %166 = arith.truncf %165 : vector<16x128xf32> to vector<16x128xbf16>
    %cst_46 = arith.constant dense<0.000000e+00> : vector<16x16xf32>
    %167 = tpu.matmul %166, %11, %cst_46 {dimension_numbers = #tpu.dot_dimension_numbers<[1], [1], [0], [0], [0, 0, 1, 0], [], []>} : vector<16x128xbf16>, vector<16x128xbf16>, vector<16x16xf32> -> vector<16x16xf32>
    %168 = arith.addf %167, %14 : vector<16x16xf32>
    %cst_47 = arith.constant dense<0xFF800000> : vector<16xf32>
    %169 = vector.multi_reduction <maximumf>, %168, %cst_47 [1] : vector<16x16xf32> to vector<16xf32>
    %170 = vector.shape_cast %169 : vector<16xf32> to vector<16x1xf32>
    %171 = vector.broadcast %170 : vector<16x1xf32> to vector<16x16xf32>
    %172 = arith.subf %168, %171 : vector<16x16xf32>
    %173 = math.exp %172 : vector<16x16xf32>
    %cst_48 = arith.constant dense<0.000000e+00> : vector<16xf32>
    %174 = vector.multi_reduction <add>, %173, %cst_48 [1] : vector<16x16xf32> to vector<16xf32>
    %175 = vector.shape_cast %174 : vector<16xf32> to vector<16x1xf32>
    %176 = tpu.reciprocal %175 {approx = true} : vector<16x1xf32> -> vector<16x1xf32>
    %177 = vector.broadcast %176 : vector<16x1xf32> to vector<16x16xf32>
    %178 = arith.mulf %173, %177 : vector<16x16xf32>
    %179 = arith.truncf %178 : vector<16x16xf32> to vector<16x16xbf16>
    %cst_49 = arith.constant dense<0.000000e+00> : vector<16x128xf32>
    %180 = tpu.matmul %179, %13, %cst_49 {dimension_numbers = #tpu.dot_dimension_numbers<[1], [0], [0], [1], [0, 0, 1, 1], [], []>} : vector<16x16xbf16>, vector<16x128xbf16>, vector<16x128xf32> -> vector<16x128xf32>
    %181 = vector.broadcast %163 : vector<1x128xf32> to vector<16x128xf32>
    %182 = arith.mulf %180, %181 : vector<16x128xf32>
    %183 = arith.addf %162, %182 : vector<16x128xf32>
    %c0_50 = arith.constant 0 : index
    %c0_51 = arith.constant 0 : index
    %184 = vector.load %arg5[%c0_50, %c0_51] : memref<128x128xbf16, #tpu.memory_space<vmem>>, vector<128x128xbf16>
    %185 = arith.truncf %183 : vector<16x128xf32> to vector<16x128xbf16>
    %cst_52 = arith.constant dense<0.000000e+00> : vector<16x128xf32>
    %186 = tpu.matmul %185, %184, %cst_52 {dimension_numbers = #tpu.dot_dimension_numbers<[1], [0], [0], [1], [0, 0, 1, 1], [], []>} : vector<16x128xbf16>, vector<128x128xbf16>, vector<16x128xf32> -> vector<16x128xf32>
    %c0_53 = arith.constant 0 : index
    %c0_54 = arith.constant 0 : index
    %187 = vector.load %arg6[%c0_53, %c0_54] : memref<1x128xf32, #tpu.memory_space<vmem>>, vector<1x128xf32>
    %188 = vector.broadcast %187 : vector<1x128xf32> to vector<16x128xf32>
    %189 = arith.addf %186, %188 : vector<16x128xf32>
    %c0_55 = arith.constant 0 : index
    %c0_56 = arith.constant 0 : index
    %190 = vector.load %arg7[%c0_55, %c0_56] : memref<128x128xbf16, #tpu.memory_space<vmem>>, vector<128x128xbf16>
    %191 = arith.truncf %189 : vector<16x128xf32> to vector<16x128xbf16>
    %cst_57 = arith.constant dense<0.000000e+00> : vector<16x128xf32>
    %192 = tpu.matmul %191, %190, %cst_57 {dimension_numbers = #tpu.dot_dimension_numbers<[1], [0], [0], [1], [0, 0, 1, 1], [], []>} : vector<16x128xbf16>, vector<128x128xbf16>, vector<16x128xf32> -> vector<16x128xf32>
    %c0_58 = arith.constant 0 : index
    %c0_59 = arith.constant 0 : index
    %193 = vector.load %arg8[%c0_58, %c0_59] : memref<1x128xf32, #tpu.memory_space<vmem>>, vector<1x128xf32>
    %194 = vector.broadcast %193 : vector<1x128xf32> to vector<16x128xf32>
    %195 = arith.addf %192, %194 : vector<16x128xf32>
    %cst_60 = arith.constant 0.000000e+00 : f32
    %196 = vector.broadcast %cst_60 : f32 to vector<16x128xf32>
    %197 = arith.maximumf %195, %196 : vector<16x128xf32>
    %c0_61 = arith.constant 0 : index
    %c0_62 = arith.constant 0 : index
    %198 = vector.load %arg9[%c0_61, %c0_62] : memref<128x128xbf16, #tpu.memory_space<vmem>>, vector<128x128xbf16>
    %199 = arith.truncf %197 : vector<16x128xf32> to vector<16x128xbf16>
    %cst_63 = arith.constant dense<0.000000e+00> : vector<16x128xf32>
    %200 = tpu.matmul %199, %198, %cst_63 {dimension_numbers = #tpu.dot_dimension_numbers<[1], [0], [0], [1], [0, 0, 1, 1], [], []>} : vector<16x128xbf16>, vector<128x128xbf16>, vector<16x128xf32> -> vector<16x128xf32>
    %c0_64 = arith.constant 0 : index
    %c0_65 = arith.constant 0 : index
    %201 = vector.load %arg10[%c0_64, %c0_65] : memref<1x128xf32, #tpu.memory_space<vmem>>, vector<1x128xf32>
    %202 = vector.broadcast %201 : vector<1x128xf32> to vector<16x128xf32>
    %203 = arith.addf %200, %202 : vector<16x128xf32>
    %c0_66 = arith.constant 0 : index
    %c0_67 = arith.constant 0 : index
    %204 = vector.load %arg11[%c0_66, %c0_67] : memref<16x128xf32, #tpu.memory_space<vmem>>, vector<16x128xf32>
    tpu.vector_store %arg11[%c0_66, %c0_67], %203 {strides = array<i32>} : memref<16x128xf32, #tpu.memory_space<vmem>>, vector<16x128xf32>,
    return
  }
}

</mosaic_0001>

<bundles_post_ra>
// kernel: forward.3
= control target key start
LH: loop header
LB: loop body
LE: loop exit
PB: predicated region body
PF: predicated region fallthrough
CT: control target
= control target key end

     0   :  { %16 = vsyncpa [#allocation3], 0  ;;  %s1883_s0 = inlined_call_operand.vmem [shape: f32[16,128], index: 0, kind: input, shape index: {}]   ;;  %s1884_s1 = inlined_call_operand.vmem [shape: f32[16,16], index: 1, kind: input, shape index: {}]   ;;  %s1885_s2 = inlined_call_operand.vmem [shape: f32[8,128], index: 2, kind: input, shape index: {}]   ;;  %s1886_s3 = inlined_call_operand.hbm [shape: bf16[128,384], index: 3, kind: input, shape index: {}]   ;;  %s1887_s4 = inlined_call_operand.vmem [shape: f32[1,384], index: 4, kind: input, shape index: {}]   ;;  %s1888_s5 = inlined_call_operand.vmem [shape: bf16[128,128], index: 5, kind: input, shape index: {}]   ;;  %s1889_s6 = inlined_call_operand.vmem [shape: f32[1,128], index: 6, kind: input, shape index: {}]   ;;  %s1890_s7 = inlined_call_operand.vmem [shape: bf16[128,128], index: 7, kind: input, shape index: {}]   ;;  %s1891_s8 = inlined_call_operand.vmem [shape: f32[1,128], index: 8, kind: input, shape index: {}]   ;;  %s1892_s9 = inlined_call_operand.hbm [shape: bf16[128,128], index: 9, kind: input, shape index: {}]   ;;  %s1893_s10 = inlined_call_operand.vmem [shape: f32[1,128], index: 10, kind: input, shape index: {}]   ;;  %s1894_s11 = inlined_call_operand.vmem [shape: f32[16,128], index: 11, kind: output, shape index: {}]  }
   0x1   :  { %s28_s19 = sshll.u32 %s1886_s3, 4  ;;  %s29_s19 = int_to_ptr.hbm [resolvable:$true] %s28_s19 }
   0x2   :  { %17 = vsyncpa [#allocation5], 0  ;;  %s1435_s20 = smov [#allocation2]   ;;  %s51_s24 = sshll.u32 %s1892_s9, 4  ;;  %s52_s24 = int_to_ptr.hbm [resolvable:$true] %s51_s24 }
   0x3   :  { %s30_s21 = sshll.u32 %s1435_s20, 4  ;;  %s1436_s25 = smov 192   ;;  %s31_s21 = int_to_ptr.vmem [resolvable:$true] %s30_s21 }
   0x4   :  { %s1437_s26 = smov 12   ;;  %s1438_s27 = smov [#allocation4]  }
   0x5   :  { %36 = dma.hbm_to_vmem [thread:$0]  %s29_s19, 3072, %s31_s21, [#allocation3], %s1436_s25, %s1436_s25, %s1437_s26  }
   0x6   :  { %s53_s28 = sshll.u32 %s1438_s27, 4  ;;  %s1439_s29 = smov 64   ;;  %s54_s28 = int_to_ptr.vmem [resolvable:$true] %s53_s28 }
   0x7   :  { %s1440_s30 = smov 4  }
   0x8   :  { %59 = dma.hbm_to_vmem [thread:$0]  %s52_s24, 1024, %s54_s28, [#allocation5], %s1439_s29, %s1439_s29, %s1440_s30  }
   0x9   :  { %1431 = dma.done.wait [#allocation3], 3072  }
   0xa   :  { %1432 = vsyncadd [#allocation3], 4294964224 }
   0xb   :  { %1433 = dma.done.wait [#allocation5], 1024  }
   0xc   :  { %1434 = vsyncadd [#allocation5], 4294966272  ;;  %v1275_v0 = vld [vmem:[#allocation2 + $0xac] sm:$0xf]  ;;  %v1142_v1 = vld [vmem:[#allocation2 + $0xb4] sm:$0xf0] }
   0xd   :  { %v1148_v2 = vld [vmem:[#allocation2 + $0xb0] sm:$0xf]  ;;  %v1145_v3 = vor.u32 %v1275_v0, %v1142_v1  ;;  %v1277_v4 = vld [vmem:[#allocation2 + $0xb8] sm:$0xf0]  ;;  %v1140_v5 = vld [vmem:[#allocation2 + $0xa8] sm:$0xf] }
   0xe   :  { %v1276_v6 = vld [vmem:[#allocation2 + $0xb0] sm:$0xf0]  ;;  %v1149_v7 = vor.u32 %v1277_v4, %v1148_v2  ;;  %v1130_v10 = vld [vmem:[#allocation2 + $0x9c] sm:$0xf0]  ;;  %v1136_v11 = vld [vmem:[#allocation2 + $0x98] sm:$0xf] }
   0xf   :  { %v1141_v8 = vor.u32 %v1276_v6, %v1140_v5  ;;  %v1272_v9 = vld [vmem:[#allocation2 + $0x94] sm:$0xf]  ;;  %256 = vmatpush.bf16.msra.mxu1 %v1145_v3  ;;  %v1274_v13 = vld [vmem:[#allocation2 + $0xa0] sm:$0xf0]  ;;  %v1128_v14 = vld [vmem:[#allocation2 + $0x90] sm:$0xf] }
  0x10   :  { %v1133_v12 = vor.u32 %v1272_v9, %v1130_v10  ;;  %v1273_v15 = vld [vmem:[#allocation2 + $0x98] sm:$0xf0]  ;;  %270 = vmatpush.bf16.msra.mxu2 %v1149_v7  ;;  %v1137_v16 = vor.u32 %v1274_v13, %v1136_v11  ;;  %v1118_v19 = vld [vmem:[#allocation2 + $0x84] sm:$0xf0]  ;;  %v1124_v20 = vld [vmem:[#allocation2 + $0x80] sm:$0xf] }
  0x11   :  { %242 = vmatpush.bf16.msra.mxu0 %v1141_v8  ;;  %v1129_v17 = vor.u32 %v1273_v15, %v1128_v14  ;;  %v1269_v18 = vld [vmem:[#allocation2 + $0x7c] sm:$0xf]  ;;  %v1271_v21 = vld [vmem:[#allocation2 + $0x88] sm:$0xf0]  ;;  %v1116_v22 = vld [vmem:[#allocation2 + $0x78] sm:$0xf] }
  0x12   :  { %v1270_v23 = vld [vmem:[#allocation2 + $0x80] sm:$0xf0]  ;;  %v1121_v24 = vor.u32 %v1269_v18, %v1118_v19  ;;  %v1125_v25 = vor.u32 %v1271_v21, %v1124_v20  ;;  %v1106_v28 = vld [vmem:[#allocation2 + $0x6c] sm:$0xf0]  ;;  %v1112_v29 = vld [vmem:[#allocation2 + $0x68] sm:$0xf] }
  0x13   :  { %257 = vmatpush.bf16.msra.mxu1 %v1133_v12  ;;  %v1117_v26 = vor.u32 %v1270_v23, %v1116_v22  ;;  %v1266_v27 = vld [vmem:[#allocation2 + $0x64] sm:$0xf]  ;;  %v1268_v30 = vld [vmem:[#allocation2 + $0x70] sm:$0xf0]  ;;  %v1104_v31 = vld [vmem:[#allocation2 + $0x60] sm:$0xf] }
  0x14   :  { %271 = vmatpush.bf16.msra.mxu2 %v1137_v16  ;;  %v1267_v32 = vld [vmem:[#allocation2 + $0x68] sm:$0xf0]  ;;  %v1109_v33 = vor.u32 %v1266_v27, %v1106_v28  ;;  %v1113_v34 = vor.u32 %v1268_v30, %v1112_v29  ;;  %v1094_v37 = vld [vmem:[#allocation2 + $0x54] sm:$0xf0]  ;;  %v1100_v38 = vld [vmem:[#allocation2 + $0x50] sm:$0xf] }
  0x15   :  { %243 = vmatpush.bf16.msra.mxu0 %v1129_v17  ;;  %v1105_v35 = vor.u32 %v1267_v32, %v1104_v31  ;;  %v1263_v36 = vld [vmem:[#allocation2 + $0x4c] sm:$0xf]  ;;  %v1265_v39 = vld [vmem:[#allocation2 + $0x58] sm:$0xf0]  ;;  %v1092_v40 = vld [vmem:[#allocation2 + $0x48] sm:$0xf] }
  0x16   :  { %v1264_v41 = vld [vmem:[#allocation2 + $0x50] sm:$0xf0]  ;;  %v1097_v42 = vor.u32 %v1263_v36, %v1094_v37  ;;  %v1082_v44 = vld [vmem:[#allocation2 + $0x3c] sm:$0xf0]  ;;  %v1101_v45 = vor.u32 %v1265_v39, %v1100_v38  ;;  %v1088_v47 = vld [vmem:[#allocation2 + $0x38] sm:$0xf] }
  0x17   :  { %258 = vmatpush.bf16.msra.mxu1 %v1121_v24  ;;  %v1260_v43 = vld [vmem:[#allocation2 + $0x34] sm:$0xf]  ;;  %v1093_v46 = vor.u32 %v1264_v41, %v1092_v40  ;;  %v1262_v48 = vld [vmem:[#allocation2 + $0x40] sm:$0xf0]  ;;  %v1080_v49 = vld [vmem:[#allocation2 + $0x30] sm:$0xf] }
  0x18   :  { %272 = vmatpush.bf16.msra.mxu2 %v1125_v25  ;;  %v1261_v50 = vld [vmem:[#allocation2 + $0x38] sm:$0xf0]  ;;  %v1070_v52 = vld [vmem:[#allocation2 + $0x24] sm:$0xf0]  ;;  %v1085_v53 = vor.u32 %v1260_v43, %v1082_v44  ;;  %v1076_v54 = vld [vmem:[#allocation2 + $0x20] sm:$0xf]  ;;  %v1089_v55 = vor.u32 %v1262_v48, %v1088_v47 }
  0x19   :  { %244 = vmatpush.bf16.msra.mxu0 %v1117_v26  ;;  %v1257_v51 = vld [vmem:[#allocation2 + $0x1c] sm:$0xf]  ;;  %v1081_v56 = vor.u32 %v1261_v50, %v1080_v49  ;;  %v1259_v57 = vld [vmem:[#allocation2 + $0x28] sm:$0xf0]  ;;  %v1068_v58 = vld [vmem:[#allocation2 + $0x18] sm:$0xf] }
  0x1a   :  { %v1258_v59 = vld [vmem:[#allocation2 + $0x20] sm:$0xf0]  ;;  %v1073_v60 = vor.u32 %v1257_v51, %v1070_v52  ;;  %v1077_v61 = vor.u32 %v1259_v57, %v1076_v54  ;;  %v1058_v0 = vld [vmem:[#allocation2 + $0xc] sm:$0xf0]  ;;  %v1064_v1 = vld [vmem:[#allocation2 + $0x8] sm:$0xf] }
  0x1b   :  { %259 = vmatpush.bf16.msra.mxu1 %v1109_v33  ;;  %v1069_v62 = vor.u32 %v1258_v59, %v1068_v58  ;;  %v1254_v63 = vld [vmem:[#allocation2 + $0x4] sm:$0xf]  ;;  %v1256_v2 = vld [vmem:[#allocation2 + $0x10] sm:$0xf0]  ;;  %v1056_v3 = vld [vmem:[#allocation2] sm:$0xf] }
  0x1c   :  { %273 = vmatpush.bf16.msra.mxu2 %v1113_v34  ;;  %v1255_v4 = vld [vmem:[#allocation2 + $0x8] sm:$0xf0]  ;;  %v1061_v5 = vor.u32 %v1254_v63, %v1058_v0  ;;  %v71_v6 = vld [vmem:[%s1883_s0] sm:$0xff]  ;;  %v1065_v8 = vor.u32 %v1256_v2, %v1064_v1  ;;  %vm309_vm0 = vcmask 130048  }
  0x1d   :  { %245 = vmatpush.bf16.msra.mxu0 %v1105_v35  ;;  %v72_v7 = vld [vmem:[%s1883_s0 + $0x8] sm:$0xff]  ;;  %v1057_v9 = vor.u32 %v1255_v4, %v1056_v3  ;;  %v106_v11 = vld [vmem:[%s1887_s4] sm:$0x7]  ;;  %v1524_v24 = vld [vmem:[%s1885_s2 + $0x3] ss:$0 sm:$0xff] }
  0x1e   :  { %v105_v10 = vpack.c.bf16 %v72_v7, %v71_v6  ;;  %v108_v13 = vperm.slane %v106_v11, 0  ;;  %v109_v15 = vperm.slane %v106_v11, 1  ;;  %v1519_v23 = vld [vmem:[%s1885_s2 + $0x1] ss:$0 sm:$0xff]  ;;  %v110_v25 = vperm.slane %v106_v11, 2  ;;  %v1620_v3 = vld [vmem:[%s1884_s1 + $0x8] sm:$0xff] }
  0x1f   :  { %260 = vmatpush.bf16.msra.mxu1 %v1097_v42  ;;  %v1529_v27 = vld [vmem:[%s1885_s2 + $0x5] ss:$0 sm:$0xff]  ;;  %v1536_v29 = vld [vmem:[%s1885_s2] ss:$0 sm:$0xff]  ;;  %v1541_v31 = vld [vmem:[%s1885_s2 + $0x2] ss:$0 sm:$0xff] }
  0x20   :  { %274 = vmatpush.bf16.msra.mxu2 %v1101_v45  ;;  %v1546_v32 = vld [vmem:[%s1885_s2 + $0x7] ss:$0 sm:$0xff]  ;;  %v1606_v59 = vld [vmem:[%s1885_s2 + $0x6] ss:$0 sm:$0xff] }
  0x21   :  { %246 = vmatpush.bf16.msra.mxu0 %v1093_v46  ;;  %v1613_v63 = vld [vmem:[%s1884_s1] sm:$0xff] }
  0x23   :  { %261 = vmatpush.bf16.msra.mxu1 %v1085_v53 }
  0x24   :  { %275 = vmatpush.bf16.msra.mxu2 %v1089_v55  ;;  %v1599_v55 = vld [vmem:[%s1885_s2 + $0x4] ss:$0 sm:$0xff] }
  0x25   :  { %247 = vmatpush.bf16.msra.mxu0 %v1081_v56 }
  0x27   :  { %262 = vmatpush.bf16.msra.mxu1 %v1073_v60 }
  0x28   :  { %276 = vmatpush.bf16.msra.mxu2 %v1077_v61 }
  0x29   :  { %248 = vmatpush.bf16.msra.mxu0 %v1069_v62 }
  0x2b   :  { %263 = vmatpush.bf16.msra.mxu1 %v1061_v5 }
  0x2c   :  { %277 = vmatpush.bf16.msra.mxu2 %v1065_v8 }
  0x2d   :  { %249 = vmatpush.bf16.msra.mxu0 %v1057_v9 }
  0x2e   :  { %264 = vmatmul.bf16.vlgmr.msra.gmra.mxu1 %v105_v10 }
  0x2f   :  { %278 = vmatmul.bf16.vlgmr.msra.gmra.mxu2 %v105_v10 }
  0x30   :  { %250 = vmatmul.bf16.vlgmr.msra.gmra.mxu0 %v105_v10 }
  0xab   :  { %v265_v12 = vpop.f32.mrf.mxu1 }
  0xac   :  { %v266_v19 = vadd.f32 %v265_v12, %v109_v15 }
  0xad   :  { %v251_v14 = vpop.f32.mrf.mxu0 }
  0xae   :  { %v252_v16 = vadd.f32 %v251_v14, %v108_v13 }
  0xb0   :  { %v284_v20 = vmul.f32 0.35355338, %v252_v16 }
  0xb2   :  { %v279_v17 = vpop.f32.mrf.mxu2  ;;  %v1551_v33 = vmul.f32 %v1519_v23, %v284_v20  ;;  %v1554_v34 = vmul.f32 %v1524_v24, %v284_v20  ;;  %v1560_v38 = vmul.f32 %v1529_v27, %v284_v20  ;;  %v292_v45 = vmul.f32 %v1536_v29, %v284_v20 }
  0xb3   :  { %v267_v18 = vpop.f32.mrf.mxu1  ;;  %v280_v35 = vadd.f32 %v279_v17, %v110_v25  ;;  %v1576_v46 = vmul.f32 %v1546_v32, %v284_v20  ;;  %v419_v47 = vmul.f32 %v1541_v31, %v284_v20  ;;  %v545_v57 = vmul.f32 %v1599_v55, %v284_v20 }
  0xb4   :  { %v268_v21 = vadd.f32 %v267_v18, %v109_v15  ;;  %v671_v61 = vmul.f32 %v1606_v59, %v284_v20 }
  0xb5   :  { %v253_v22 = vpop.f32.mrf.mxu0 }
  0xb6   :  { %v254_v26 = vadd.f32 %v253_v22, %v108_v13  ;;  %v1531_v28 = vpack.c.bf16 %v268_v21, %v266_v19 }
  0xb8   :  { %v285_v30 = vmul.f32 0.35355338, %v254_v26  ;;  %302 = vmatpush.bf16.xpose.msrb.mxu0 %v1531_v28  ;;  %429 = vmatpush.bf16.xpose.msrb.mxu1 %v1531_v28 }
  0xba   :  { %v293_v36 = vmul.f32 %v1536_v29, %v285_v30  ;;  %v420_v37 = vmul.f32 %v1541_v31, %v285_v30  ;;  %v281_v39 = vpop.f32.mrf.mxu2  ;;  %v1563_v40 = vmul.f32 %v1519_v23, %v285_v30  ;;  %v1566_v41 = vmul.f32 %v1524_v24, %v285_v30 }
  0xbb   :  { %v1569_v42 = vmul.f32 %v1529_v27, %v285_v30  ;;  %v1572_v43 = vmul.f32 %v1546_v32, %v285_v30  ;;  %v282_v44 = vadd.f32 %v281_v39, %v110_v25  ;;  %v546_v56 = vmul.f32 %v1599_v55, %v285_v30 }
  0xbc   :  { %v358_v48 = vpack.c.bf16 %v1563_v40, %v1551_v33  ;;  %v484_v49 = vpack.c.bf16 %v1566_v41, %v1554_v34  ;;  %v294_v52 = vpack.c.bf16 %v293_v36, %v292_v45  ;;  %v421_v54 = vpack.c.bf16 %v420_v37, %v419_v47 }
  0xbd   :  { %v610_v50 = vpack.c.bf16 %v1569_v42, %v1560_v38  ;;  %v1585_v51 = vpack.c.bf16 %v282_v44, %v280_v35  ;;  %v736_v53 = vpack.c.bf16 %v1572_v43, %v1576_v46  ;;  %v547_v58 = vpack.c.bf16 %v546_v56, %v545_v57 }
  0xbe   :  { %v672_v60 = vmul.f32 %v1606_v59, %v285_v30 }
  0xbf   :  { %343 = vmatpush.bf16.msra.mxu3 %v1585_v51  ;;  %303 = vmatmul.bf16.vlgmr.msrb.gmra.mxu0 %v294_v52 }
  0xc0   :  { %555 = vmatpush.bf16.xpose.msra.mxu1 %v1531_v28  ;;  %406 = vmatpush.bf16.msra.mxu0 %v1585_v51  ;;  %v673_v62 = vpack.c.bf16 %v672_v60, %v671_v61 }
  0xc1   :  { %430 = vmatmul.bf16.vlgmr.msrb.gmra.mxu1 %v421_v54  ;;  %469 = vmatpush.bf16.msrb.mxu2 %v1585_v51 }
  0xc3   :  { %366 = vmatpush.bf16.xpose.msrb.mxu3 %v1531_v28 }
  0xc4   :  { %532 = vmatpush.bf16.msrb.mxu0 %v1585_v51 }
  0xc5   :  { %595 = vmatpush.bf16.msra.mxu2 %v1585_v51 }
  0xc8   :  { %681 = vmatpush.bf16.xpose.msrb.mxu1 %v1531_v28 }
  0xd1   :  { %556 = vmatmul.bf16.vlgmr.msra.gmra.mxu1 %v547_v58 }
  0xe1   :  { %682 = vmatmul.bf16.vlgmr.msrb.gmra.mxu1 %v673_v62 }
 0x13c   :  { %v304_v0 = vpop.f32.mrf.mxu0 }
 0x13d   :  { %v305_v1 = vadd.f32 %v304_v0, %v1613_v63 }
 0x13e   :  { %v431_v7 = vpop.f32.mrf.mxu1 }
 0x13f   :  { %v310_v2 = vsel %vm309_vm0, %v305_v1, -inf  ;;  %v1625_v8 = vadd.f32 %v431_v7, %v1613_v63 }
 0x140   :  { %311 = vmax.xlane.f32.xlu0 %v310_v2 }
 0x141   :  { %v436_v9 = vsel %vm309_vm0, %v1625_v8, -inf }
 0x144   :  { %v306_v4 = vpop.f32.mrf.mxu0 }
 0x145   :  { %v307_v5 = vadd.f32 %v306_v4, %v1620_v3 }
 0x146   :  { %v433_v19 = vpop.f32.mrf.mxu1 }
 0x147   :  { %v313_v6 = vsel %vm309_vm0, %v307_v5, -inf  ;;  %v1632_v21 = vadd.f32 %v433_v19, %v1620_v3 }
 0x148   :  { %314 = vmax.xlane.f32.xlu0 %v313_v6 }
 0x149   :  { %v439_v22 = vsel %vm309_vm0, %v1632_v21, -inf }
 0x14e   :  { %v557_v25 = vpop.f32.mrf.mxu1 }
 0x14f   :  { %v1637_v26 = vadd.f32 %v557_v25, %v1613_v63 }
 0x150   :  { %437 = vmax.xlane.f32.xlu0 %v436_v9 }
 0x151   :  { %v562_v30 = vsel %vm309_vm0, %v1637_v26, -inf }
 0x156   :  { %v559_v42 = vpop.f32.mrf.mxu1 }
 0x15e   :  { %v683_v56 = vpop.f32.mrf.mxu1 }
 0x15f   :  { %v1681_v60 = vadd.f32 %v683_v56, %v1613_v63 }
 0x166   :  { %v685_v2 = vpop.f32.mrf.mxu1 }
 0x167   :  { %v1691_v4 = vadd.f32 %v685_v2, %v1620_v3 }
 0x169   :  { %v691_v9 = vsel %vm309_vm0, %v1691_v4, -inf }
 0x1b3   :  { %v312_v10 = vpop.xlane.xlu0 %311 }
 0x1b4   :  { %v316_v11 = vsub.f32 %v305_v1, %v312_v10  ;;  %v688_v1 = vsel %vm309_vm0, %v1681_v60, -inf }
 0x1b6   :  { %v318_v12 = vmul.f32 1.442695, %v316_v11 }
 0x1b8   :  { %1319 = vpow2.f32 %v318_v12 }
 0x1bb   :  { %v315_v13 = vpop.xlane.xlu0 %314 }
 0x1bc   :  { %v317_v14 = vsub.f32 %v307_v5, %v315_v13 }
 0x1be   :  { %v1320_v15 = vpop.eup %1319  ;;  %v320_v16 = vmul.f32 1.442695, %v317_v14 }
 0x1bf   :  { %v322_v17 = vsel %vm309_vm0, %v1320_v15, 0.0 }
 0x1c0   :  { %1321 = vpow2.f32 %v320_v16  ;;  %323 = vadd.xlane.f32.xlu1 %v322_v17 }
 0x1c3   :  { %v438_v10 = vpop.xlane.xlu0 %437 }
 0x1c4   :  { %v442_v13 = vsub.f32 %v1625_v8, %v438_v10 }
 0x1c6   :  { %v1322_v18 = vpop.eup %1321 }
 0x1c7   :  { %v325_v20 = vsel %vm309_vm0, %v1322_v18, 0.0 }
 0x1c8   :  { %326 = vadd.xlane.f32.xlu1 %v325_v20 }
 0x1d0   :  { %440 = vmax.xlane.f32.xlu1 %v439_v22 }
 0x1d8   :  { %563 = vmax.xlane.f32.xlu1 %v562_v30 }
 0x233   :  { %v324_v35 = vpop.xlane.xlu1 %323 }
 0x234   :  { %1323 = vrcp.f32 %v324_v35 }
 0x23a   :  { %v1324_v37 = vpop.eup %1323 }
 0x23b   :  { %v327_v36 = vpop.xlane.xlu1 %326  ;;  %v330_v44 = vmul.f32 %v1324_v37, %v1320_v15  ;;  %v444_v15 = vmul.f32 1.442695, %v442_v13 }
 0x23c   :  { %1325 = vrcp.f32 %v327_v36 }
 0x23d   :  { %1327 = vpow2.f32 %v444_v15 }
 0x242   :  { %v1326_v39 = vpop.eup %1325 }
 0x243   :  { %v331_v45 = vmul.f32 %v1326_v39, %v1322_v18  ;;  %v1711_v19 = vpop.eup %1327  ;;  %v441_v8 = vpop.xlane.xlu1 %440 }
 0x244   :  { %v443_v25 = vsub.f32 %v1632_v21, %v441_v8 }
 0x245   :  { %v332_v47 = vpack.c.bf16 %v331_v45, %v330_v44 }
 0x247   :  { %1150 = vmatmul.msk.bf16.vlgmr.msra.gmra.mxu3 %vm309_vm0, %v332_v47 }
 0x248   :  { %492 = vmatpush.bf16.xpose.msra.mxu3 %v1531_v28 }
 0x24b   :  { %v564_v35 = vpop.xlane.xlu1 %563 }
 0x24c   :  { %v568_v44 = vsub.f32 %v1637_v26, %v564_v35 }
 0x257   :  { %367 = vmatmul.bf16.vlgmr.msrb.gmra.mxu3 %v358_v48 }
 0x258   :  { %618 = vmatpush.bf16.xpose.msrb.mxu3 %v1531_v28 }
 0x267   :  { %493 = vmatmul.bf16.vlgmr.msra.gmra.mxu3 %v484_v49 }
 0x268   :  { %744 = vmatpush.bf16.xpose.msra.mxu3 %v1531_v28 }
 0x277   :  { %619 = vmatmul.bf16.vlgmr.msrb.gmra.mxu3 %v610_v50  ;;  %v1671_v50 = vadd.f32 %v559_v42, %v1620_v3 }
 0x279   :  { %v565_v58 = vsel %vm309_vm0, %v1671_v50, -inf }
 0x287   :  { %745 = vmatmul.bf16.vlgmr.msra.gmra.mxu3 %v736_v53 }
 0x2ca   :  { %v1657_v52 = vpop.f32.mrf.mxu3 }
 0x2d2   :  { %v1659_v33 = vpop.f32.mrf.mxu3 }
 0x2da   :  { %v368_v40 = vpop.f32.mrf.mxu3 }
 0x2db   :  { %v369_v48 = vadd.f32 %v368_v40, %v1613_v63  ;;  %v570_v40 = vmul.f32 1.442695, %v568_v44 }
 0x2dd   :  { %v373_v34 = vsel %vm309_vm0, %v369_v48, -inf }
 0x2de   :  { %374 = vmax.xlane.f32.xlu2 %v373_v34 }
 0x2e2   :  { %v370_v41 = vpop.f32.mrf.mxu3 }
 0x2e3   :  { %v371_v28 = vadd.f32 %v370_v41, %v1620_v3 }
 0x2e5   :  { %v376_v38 = vsel %vm309_vm0, %v371_v28, -inf }
 0x2e6   :  { %377 = vmax.xlane.f32.xlu2 %v376_v38 }
 0x2ea   :  { %v494_v49 = vpop.f32.mrf.mxu3 }
 0x2eb   :  { %v1666_v43 = vadd.f32 %v494_v49, %v1613_v63 }
 0x2ed   :  { %v499_v46 = vsel %vm309_vm0, %v1666_v43, -inf }
 0x2ee   :  { %500 = vmax.xlane.f32.xlu2 %v499_v46 }
 0x2f2   :  { %v496_v53 = vpop.f32.mrf.mxu3 }
 0x2f3   :  { %v1674_v54 = vadd.f32 %v496_v53, %v1620_v3 }
 0x2f5   :  { %v502_v57 = vsel %vm309_vm0, %v1674_v54, -inf }
 0x2f6   :  { %503 = vmax.xlane.f32.xlu0 %v502_v57  ;;  %566 = vmax.xlane.f32.xlu2 %v565_v58 }
 0x2fa   :  { %v620_v61 = vpop.f32.mrf.mxu3 }
 0x2fb   :  { %v1684_v62 = vadd.f32 %v620_v61, %v1613_v63 }
 0x2fd   :  { %v625_v0 = vsel %vm309_vm0, %v1684_v62, -inf }
 0x2fe   :  { %626 = vmax.xlane.f32.xlu0 %v625_v0  ;;  %689 = vmax.xlane.f32.xlu2 %v688_v1 }
 0x302   :  { %v622_v5 = vpop.f32.mrf.mxu3 }
 0x303   :  { %v1694_v6 = vadd.f32 %v622_v5, %v1620_v3 }
 0x305   :  { %v628_v7 = vsel %vm309_vm0, %v1694_v6, -inf }
 0x306   :  { %629 = vmax.xlane.f32.xlu1 %v628_v7  ;;  %692 = vmax.xlane.f32.xlu0 %v691_v9 }
 0x30a   :  { %v746_v11 = vpop.f32.mrf.mxu3 }
 0x30b   :  { %v1701_v12 = vadd.f32 %v746_v11, %v1613_v63  ;;  %v448_v63 = vsel %vm309_vm0, %v1711_v19, 0.0 }
 0x30d   :  { %v751_v14 = vsel %vm309_vm0, %v1701_v12, -inf }
 0x30e   :  { %752 = vmax.xlane.f32.xlu1 %v751_v14 }
 0x312   :  { %v748_v16 = vpop.f32.mrf.mxu3 }
 0x313   :  { %v1707_v17 = vadd.f32 %v748_v16, %v1620_v3  ;;  %v446_v3 = vmul.f32 1.442695, %v443_v25 }
 0x315   :  { %v754_v18 = vsel %vm309_vm0, %v1707_v17, -inf }
 0x316   :  { %755 = vmax.xlane.f32.xlu2 %v754_v18 }
 0x31e   :  { %449 = vadd.xlane.f32.xlu2 %v448_v63 }
 0x351   :  { %v375_v20 = vpop.xlane.xlu2 %374 }
 0x352   :  { %v379_v22 = vsub.f32 %v369_v48, %v375_v20 }
 0x354   :  { %v381_v30 = vmul.f32 1.442695, %v379_v22 }
 0x356   :  { %1329 = vpow2.f32 %v381_v30 }
 0x357   :  { %1331 = vpow2.f32 %v446_v3 }
 0x359   :  { %v378_v36 = vpop.xlane.xlu2 %377 }
 0x35a   :  { %v380_v37 = vsub.f32 %v371_v28, %v378_v36 }
 0x35c   :  { %v1716_v39 = vpop.eup %1329  ;;  %v383_v45 = vmul.f32 1.442695, %v380_v37 }
 0x35d   :  { %v385_v47 = vsel %vm309_vm0, %v1716_v39, 0.0  ;;  %v1721_v21 = vpop.eup %1331 }
 0x35e   :  { %1333 = vpow2.f32 %v383_v45  ;;  %386 = vadd.xlane.f32.xlu0 %v385_v47  ;;  %v451_v26 = vsel %vm309_vm0, %v1721_v21, 0.0 }
 0x35f   :  { %1335 = vpow2.f32 %v570_v40 }
 0x361   :  { %v501_v48 = vpop.xlane.xlu2 %500 }
 0x362   :  { %v505_v34 = vsub.f32 %v1666_v43, %v501_v48 }
 0x364   :  { %v1724_v41 = vpop.eup %1333  ;;  %v507_v28 = vmul.f32 1.442695, %v505_v34 }
 0x365   :  { %v388_v38 = vsel %vm309_vm0, %v1724_v41, 0.0  ;;  %v1730_v46 = vpop.eup %1335 }
 0x366   :  { %1337 = vpow2.f32 %v507_v28  ;;  %389 = vadd.xlane.f32.xlu1 %v388_v38  ;;  %452 = vadd.xlane.f32.xlu0 %v451_v26  ;;  %v574_v0 = vsel %vm309_vm0, %v1730_v46, 0.0 }
 0x369   :  { %v567_v42 = vpop.xlane.xlu2 %566  ;;  %v504_v49 = vpop.xlane.xlu0 %503 }
 0x36a   :  { %v569_v53 = vsub.f32 %v1671_v50, %v567_v42  ;;  %v506_v43 = vsub.f32 %v1674_v54, %v504_v49 }
 0x36c   :  { %v1734_v56 = vpop.eup %1337  ;;  %v572_v57 = vmul.f32 1.442695, %v569_v53  ;;  %v509_v58 = vmul.f32 1.442695, %v506_v43 }
 0x36d   :  { %v511_v61 = vsel %vm309_vm0, %v1734_v56, 0.0 }
 0x36e   :  { %1339 = vpow2.f32 %v572_v57  ;;  %512 = vadd.xlane.f32.xlu1 %v511_v61  ;;  %575 = vadd.xlane.f32.xlu0 %v574_v0 }
 0x36f   :  { %1341 = vpow2.f32 %v509_v58 }
 0x371   :  { %v690_v1 = vpop.xlane.xlu2 %689  ;;  %v627_v2 = vpop.xlane.xlu0 %626 }
 0x372   :  { %v694_v50 = vsub.f32 %v1681_v60, %v690_v1  ;;  %v631_v54 = vsub.f32 %v1684_v62, %v627_v2 }
 0x374   :  { %v1742_v5 = vpop.eup %1339  ;;  %v696_v7 = vmul.f32 1.442695, %v694_v50  ;;  %v633_v9 = vmul.f32 1.442695, %v631_v54 }
 0x375   :  { %v1744_v10 = vpop.eup %1341  ;;  %v577_v11 = vsel %vm309_vm0, %v1742_v5, 0.0 }
 0x376   :  { %1343 = vpow2.f32 %v696_v7  ;;  %578 = vadd.xlane.f32.xlu1 %v577_v11  ;;  %v514_v13 = vsel %vm309_vm0, %v1744_v10, 0.0 }
 0x377   :  { %1345 = vpow2.f32 %v633_v9  ;;  %515 = vadd.xlane.f32.xlu2 %v514_v13 }
 0x379   :  { %v630_v14 = vpop.xlane.xlu1 %629  ;;  %v693_v60 = vpop.xlane.xlu0 %692 }
 0x37a   :  { %v632_v62 = vsub.f32 %v1694_v6, %v630_v14  ;;  %v695_v15 = vsub.f32 %v1691_v4, %v693_v60 }
 0x37c   :  { %v1752_v16 = vpop.eup %1343  ;;  %v635_v18 = vmul.f32 1.442695, %v632_v62  ;;  %v698_v63 = vmul.f32 1.442695, %v695_v15 }
 0x37d   :  { %v1754_v8 = vpop.eup %1345  ;;  %v700_v20 = vsel %vm309_vm0, %v1752_v16, 0.0 }
 0x37e   :  { %1347 = vpow2.f32 %v635_v18  ;;  %701 = vadd.xlane.f32.xlu1 %v700_v20  ;;  %v637_v22 = vsel %vm309_vm0, %v1754_v8, 0.0 }
 0x37f   :  { %1349 = vpow2.f32 %v698_v63  ;;  %638 = vadd.xlane.f32.xlu2 %v637_v22 }
 0x381   :  { %v753_v25 = vpop.xlane.xlu1 %752 }
 0x382   :  { %v757_v6 = vsub.f32 %v1701_v12, %v753_v25 }
 0x384   :  { %v1761_v4 = vpop.eup %1347  ;;  %v759_v30 = vmul.f32 1.442695, %v757_v6 }
 0x385   :  { %v1763_v3 = vpop.eup %1349  ;;  %v640_v35 = vsel %vm309_vm0, %v1761_v4, 0.0 }
 0x386   :  { %1351 = vpow2.f32 %v759_v30  ;;  %641 = vadd.xlane.f32.xlu0 %v640_v35  ;;  %v703_v36 = vsel %vm309_vm0, %v1763_v3, 0.0 }
 0x387   :  { %704 = vadd.xlane.f32.xlu2 %v703_v36 }
 0x389   :  { %v756_v37 = vpop.xlane.xlu2 %755 }
 0x38a   :  { %v758_v44 = vsub.f32 %v1707_v17, %v756_v37 }
 0x38c   :  { %v1770_v45 = vpop.eup %1351  ;;  %v761_v12 = vmul.f32 1.442695, %v758_v44 }
 0x38d   :  { %v763_v47 = vsel %vm309_vm0, %v1770_v45, 0.0 }
 0x38e   :  { %1353 = vpow2.f32 %v761_v12  ;;  %764 = vadd.xlane.f32.xlu0 %v763_v47 }
 0x391   :  { %v450_v28 = vpop.xlane.xlu2 %449 }
 0x394   :  { %v1774_v40 = vpop.eup %1353 }
 0x395   :  { %v766_v48 = vsel %vm309_vm0, %v1774_v40, 0.0 }
 0x396   :  { %767 = vadd.xlane.f32.xlu1 %v766_v48  ;;  %v1284_v48 = vld [vmem:[%s1888_s5 + $0x30] sm:$0xff] }
 0x3d1   :  { %v387_v34 = vpop.xlane.xlu0 %386 }
 0x3d2   :  { %1355 = vrcp.f32 %v387_v34 }
 0x3d3   :  { %1357 = vrcp.f32 %v450_v28 }
 0x3d8   :  { %v1356_v26 = vpop.eup %1355 }
 0x3d9   :  { %v390_v38 = vpop.xlane.xlu1 %389  ;;  %v453_v17 = vpop.xlane.xlu0 %452  ;;  %v393_v43 = vmul.f32 %v1356_v26, %v1716_v39  ;;  %v1281_v26 = vld [vmem:[%s1888_s5 + $0x18] sm:$0xff] }
 0x3da   :  { %1359 = vrcp.f32 %v390_v38  ;;  %v1358_v42 = vpop.eup %1357 }
 0x3db   :  { %1361 = vrcp.f32 %v453_v17  ;;  %v456_v61 = vmul.f32 %v1358_v42, %v1711_v19  ;;  %v1280_v42 = vld [vmem:[%s1888_s5 + $0x10] sm:$0xff] }
 0x3e0   :  { %v1360_v49 = vpop.eup %1359 }
 0x3e1   :  { %v1362_v53 = vpop.eup %1361  ;;  %v394_v57 = vmul.f32 %v1360_v49, %v1724_v41  ;;  %v513_v58 = vpop.xlane.xlu1 %512 }
 0x3e2   :  { %v457_v0 = vmul.f32 %v1362_v53, %v1721_v21  ;;  %v576_v50 = vpop.xlane.xlu0 %575 }
 0x3e3   :  { %v395_v1 = vpack.c.bf16 %v394_v57, %v393_v43  ;;  %1363 = vrcp.f32 %v576_v50  ;;  %v1279_v43 = vld [vmem:[%s1888_s5 + $0x8] sm:$0xff]  ;;  %v1278_v57 = vld [vmem:[%s1888_s5] sm:$0xff] }
 0x3e4   :  { %v458_v2 = vpack.c.bf16 %v457_v0, %v456_v61  ;;  %1365 = vrcp.f32 %v513_v58  ;;  %v1293_v61 = vld [vmem:[%s1890_s7 + $0x38] sm:$0xff] }
 0x3e5   :  { %1151 = vmatmul.msk.bf16.vlgmr.msra.gmra.mxu0 %vm309_vm0, %v395_v1  ;;  %v1292_v1 = vld [vmem:[%s1890_s7 + $0x30] sm:$0xff] }
 0x3e6   :  { %1152 = vmatmul.msk.bf16.vlgmr.msrb.gmra.mxu2 %vm309_vm0, %v458_v2  ;;  %658 = vmatpush.bf16.msra.mxu0 %v1585_v51  ;;  %v1291_v2 = vld [vmem:[%s1890_s7 + $0x28] sm:$0xff] }
 0x3e7   :  { %721 = vmatpush.bf16.msrb.mxu2 %v1585_v51 }
 0x3e9   :  { %v579_v39 = vpop.xlane.xlu1 %578  ;;  %v1364_v19 = vpop.eup %1363 }
 0x3ea   :  { %1367 = vrcp.f32 %v579_v39  ;;  %v516_v41 = vpop.xlane.xlu2 %515  ;;  %v1366_v54 = vpop.eup %1365  ;;  %v582_v9 = vmul.f32 %v1364_v19, %v1730_v46 }
 0x3eb   :  { %1369 = vrcp.f32 %v516_v41  ;;  %v519_v13 = vmul.f32 %v1366_v54, %v1734_v56  ;;  %v1290_v41 = vld [vmem:[%s1890_s7 + $0x20] sm:$0xff] }
 0x3f0   :  { %v1368_v21 = vpop.eup %1367 }
 0x3f1   :  { %v1370_v7 = vpop.eup %1369  ;;  %v583_v11 = vmul.f32 %v1368_v21, %v1742_v5  ;;  %v702_v18 = vpop.xlane.xlu1 %701  ;;  %v350_v21 = vmul.f32 %v1536_v29, %v1657_v52 }
 0x3f2   :  { %v520_v14 = vmul.f32 %v1370_v7, %v1744_v10  ;;  %v639_v60 = vpop.xlane.xlu2 %638  ;;  %v351_v7 = vmul.f32 %v1536_v29, %v1659_v33 }
 0x3f3   :  { %v584_v62 = vpack.c.bf16 %v583_v11, %v582_v9  ;;  %1371 = vrcp.f32 %v639_v60 }
 0x3f4   :  { %v521_v15 = vpack.c.bf16 %v520_v14, %v519_v13  ;;  %1373 = vrcp.f32 %v702_v18  ;;  %v1289_v13 = vld [vmem:[%s1890_s7 + $0x18] sm:$0xff] }
 0x3f6   :  { %1153 = vmatmul.msk.bf16.vlgmr.msrb.gmra.mxu0 %vm309_vm0, %v521_v15  ;;  %1154 = vmatmul.msk.bf16.vlgmr.msra.gmra.mxu2 %vm309_vm0, %v584_v62 }
 0x3f7   :  { %784 = vmatpush.bf16.msrb.mxu0 %v1585_v51  ;;  %947 = vmatpush.bf16.msra.mxu2 %v1293_v61 }
 0x3f9   :  { %v642_v63 = vpop.xlane.xlu0 %641  ;;  %v1372_v5 = vpop.eup %1371 }
 0x3fa   :  { %v705_v46 = vpop.xlane.xlu2 %704  ;;  %1375 = vrcp.f32 %v642_v63  ;;  %v1374_v56 = vpop.eup %1373  ;;  %v645_v22 = vmul.f32 %v1372_v5, %v1754_v8 }
 0x3fb   :  { %1377 = vrcp.f32 %v705_v46  ;;  %v708_v6 = vmul.f32 %v1374_v56, %v1752_v16  ;;  %948 = vmatpush.bf16.msra.mxu2 %v1292_v1 }
 0x3ff   :  { %949 = vmatpush.bf16.msra.mxu2 %v1291_v2  ;;  %v1318_v2 = vld [vmem:[%s1893_s10] ss:$0 sm:$0xff] }
 0x400   :  { %v1376_v20 = vpop.eup %1375 }
 0x401   :  { %v1378_v10 = vpop.eup %1377  ;;  %v646_v25 = vmul.f32 %v1376_v20, %v1761_v4  ;;  %v765_v36 = vpop.xlane.xlu0 %764 }
 0x402   :  { %v709_v30 = vmul.f32 %v1378_v10, %v1763_v3  ;;  %1379 = vrcp.f32 %v765_v36  ;;  %v1285_v3 = vld [vmem:[%s1888_s5 + $0x38] sm:$0xff] }
 0x403   :  { %v647_v35 = vpack.c.bf16 %v646_v25, %v645_v22  ;;  %864 = vmatpush.bf16.msra.mxu1 %v1285_v3  ;;  %950 = vmatpush.bf16.msra.mxu2 %v1290_v41 }
 0x404   :  { %v710_v51 = vpack.c.bf16 %v709_v30, %v708_v6 }
 0x406   :  { %1155 = vmatmul.msk.bf16.vlgmr.msra.gmra.mxu0 %vm309_vm0, %v647_v35  ;;  %1156 = vmatmul.msk.bf16.vlgmr.msrb.gmra.mxu2 %vm309_vm0, %v710_v51 }
 0x407   :  { %865 = vmatpush.bf16.msra.mxu1 %v1284_v48  ;;  %951 = vmatpush.bf16.msra.mxu2 %v1289_v13  ;;  %v1316_v48 = vld [vmem:[%s1889_s6] ss:$0 sm:$0xff] }
 0x408   :  { %v1380_v44 = vpop.eup %1379 }
 0x409   :  { %v768_v37 = vpop.xlane.xlu1 %767  ;;  %v771_v8 = vmul.f32 %v1380_v44, %v1770_v45  ;;  %v1283_v45 = vld [vmem:[%s1888_s5 + $0x28] sm:$0xff] }
 0x40a   :  { %1381 = vrcp.f32 %v768_v37 }
 0x40b   :  { %866 = vmatpush.bf16.msra.mxu1 %v1283_v45 }
 0x410   :  { %v1382_v12 = vpop.eup %1381 }
 0x411   :  { %v772_v4 = vmul.f32 %v1382_v12, %v1774_v40  ;;  %v1282_v40 = vld [vmem:[%s1888_s5 + $0x20] sm:$0xff] }
 0x412   :  { %867 = vmatpush.bf16.msra.mxu1 %v1282_v40 }
 0x413   :  { %v773_v47 = vpack.c.bf16 %v772_v4, %v771_v8  ;;  %v1286_v8 = vld [vmem:[%s1890_s7] sm:$0xff]  ;;  %v1300_v4 = vld [vmem:[#allocation4 + $0x30] sm:$0xff] }
 0x416   :  { %1157 = vmatmul.msk.bf16.vlgmr.msrb.gmra.mxu0 %vm309_vm0, %v773_v47  ;;  %868 = vmatpush.bf16.msra.mxu1 %v1281_v26  ;;  %v1299_v47 = vld [vmem:[#allocation4 + $0x28] sm:$0xff] }
 0x417   :  { %v1295_v26 = vld [vmem:[#allocation4 + $0x8] sm:$0xff] }
 0x41a   :  { %869 = vmatpush.bf16.msra.mxu1 %v1280_v42  ;;  %v1294_v42 = vld [vmem:[#allocation4] sm:$0xff] }
 0x41e   :  { %870 = vmatpush.bf16.msra.mxu1 %v1279_v43 }
 0x422   :  { %871 = vmatpush.bf16.msra.mxu1 %v1278_v57 }
 0x462   :  { %v408_v16 = vpop.f32.mrf.mxu0 }
 0x463   :  { %v413_v19 = vmul.f32 %v1519_v23, %v408_v16  ;;  %v1298_v16 = vld [vmem:[#allocation4 + $0x20] sm:$0xff] }
 0x465   :  { %v415_v14 = vadd.f32 %v413_v19, %v350_v21 }
 0x469   :  { %v471_v34 = vpop.f32.mrf.mxu2 }
 0x46a   :  { %v410_v28 = vpop.f32.mrf.mxu0  ;;  %v476_v9 = vmul.f32 %v1541_v31, %v471_v34 }
 0x46b   :  { %v414_v54 = vmul.f32 %v1519_v23, %v410_v28 }
 0x46c   :  { %v478_v52 = vadd.f32 %v476_v9, %v415_v14 }
 0x46d   :  { %v416_v60 = vadd.f32 %v414_v54, %v351_v7 }
 0x471   :  { %v473_v38 = vpop.f32.mrf.mxu2 }
 0x472   :  { %v477_v11 = vmul.f32 %v1541_v31, %v473_v38  ;;  %v1297_v38 = vld [vmem:[#allocation4 + $0x18] sm:$0xff] }
 0x473   :  { %v534_v17 = vpop.f32.mrf.mxu0 }
 0x474   :  { %v539_v62 = vmul.f32 %v1524_v24, %v534_v17  ;;  %v479_v18 = vadd.f32 %v477_v11, %v416_v60  ;;  %v1296_v17 = vld [vmem:[#allocation4 + $0x10] sm:$0xff] }
 0x476   :  { %v541_v63 = vadd.f32 %v539_v62, %v478_v52 }
 0x479   :  { %v597_v49 = vpop.f32.mrf.mxu2 }
 0x47a   :  { %v602_v29 = vmul.f32 %v1599_v55, %v597_v49 }
 0x47b   :  { %v536_v53 = vpop.f32.mrf.mxu0 }
 0x47c   :  { %v540_v23 = vmul.f32 %v1524_v24, %v536_v53  ;;  %v604_v20 = vadd.f32 %v602_v29, %v541_v63  ;;  %v1317_v53 = vld [vmem:[%s1891_s8] ss:$0 sm:$0xff] }
 0x47e   :  { %v542_v46 = vadd.f32 %v540_v23, %v479_v18 }
 0x481   :  { %v599_v58 = vpop.f32.mrf.mxu2 }
 0x482   :  { %v603_v33 = vmul.f32 %v1599_v55, %v599_v58 }
 0x483   :  { %v660_v0 = vpop.f32.mrf.mxu0 }
 0x484   :  { %v665_v5 = vmul.f32 %v1529_v27, %v660_v0  ;;  %v605_v10 = vadd.f32 %v603_v33, %v542_v46 }
 0x486   :  { %v667_v25 = vadd.f32 %v665_v5, %v604_v20 }
 0x489   :  { %v723_v50 = vpop.f32.mrf.mxu2 }
 0x48a   :  { %v728_v22 = vmul.f32 %v1606_v59, %v723_v50 }
 0x48b   :  { %v662_v39 = vpop.f32.mrf.mxu0 }
 0x48c   :  { %v666_v56 = vmul.f32 %v1529_v27, %v662_v39  ;;  %v730_v55 = vadd.f32 %v728_v22, %v667_v25  ;;  %v1288_v27 = vld [vmem:[%s1890_s7 + $0x10] sm:$0xff] }
 0x48d   :  { %952 = vmatpush.bf16.msra.mxu2 %v1288_v27 }
 0x48e   :  { %v668_v6 = vadd.f32 %v666_v56, %v605_v10 }
 0x491   :  { %v725_v31 = vpop.f32.mrf.mxu2 }
 0x492   :  { %v729_v24 = vmul.f32 %v1606_v59, %v725_v31  ;;  %v1287_v59 = vld [vmem:[%s1890_s7 + $0x8] sm:$0xff] }
 0x493   :  { %v786_v15 = vpop.f32.mrf.mxu0  ;;  %953 = vmatpush.bf16.msra.mxu2 %v1287_v59 }
 0x494   :  { %v791_v30 = vmul.f32 %v1546_v32, %v786_v15  ;;  %v731_v51 = vadd.f32 %v729_v24, %v668_v6 }
 0x496   :  { %v793_v37 = vadd.f32 %v791_v30, %v730_v55 }
 0x497   :  { %954 = vmatpush.bf16.msra.mxu2 %v1286_v8 }
 0x49b   :  { %v788_v35 = vpop.f32.mrf.mxu0 }
 0x49c   :  { %v792_v36 = vmul.f32 %v1546_v32, %v788_v35  ;;  %v1301_v32 = vld [vmem:[#allocation4 + $0x38] sm:$0xff] }
 0x49d   :  { %1032 = vmatpush.bf16.msrb.mxu3 %v1301_v32 }
 0x49e   :  { %v794_v44 = vadd.f32 %v792_v36, %v731_v51 }
 0x4a0   :  { %v811_v12 = vpack.c.bf16 %v794_v44, %v793_v37 }
 0x4a1   :  { %1033 = vmatpush.bf16.msrb.mxu3 %v1300_v4 }
 0x4a2   :  { %872 = vmatmul.bf16.vlgmr.msra.gmra.mxu1 %v811_v12 }
 0x4a5   :  { %1034 = vmatpush.bf16.msrb.mxu3 %v1299_v47 }
 0x4a9   :  { %1035 = vmatpush.bf16.msrb.mxu3 %v1298_v16 }
 0x4ad   :  { %1036 = vmatpush.bf16.msrb.mxu3 %v1297_v38 }
 0x4b1   :  { %1037 = vmatpush.bf16.msrb.mxu3 %v1296_v17 }
 0x4b5   :  { %1038 = vmatpush.bf16.msrb.mxu3 %v1295_v26 }
 0x4b9   :  { %1039 = vmatpush.bf16.msrb.mxu3 %v1294_v42 }
 0x51f   :  { %v873_v3 = vpop.f32.mrf.mxu1 }
 0x520   :  { %v874_v28 = vadd.f32 %v1316_v48, %v873_v3 }
 0x527   :  { %v875_v34 = vpop.f32.mrf.mxu1 }
 0x528   :  { %v876_v45 = vadd.f32 %v1316_v48, %v875_v34 }
 0x52a   :  { %v894_v40 = vpack.c.bf16 %v876_v45, %v874_v28 }
 0x52c   :  { %955 = vmatmul.bf16.vlgmr.msra.gmra.mxu2 %v894_v40 }
 0x5af   :  { %v956_v49 = vpop.f32.mrf.mxu2 }
 0x5b0   :  { %v957_v43 = vadd.f32 %v1317_v53, %v956_v49 }
 0x5b2   :  { %v961_v61 = vmax.f32 %v957_v43, 0.0 }
 0x5b7   :  { %v958_v57 = vpop.f32.mrf.mxu2 }
 0x5b8   :  { %v959_v58 = vadd.f32 %v1317_v53, %v958_v57 }
 0x5ba   :  { %v962_v0 = vmax.f32 %v959_v58, 0.0 }
 0x5bc   :  { %v979_v1 = vpack.c.bf16 %v962_v0, %v961_v61 }
 0x5be   :  { %1040 = vmatmul.bf16.vlgmr.msrb.gmra.mxu3 %v979_v1 }
 0x641   :  { %v1041_v50 = vpop.f32.mrf.mxu3 }
 0x642   :  { %v1042_v39 = vadd.f32 %v1318_v2, %v1041_v50 }
 0x644   :  { %1046 = vst [vmem:[%s1894_s11] sm:$0xff] %v1042_v39 }
 0x649   :  { %v1043_v41 = vpop.f32.mrf.mxu3 }
 0x64a   :  { %v1044_v19 = vadd.f32 %v1318_v2, %v1043_v41 }
 0x64c   :  { %1047 = vst [vmem:[%s1894_s11 + $0x8] sm:$0xff] %v1044_v19 }
 0x64d   :  { %1052 = vsyncpa [#allocation3], 1 }
 0x64e   :  { %1053 = vsyncpa [#allocation5], 1 }

// kernel: forward.2
= control target key start
LH: loop header
LB: loop body
LE: loop exit
PB: predicated region body
PF: predicated region fallthrough
CT: control target
= control target key end

     0   :  { %s5737_s0 = inlined_call_operand.vmem [shape: f32[16,128], index: 0, kind: input, shape index: {}]   ;;  %s5738_s1 = inlined_call_operand.vmem [shape: f32[16,9], index: 1, kind: input, shape index: {}]   ;;  %s5739_s2 = inlined_call_operand.vmem [shape: bf16[16,16], index: 2, kind: input, shape index: {}]   ;;  %s5740_s3 = inlined_call_operand.vmem [shape: bf16[16,16], index: 3, kind: input, shape index: {}]   ;;  %s5741_s4 = inlined_call_operand.hbm [shape: bf16[128,1152], index: 4, kind: input, shape index: {}]   ;;  %s5742_s5 = inlined_call_operand.vmem [shape: f32[16,7], index: 5, kind: input, shape index: {}]   ;;  %s5743_s6 = inlined_call_operand.vmem [shape: bf16[16,16], index: 6, kind: input, shape index: {}]   ;;  %s5744_s7 = inlined_call_operand.vmem [shape: bf16[16,16], index: 7, kind: input, shape index: {}]   ;;  %s5745_s8 = inlined_call_operand.hbm [shape: bf16[128,896], index: 8, kind: input, shape index: {}]   ;;  %s5746_s9 = inlined_call_operand.vmem [shape: f32[8,5], index: 9, kind: input, shape index: {}]   ;;  %s5747_s10 = inlined_call_operand.vmem [shape: bf16[8,16], index: 10, kind: input, shape index: {}]   ;;  %s5748_s11 = inlined_call_operand.vmem [shape: bf16[16,8], index: 11, kind: input, shape index: {}]   ;;  %s5749_s12 = inlined_call_operand.hbm [shape: bf16[128,640], index: 12, kind: input, shape index: {}]   ;;  %s5750_s13 = inlined_call_operand.hbm [shape: bf16[128,384], index: 13, kind: input, shape index: {}]   ;;  %s5751_s14 = inlined_call_operand.hbm [shape: bf16[128,384], index: 14, kind: input, shape index: {}]   ;;  %s5752_s15 = inlined_call_operand.vmem [shape: f32[1,384], index: 15, kind: input, shape index: {}]   ;;  %s5753_s16 = inlined_call_operand.vmem [shape: f32[1,384], index: 16, kind: input, shape index: {}]   ;;  %s5754_s17 = inlined_call_operand.vmem [shape: f32[16,128], index: 17, kind: output, shape index: {}]  }
   0x1   :  { %5969 = sst [smem:[#allocation207_spill]] %s5737_s0 }
   0x2   :  { %5970 = sst [smem:[#allocation208_spill]] %s5738_s1 }
   0x3   :  { %22 = vsyncpa [#allocation3], 0 }
   0x4   :  { %23 = vsyncpa [#allocation5], 0  ;;  %s56_s26 = sshll.u32 %s5745_s8, 4  ;;  %s57_s26 = int_to_ptr.hbm [resolvable:$true] %s56_s26 }
   0x5   :  { %24 = vsyncpa [#allocation8], 0  ;;  %s4372_s27 = smov [#allocation4]   ;;  %s88_s30 = sshll.u32 %s5750_s13, 4  ;;  %s89_s30 = int_to_ptr.hbm [resolvable:$true] %s88_s30 }
   0x6   :  { %s58_s28 = sshll.u32 %s4372_s27, 4  ;;  %s4373_s18 = smov 448   ;;  %s59_s28 = int_to_ptr.vmem [resolvable:$true] %s58_s28 }
   0x7   :  { %s4374_s19 = smov 28   ;;  %s4375_s1 = smov [#allocation7]  }
   0x8   :  { %64 = dma.hbm_to_vmem [thread:$0]  %s57_s26, 7168, %s59_s28, [#allocation5], %s4373_s18, %s4373_s18, %s4374_s19  }
   0x9   :  { %s90_s20 = sshll.u32 %s4375_s1, 4  ;;  %s4376_s21 = smov 192   ;;  %s91_s20 = int_to_ptr.vmem [resolvable:$true] %s90_s20 }
   0xa   :  { %s4377_s22 = smov 12   ;;  %s37_s24 = sshll.u32 %s5741_s4, 4  ;;  %s38_s24 = int_to_ptr.hbm [resolvable:$true] %s37_s24 }
   0xb   :  { %96 = dma.hbm_to_vmem [thread:$0]  %s89_s30, 3072, %s91_s20, [#allocation8], %s4376_s21, %s4376_s21, %s4377_s22  }
   0xc   :  { %s4378_s25 = smov [#allocation2]   ;;  %s75_s0 = sshll.u32 %s5749_s12, 4  ;;  %s76_s0 = int_to_ptr.hbm [resolvable:$true] %s75_s0 }
   0xd   :  { %s39_s27 = sshll.u32 %s4378_s25, 4  ;;  %s4379_s26 = smov 576   ;;  %s40_s27 = int_to_ptr.vmem [resolvable:$true] %s39_s27 }
   0xe   :  { %s4380_s28 = smov 36   ;;  %s4381_s18 = smov [#allocation6]  }
   0xf   :  { %45 = dma.hbm_to_vmem [thread:$0]  %s38_s24, 9216, %s40_s27, [#allocation3], %s4379_s26, %s4379_s26, %s4380_s28  }
  0x10   :  { %s77_s19 = sshll.u32 %s4381_s18, 4  ;;  %s4382_s30 = smov 320   ;;  %s78_s19 = int_to_ptr.vmem [resolvable:$true] %s77_s19 }
  0x11   :  { %s4383_s1 = smov 20   ;;  %s101_s8 = sshll.u32 %s5751_s14, 4  ;;  %s102_s8 = int_to_ptr.hbm [resolvable:$true] %s101_s8 }
  0x12   :  { %83 = dma.hbm_to_vmem [thread:$0]  %s76_s0, 5120, %s78_s19, [#allocation5], %s4382_s30, %s4382_s30, %s4383_s1  }
  0x13   :  { %s4384_s23 = smov [#allocation9]  }
  0x14   :  { %s103_s25 = sshll.u32 %s4384_s23, 4  ;;  %s104_s25 = int_to_ptr.vmem [resolvable:$true] %s103_s25 }
  0x15   :  { %109 = dma.hbm_to_vmem [thread:$0]  %s102_s8, 3072, %s104_s25, [#allocation8], %s4376_s21, %s4376_s21, %s4377_s22  }
  0x16   :  { %4366 = dma.done.wait [#allocation3], 9216  }
  0x17   :  { %4367 = vsyncadd [#allocation3], 4294958080 }
  0x18   :  { %4368 = dma.done.wait [#allocation5], 12288  }
  0x19   :  { %4369 = vsyncadd [#allocation5], 4294955008 }
  0x1a   :  { %4370 = dma.done.wait [#allocation8], 6144  }
  0x1b   :  { %4371 = vsyncadd [#allocation8], 4294961152  ;;  %s5971_s27 = sld [smem:[#allocation207_spill]]  ;;  %v3276_v3 = vld [vmem:[#allocation2 + $0x1f8] sm:$0xf]  ;;  %v3921_v6 = vld [vmem:[%s5739_s2] sm:$0xff] }
  0x1c   :  { %v3989_v4 = vld [vmem:[#allocation2 + $0x218] sm:$0xf0]  ;;  %v3240_v5 = vld [vmem:[#allocation2 + $0x1b0] sm:$0xf]  ;;  %v3980_v8 = vld [vmem:[#allocation2 + $0x1d0] sm:$0xf0] }
  0x1d   :  { %v4510_v7 = vor.u32 %v3989_v4, %v3276_v3  ;;  %vm145_vm0 = vcmask 130048   ;;  %v3204_v9 = vld [vmem:[#allocation2 + $0x168] sm:$0xf]  ;;  %v3985_v10 = vld [vmem:[#allocation2 + $0x1fc] sm:$0xf]  ;;  %v4514_v11 = vor.u32 %v3980_v8, %v3240_v5  ;;  %s5978_s26 = sld [smem:[#allocation208_spill]] }
  0x1e   :  { %v3278_v12 = vld [vmem:[#allocation2 + $0x21c] sm:$0xf0]  ;;  %v3990_v14 = vld [vmem:[#allocation2 + $0x220] sm:$0xf0]  ;;  %v3971_v15 = vld [vmem:[#allocation2 + $0x188] sm:$0xf0] }
  0x1f   :  { %612 = vmatpush.bf16.msra.mxu1 %v4510_v7  ;;  %v3284_v13 = vld [vmem:[#allocation2 + $0x200] sm:$0xf]  ;;  %v4516_v16 = vor.u32 %v3985_v10, %v3278_v12  ;;  %v3986_v18 = vld [vmem:[#allocation2 + $0x204] sm:$0xf]  ;;  %v3286_v19 = vld [vmem:[#allocation2 + $0x224] sm:$0xf0]  ;;  %v4528_v27 = vor.u32 %v3971_v15, %v3204_v9 }
  0x20   :  { %v4518_v17 = vor.u32 %v3990_v14, %v3284_v13  ;;  %v4521_v20 = vor.u32 %v3986_v18, %v3286_v19  ;;  %v3976_v21 = vld [vmem:[#allocation2 + $0x1b4] sm:$0xf]  ;;  %v3242_v22 = vld [vmem:[#allocation2 + $0x1d4] sm:$0xf0]  ;;  %v3981_v25 = vld [vmem:[#allocation2 + $0x1d8] sm:$0xf0] }
  0x21   :  { %v135_v0 = vld [vmem:[%s5971_s27] sm:$0xff]  ;;  %v136_v1 = vld [vmem:[%s5971_s27 + $0x8] sm:$0xff]  ;;  %5972 = vst [vmem:[#allocation13_spill] sm:$0xff] %v4516_v16  ;;  %v4525_v23 = vor.u32 %v3976_v21, %v3242_v22  ;;  %v3248_v24 = vld [vmem:[#allocation2 + $0x1b8] sm:$0xf]  ;;  %vm1843_vm1 = vcmask 1043456  }
  0x22   :  { %v4505_v2 = vpack.c.bf16 %v136_v1, %v135_v0  ;;  %640 = vmatpush.bf16.msra.mxu3 %v4518_v17  ;;  %v3977_v26 = vld [vmem:[#allocation2 + $0x1bc] sm:$0xf]  ;;  %v3168_v28 = vld [vmem:[#allocation2 + $0x120] sm:$0xf]  ;;  %v3962_v29 = vld [vmem:[#allocation2 + $0x140] sm:$0xf0]  ;;  %654 = vmatpush.bf16.msra.mxu0 %v4521_v20  ;;  %v4531_v30 = vor.u32 %v3981_v25, %v3248_v24 }
  0x23   :  { %5973 = vst [vmem:[#allocation14_spill] sm:$0xff] %v4525_v23  ;;  %613 = vmatpush.bf16.msra.mxu1 %v4514_v11  ;;  %v3250_v31 = vld [vmem:[#allocation2 + $0x1dc] sm:$0xf0]  ;;  %v3967_v33 = vld [vmem:[#allocation2 + $0x16c] sm:$0xf]  ;;  %v4542_v43 = vor.u32 %v3962_v29, %v3168_v28  ;;  %vm1839_vm2 = vcmask 64512  }
  0x24   :  { %156 = vmatpush.bf16.msra.mxu2 %v4505_v2  ;;  %v4533_v32 = vor.u32 %v3977_v26, %v3250_v31  ;;  %v3206_v34 = vld [vmem:[#allocation2 + $0x18c] sm:$0xf0]  ;;  %v3972_v36 = vld [vmem:[#allocation2 + $0x190] sm:$0xf0]  ;;  %v3214_v38 = vld [vmem:[#allocation2 + $0x194] sm:$0xf0] }
  0x25   :  { %v3212_v35 = vld [vmem:[#allocation2 + $0x170] sm:$0xf]  ;;  %v3968_v37 = vld [vmem:[#allocation2 + $0x174] sm:$0xf]  ;;  %v3132_v39 = vld [vmem:[#allocation2 + $0xd8] sm:$0xf]  ;;  %v4537_v40 = vor.u32 %v3967_v33, %v3206_v34 }
  0x26   :  { %641 = vmatpush.bf16.msra.mxu3 %v4531_v30  ;;  %v4539_v41 = vor.u32 %v3972_v36, %v3212_v35  ;;  %v3958_v42 = vld [vmem:[#allocation2 + $0x124] sm:$0xf]  ;;  %655 = vmatpush.bf16.msra.mxu0 %v4533_v32  ;;  %v4545_v44 = vor.u32 %v3968_v37, %v3214_v38  ;;  %v3170_v45 = vld [vmem:[#allocation2 + $0x144] sm:$0xf0]  ;;  %v3963_v47 = vld [vmem:[#allocation2 + $0x148] sm:$0xf0] }
  0x27   :  { %3021 = vmatmul.msk.bf16.vlgmr.msra.gmra.mxu2 %vm145_vm0, %v3921_v6  ;;  %5974 = vst [vmem:[#allocation15_spill] sm:$0xff] %v4537_v40  ;;  %614 = vmatpush.bf16.msra.mxu1 %v4528_v27  ;;  %v3176_v46 = vld [vmem:[#allocation2 + $0x128] sm:$0xf]  ;;  %v3953_v48 = vld [vmem:[#allocation2 + $0xf8] sm:$0xf0]  ;;  %v4549_v52 = vor.u32 %v3958_v42, %v3170_v45  ;;  %v4580_v21 = vld [vmem:[%s5978_s26] sm:$0xff] }
  0x28   :  { %626 = vmatpush.bf16.msrb.mxu2 %v4516_v16  ;;  %v3959_v49 = vld [vmem:[#allocation2 + $0x12c] sm:$0xf]  ;;  %v3178_v50 = vld [vmem:[#allocation2 + $0x14c] sm:$0xf0]  ;;  %v4551_v53 = vor.u32 %v3963_v47, %v3176_v46  ;;  %v3949_v54 = vld [vmem:[#allocation2 + $0xdc] sm:$0xf]  ;;  %v4554_v55 = vor.u32 %v3953_v48, %v3132_v39 }
  0x29   :  { %v3096_v51 = vld [vmem:[#allocation2 + $0x90] sm:$0xf]  ;;  %5975 = vst [vmem:[#allocation16_spill] sm:$0xff] %v4549_v52  ;;  %v4557_v56 = vor.u32 %v3959_v49, %v3178_v50  ;;  %v3134_v57 = vld [vmem:[#allocation2 + $0xfc] sm:$0xf0]  ;;  %v5757_v34 = vmov 1  }
  0x2a   :  { %642 = vmatpush.bf16.msra.mxu3 %v4539_v41  ;;  %656 = vmatpush.bf16.msra.mxu0 %v4545_v44  ;;  %v3140_v58 = vld [vmem:[#allocation2 + $0xe0] sm:$0xf]  ;;  %v3954_v59 = vld [vmem:[#allocation2 + $0x100] sm:$0xf0]  ;;  %v3944_v60 = vld [vmem:[#allocation2 + $0xb0] sm:$0xf0]  ;;  %v4561_v0 = vor.u32 %v3949_v54, %v3134_v57 }
  0x2b   :  { %615 = vmatpush.bf16.msra.mxu1 %v4542_v43  ;;  %v3950_v61 = vld [vmem:[#allocation2 + $0xe4] sm:$0xf]  ;;  %v3142_v62 = vld [vmem:[#allocation2 + $0x104] sm:$0xf0]  ;;  %v4563_v1 = vor.u32 %v3954_v59, %v3140_v58  ;;  %v3940_v3 = vld [vmem:[#allocation2 + $0x94] sm:$0xf]  ;;  %v4566_v4 = vor.u32 %v3944_v60, %v3096_v51  ;;  %4165 = vset.pattern.permute.xlu1 %v5757_v34 }
  0x2c   :  { %627 = vmatpush.bf16.msrb.mxu2 %v4525_v23  ;;  %v3060_v63 = vld [vmem:[#allocation2 + $0x48] sm:$0xf]  ;;  %5976 = vst [vmem:[#allocation17_spill] sm:$0xff] %v4561_v0  ;;  %v4569_v5 = vor.u32 %v3950_v61, %v3142_v62  ;;  %v3098_v6 = vld [vmem:[#allocation2 + $0xb4] sm:$0xf0]  ;;  %753 = vperm.xlu1 %4165, %v4580_v21   ;;  %v5764_v34 = vmov 3  }
  0x2d   :  { %v3104_v8 = vld [vmem:[#allocation2 + $0x98] sm:$0xf]  ;;  %v3945_v9 = vld [vmem:[#allocation2 + $0xb8] sm:$0xf0]  ;;  %v3935_v10 = vld [vmem:[#allocation2 + $0x68] sm:$0xf0]  ;;  %v4573_v15 = vor.u32 %v3940_v3, %v3098_v6 }
  0x2e   :  { %643 = vmatpush.bf16.msra.mxu3 %v4551_v53  ;;  %657 = vmatpush.bf16.msra.mxu0 %v4557_v56  ;;  %v3941_v12 = vld [vmem:[#allocation2 + $0x9c] sm:$0xf]  ;;  %v3106_v13 = vld [vmem:[#allocation2 + $0xbc] sm:$0xf0]  ;;  %v4575_v18 = vor.u32 %v3945_v9, %v3104_v8  ;;  %v3931_v19 = vld [vmem:[#allocation2 + $0x4c] sm:$0xf]  ;;  %v4583_v22 = vor.u32 %v3935_v10, %v3060_v63 }
  0x2f   :  { %616 = vmatpush.bf16.msra.mxu1 %v4554_v55  ;;  %v3024_v14 = vld [vmem:[#allocation2] sm:$0xf]  ;;  %5977 = vst [vmem:[#allocation18_spill] sm:$0xff] %v4573_v15  ;;  %v4586_v24 = vor.u32 %v3941_v12, %v3106_v13  ;;  %v3062_v25 = vld [vmem:[#allocation2 + $0x6c] sm:$0xf0]  ;;  %v6015_v23 = vmov 4  }
  0x30   :  { %628 = vmatpush.bf16.msrb.mxu2 %v4537_v40  ;;  %v3068_v26 = vld [vmem:[#allocation2 + $0x50] sm:$0xf]  ;;  %v3936_v28 = vld [vmem:[#allocation2 + $0x70] sm:$0xf0]  ;;  %v3926_v29 = vld [vmem:[#allocation2 + $0x20] sm:$0xf0]  ;;  %v4592_v37 = vor.u32 %v3931_v19, %v3062_v25 }
  0x31   :  { %v3932_v31 = vld [vmem:[#allocation2 + $0x54] sm:$0xf]  ;;  %v3070_v33 = vld [vmem:[#allocation2 + $0x74] sm:$0xf0]  ;;  %v3292_v35 = vld [vmem:[#allocation2 + $0x208] sm:$0xf]  ;;  %v4594_v38 = vor.u32 %v3936_v28, %v3068_v26  ;;  %v4597_v45 = vor.u32 %v3926_v29, %v3024_v14 }
  0x32   :  { %644 = vmatpush.bf16.msra.mxu3 %v4563_v1  ;;  %658 = vmatpush.bf16.msra.mxu0 %v4569_v5  ;;  %v3991_v36 = vld [vmem:[#allocation2 + $0x228] sm:$0xf0]  ;;  %5979 = vst [vmem:[#allocation19_spill] sm:$0xff] %v4592_v37  ;;  %v3922_v39 = vld [vmem:[#allocation2 + $0x4] sm:$0xf]  ;;  %v4600_v47 = vor.u32 %v3932_v31, %v3070_v33 }
  0x33   :  { %617 = vmatpush.bf16.msra.mxu1 %v4566_v4  ;;  %5980 = vst [vmem:[#allocation20_spill] sm:$0xff] %v4594_v38  ;;  %v3026_v42 = vld [vmem:[#allocation2 + $0x24] sm:$0xf0]  ;;  %v3256_v46 = vld [vmem:[#allocation2 + $0x1c0] sm:$0xf]  ;;  %v4602_v51 = vor.u32 %v3991_v36, %v3292_v35 }
  0x34   :  { %629 = vmatpush.bf16.msrb.mxu2 %v4549_v52  ;;  %5981 = vst [vmem:[#allocation21_spill] sm:$0xff] %v4600_v47  ;;  %v3032_v48 = vld [vmem:[#allocation2 + $0x8] sm:$0xf]  ;;  %v3927_v49 = vld [vmem:[#allocation2 + $0x28] sm:$0xf0]  ;;  %v4606_v62 = vor.u32 %v3922_v39, %v3026_v42 }
  0x35   :  { %v3923_v50 = vld [vmem:[#allocation2 + $0xc] sm:$0xf]  ;;  %v3034_v54 = vld [vmem:[#allocation2 + $0x2c] sm:$0xf0]  ;;  %v3982_v59 = vld [vmem:[#allocation2 + $0x1e0] sm:$0xf0]  ;;  %v4608_v63 = vor.u32 %v3927_v49, %v3032_v48 }
  0x36   :  { %645 = vmatpush.bf16.msra.mxu3 %v4575_v18  ;;  %659 = vmatpush.bf16.msra.mxu0 %v4586_v24  ;;  %v3987_v57 = vld [vmem:[#allocation2 + $0x20c] sm:$0xf]  ;;  %v3294_v58 = vld [vmem:[#allocation2 + $0x22c] sm:$0xf0]  ;;  %v3992_v61 = vld [vmem:[#allocation2 + $0x230] sm:$0xf0]  ;;  %v4612_v8 = vor.u32 %v3923_v50, %v3034_v54  ;;  %v4617_v10 = vor.u32 %v3982_v59, %v3256_v46 }
  0x37   :  { %618 = vmatpush.bf16.msra.mxu1 %v4583_v22  ;;  %v3300_v60 = vld [vmem:[#allocation2 + $0x210] sm:$0xf]  ;;  %5982 = vst [vmem:[#allocation22_spill] sm:$0xff] %v4606_v62  ;;  %v3988_v3 = vld [vmem:[#allocation2 + $0x214] sm:$0xf]  ;;  %v4614_v9 = vor.u32 %v3987_v57, %v3294_v58  ;;  %v4649_v58 = vld [vmem:[%s5978_s26 + $0x8] sm:$0xff] }
  0x38   :  { %630 = vmatpush.bf16.msrb.mxu2 %v4561_v0  ;;  %5983 = vst [vmem:[#allocation23_spill] sm:$0xff] %v4608_v63  ;;  %v3302_v6 = vld [vmem:[#allocation2 + $0x234] sm:$0xf0]  ;;  %v4619_v12 = vor.u32 %v3992_v61, %v3300_v60  ;;  %v3973_v14 = vld [vmem:[#allocation2 + $0x198] sm:$0xf0]  ;;  %757 = vperm.xlu1 %4165, %v4649_v58  }
  0x39   :  { %5984 = vst [vmem:[#allocation24_spill] sm:$0xff] %v4612_v8  ;;  %v3220_v13 = vld [vmem:[#allocation2 + $0x178] sm:$0xf]  ;;  %v4621_v19 = vor.u32 %v3988_v3, %v3302_v6  ;;  %v3184_v26 = vld [vmem:[#allocation2 + $0x130] sm:$0xf] }
  0x3a   :  { %646 = vmatpush.bf16.msra.mxu3 %v4594_v38  ;;  %660 = vmatpush.bf16.msra.mxu0 %v4600_v47  ;;  %5985 = vst [vmem:[#allocation25_spill] sm:$0xff] %v4614_v9  ;;  %v4628_v25 = vor.u32 %v3973_v14, %v3220_v13  ;;  %v3964_v28 = vld [vmem:[#allocation2 + $0x150] sm:$0xf0]  ;;  %v3148_v31 = vld [vmem:[#allocation2 + $0xe8] sm:$0xf]  ;;  %v5759_v14 = vmov 0  }
  0x3b   :  { %619 = vmatpush.bf16.msra.mxu1 %v4597_v45  ;;  %5986 = vst [vmem:[#allocation26_spill] sm:$0xff] %v4619_v12  ;;  %v4633_v29 = vor.u32 %v3964_v28, %v3184_v26  ;;  %v3955_v33 = vld [vmem:[#allocation2 + $0x108] sm:$0xf0]  ;;  %v3978_v36 = vld [vmem:[#allocation2 + $0x1c4] sm:$0xf]  ;;  %4164 = vset.pattern.permute.xlu0 %v5759_v14 }
  0x3c   :  { %631 = vmatpush.bf16.msrb.mxu2 %v4573_v15  ;;  %5987 = vst [vmem:[#allocation27_spill] sm:$0xff] %v4621_v19  ;;  %v4636_v35 = vor.u32 %v3955_v33, %v3148_v31  ;;  %v3258_v39 = vld [vmem:[#allocation2 + $0x1e4] sm:$0xf0]  ;;  %v3983_v48 = vld [vmem:[#allocation2 + $0x1e8] sm:$0xf0]  ;;  %742 = vperm.xlu0 %4164, %v4580_v21   ;;  %v5772_v15 = vmov 4  }
  0x3d   :  { %v3264_v42 = vld [vmem:[#allocation2 + $0x1c8] sm:$0xf]  ;;  %v4639_v46 = vor.u32 %v3978_v36, %v3258_v39  ;;  %v3979_v49 = vld [vmem:[#allocation2 + $0x1cc] sm:$0xf]  ;;  %v3266_v50 = vld [vmem:[#allocation2 + $0x1ec] sm:$0xf0] }
  0x3e   :  { %647 = vmatpush.bf16.msra.mxu3 %v4608_v63  ;;  %661 = vmatpush.bf16.msra.mxu0 %v4612_v8  ;;  %v4641_v54 = vor.u32 %v3983_v48, %v3264_v42  ;;  %v4643_v57 = vor.u32 %v3979_v49, %v3266_v50  ;;  %v3112_v59 = vld [vmem:[#allocation2 + $0xa0] sm:$0xf]  ;;  %v3946_v60 = vld [vmem:[#allocation2 + $0xc0] sm:$0xf0]  ;;  %v3969_v3 = vld [vmem:[#allocation2 + $0x17c] sm:$0xf] }
  0x3f   :  { %668 = vmatpush.bf16.msrb.mxu1 %v4602_v51  ;;  %5988 = vst [vmem:[#allocation28_spill] sm:$0xff] %v4639_v46  ;;  %v4653_v61 = vor.u32 %v3946_v60, %v3112_v59  ;;  %v3222_v6 = vld [vmem:[#allocation2 + $0x19c] sm:$0xf0]  ;;  %v3974_v28 = vld [vmem:[#allocation2 + $0x1a0] sm:$0xf0] }
  0x40   :  { %632 = vmatpush.bf16.msrb.mxu2 %v4592_v37  ;;  %5989 = vst [vmem:[#allocation29_spill] sm:$0xff] %v4641_v54  ;;  %v3228_v13 = vld [vmem:[#allocation2 + $0x180] sm:$0xf]  ;;  %v4657_v26 = vor.u32 %v3969_v3, %v3222_v6  ;;  %v3970_v31 = vld [vmem:[#allocation2 + $0x184] sm:$0xf]  ;;  %4168 = vset.pattern.permute.xlu1 %v5764_v34 }
  0x41   :  { %5990 = vst [vmem:[#allocation30_spill] sm:$0xff] %v4643_v57  ;;  %v3230_v33 = vld [vmem:[#allocation2 + $0x1a4] sm:$0xf0]  ;;  %v4660_v36 = vor.u32 %v3974_v28, %v3228_v13  ;;  %v3076_v42 = vld [vmem:[#allocation2 + $0x58] sm:$0xf]  ;;  %781 = vperm.xlu1 %4168, %v4649_v58  }
  0x42   :  { %696 = vmatpush.bf16.msrb.mxu3 %v4619_v12  ;;  %710 = vmatpush.bf16.msrb.mxu0 %v4621_v19  ;;  %5991 = vst [vmem:[#allocation31_spill] sm:$0xff] %v4653_v61  ;;  %v4662_v39 = vor.u32 %v3970_v31, %v3230_v33  ;;  %v3937_v48 = vld [vmem:[#allocation2 + $0x78] sm:$0xf0]  ;;  %v3960_v50 = vld [vmem:[#allocation2 + $0x134] sm:$0xf] }
  0x43   :  { %669 = vmatpush.bf16.msrb.mxu1 %v4617_v10  ;;  %5992 = vst [vmem:[#allocation32_spill] sm:$0xff] %v4657_v26  ;;  %v4666_v49 = vor.u32 %v3937_v48, %v3076_v42  ;;  %v3186_v59 = vld [vmem:[#allocation2 + $0x154] sm:$0xf0]  ;;  %v3965_v6 = vld [vmem:[#allocation2 + $0x158] sm:$0xf0] }
  0x44   :  { %633 = vmatpush.bf16.msrb.mxu2 %v4606_v62  ;;  %5993 = vst [vmem:[#allocation33_spill] sm:$0xff] %v4660_v36  ;;  %v3192_v60 = vld [vmem:[#allocation2 + $0x138] sm:$0xf]  ;;  %v4670_v3 = vor.u32 %v3960_v50, %v3186_v59  ;;  %v3961_v13 = vld [vmem:[#allocation2 + $0x13c] sm:$0xf]  ;;  %747 = vperm.xlu0 %4164, %v4649_v58  }
  0x45   :  { %5994 = vst [vmem:[#allocation34_spill] sm:$0xff] %v4662_v39  ;;  %v3194_v28 = vld [vmem:[#allocation2 + $0x15c] sm:$0xf0]  ;;  %v4673_v31 = vor.u32 %v3965_v6, %v3192_v60  ;;  %v3040_v42 = vld [vmem:[#allocation2 + $0x10] sm:$0xf] }
  0x46   :  { %697 = vmatpush.bf16.msrb.mxu3 %v4641_v54  ;;  %711 = vmatpush.bf16.msrb.mxu0 %v4643_v57  ;;  %5995 = vst [vmem:[#allocation35_spill] sm:$0xff] %v4666_v49  ;;  %v4675_v33 = vor.u32 %v3961_v13, %v3194_v28  ;;  %v3928_v48 = vld [vmem:[#allocation2 + $0x30] sm:$0xf0]  ;;  %v3951_v59 = vld [vmem:[#allocation2 + $0xec] sm:$0xf] }
  0x47   :  { %670 = vmatpush.bf16.msrb.mxu1 %v4628_v25  ;;  %5996 = vst [vmem:[#allocation36_spill] sm:$0xff] %v4670_v3  ;;  %v4681_v50 = vor.u32 %v3928_v48, %v3040_v42  ;;  %v3150_v14 = vld [vmem:[#allocation2 + $0x10c] sm:$0xf0]  ;;  %v3956_v6 = vld [vmem:[#allocation2 + $0x110] sm:$0xf0] }
  0x48   :  { %682 = vmatpush.bf16.msra.mxu2 %v4614_v9  ;;  %5997 = vst [vmem:[#allocation37_spill] sm:$0xff] %v4673_v31  ;;  %v4684_v60 = vor.u32 %v3951_v59, %v3150_v14  ;;  %v3952_v13 = vld [vmem:[#allocation2 + $0xf4] sm:$0xf]  ;;  %v3158_v28 = vld [vmem:[#allocation2 + $0x114] sm:$0xf0] }
  0x49   :  { %5998 = vst [vmem:[#allocation38_spill] sm:$0xff] %v4675_v33  ;;  %v3942_v42 = vld [vmem:[#allocation2 + $0xa4] sm:$0xf]  ;;  %v3114_v48 = vld [vmem:[#allocation2 + $0xc4] sm:$0xf0]  ;;  %4170 = vset.pattern.permute.xlu1 %v5772_v15 }
  0x4a   :  { %698 = vmatpush.bf16.msrb.mxu3 %v4660_v36  ;;  %712 = vmatpush.bf16.msrb.mxu0 %v4662_v39  ;;  %5999 = vst [vmem:[#allocation39_spill] sm:$0xff] %v4681_v50  ;;  %v3120_v34 = vld [vmem:[#allocation2 + $0xa8] sm:$0xf]  ;;  %v4695_v14 = vor.u32 %v3942_v42, %v3114_v48  ;;  %v3947_v59 = vld [vmem:[#allocation2 + $0xc8] sm:$0xf0] }
  0x4b   :  { %671 = vmatpush.bf16.msrb.mxu1 %v4633_v29  ;;  %6000 = vst [vmem:[#allocation40_spill] sm:$0xff] %v4684_v60  ;;  %v3943_v9 = vld [vmem:[#allocation2 + $0xac] sm:$0xf]  ;;  %v3122_v62 = vld [vmem:[#allocation2 + $0xcc] sm:$0xf0]  ;;  %v4697_v37 = vor.u32 %v3947_v59, %v3120_v34  ;;  %793 = vperm.xlu1 %4170, %v4649_v58  }
  0x4c   :  { %683 = vmatpush.bf16.msra.mxu2 %v4639_v46  ;;  %v4690_v46 = vor.u32 %v3952_v13, %v3158_v28  ;;  %6003 = vst [vmem:[#allocation43_spill] sm:$0xff] %v4695_v14  ;;  %v3078_v13 = vld [vmem:[#allocation2 + $0x7c] sm:$0xf0]  ;;  %v3938_v42 = vld [vmem:[#allocation2 + $0x80] sm:$0xf0] }
  0x4d   :  { %6004 = vst [vmem:[#allocation44_spill] sm:$0xff] %v4697_v37  ;;  %v3934_v48 = vld [vmem:[#allocation2 + $0x64] sm:$0xf]  ;;  %v3925_v15 = vld [vmem:[#allocation2 + $0x1c] sm:$0xf] }
  0x4e   :  { %699 = vmatpush.bf16.msrb.mxu3 %v4673_v31  ;;  %713 = vmatpush.bf16.msrb.mxu0 %v4675_v33  ;;  %6002 = vst [vmem:[#allocation42_spill] sm:$0xff] %v4690_v46  ;;  %v3050_v0 = vld [vmem:[#allocation2 + $0x3c] sm:$0xf0]  ;;  %v3984_v40 = vld [vmem:[#allocation2 + $0x1f0] sm:$0xf0] }
  0x4f   :  { %672 = vmatpush.bf16.msrb.mxu1 %v4636_v35  ;;  %v3236_v16 = vld [vmem:[#allocation2 + $0x188] sm:$0xf] }
  0x50   :  { %684 = vmatpush.bf16.msra.mxu2 %v4657_v26  ;;  %v3156_v26 = vld [vmem:[#allocation2 + $0xf0] sm:$0xf] }
  0x52   :  { %714 = vmatpush.bf16.msrb.mxu0 %v4690_v46 }
  0x53   :  { %673 = vmatpush.bf16.msrb.mxu1 %v4653_v61 }
  0x54   :  { %685 = vmatpush.bf16.msra.mxu2 %v4670_v3  ;;  %v4688_v3 = vor.u32 %v3956_v6, %v3156_v26  ;;  %v4699_v26 = vor.u32 %v3943_v9, %v3122_v62  ;;  %v3933_v6 = vld [vmem:[#allocation2 + $0x5c] sm:$0xf]  ;;  %v3086_v62 = vld [vmem:[#allocation2 + $0x84] sm:$0xf0]  ;;  %v6008_v9 = vmov 3  }
  0x55   :  { %v4704_v28 = vor.u32 %v3933_v6, %v3078_v13  ;;  %4167 = vset.pattern.permute.xlu0 %v6008_v9  ;;  %v4711_v59 = vor.u32 %v3934_v48, %v3086_v62  ;;  %v3924_v6 = vld [vmem:[#allocation2 + $0x14] sm:$0xf]  ;;  %v3042_v13 = vld [vmem:[#allocation2 + $0x34] sm:$0xf0]  ;;  %v4721_v48 = vor.u32 %v3925_v15, %v3050_v0  ;;  %v5778_v62 = vmov 2  }
  0x56   :  { %6001 = vst [vmem:[#allocation41_spill] sm:$0xff] %v4688_v3  ;;  %700 = vmatpush.bf16.msrb.mxu3 %v4688_v3  ;;  %715 = vmatpush.bf16.msrb.mxu0 %v4699_v26  ;;  %v3308_v0 = vld [vmem:[#allocation2 + $0x218] sm:$0xf]  ;;  %v3993_v15 = vld [vmem:[#allocation2 + $0x238] sm:$0xf0] }
  0x57   :  { %674 = vmatpush.bf16.msrb.mxu1 %v4666_v49  ;;  %6005 = vst [vmem:[#allocation45_spill] sm:$0xff] %v4699_v26  ;;  %777 = vperm.xlu0 %4167, %v4580_v21  }
  0x58   :  { %686 = vmatpush.bf16.msra.mxu2 %v4684_v60  ;;  %6006 = vst [vmem:[#allocation46_spill] sm:$0xff] %v4704_v28  ;;  %v3084_v60 = vld [vmem:[#allocation2 + $0x60] sm:$0xf]  ;;  %4166 = vset.pattern.permute.xlu2 %v5778_v62  ;;  %v3272_v62 = vld [vmem:[#allocation2 + $0x1d0] sm:$0xf] }
  0x59   :  { %v4707_v34 = vor.u32 %v3938_v42, %v3084_v60  ;;  %6009 = vst [vmem:[#allocation48_spill] sm:$0xff] %v4711_v59  ;;  %v4717_v60 = vor.u32 %v3924_v6, %v3042_v13  ;;  %v3929_v42 = vld [vmem:[#allocation2 + $0x38] sm:$0xf0]  ;;  %765 = vperm.xlu2 %4166, %v4580_v21   ;;  %v5781_v6 = vmov 6   ;;  %v4391_v13 = vmov 7  }
  0x5a   :  { %701 = vmatpush.bf16.msrb.mxu3 %v4697_v37  ;;  %716 = vmatpush.bf16.msrb.mxu0 %v4711_v59  ;;  %6012 = vst [vmem:[#allocation51_spill] sm:$0xff] %v4721_v48  ;;  %v6018_v59 = vmov 0  }
  0x5b   :  { %675 = vmatpush.bf16.msrb.mxu1 %v4681_v50  ;;  %6007 = vst [vmem:[#allocation47_spill] sm:$0xff] %v4707_v34  ;;  %4173 = vset.pattern.permute.xlu1 %v5781_v6  ;;  %v4735_v6 = vor.u32 %v3984_v40, %v3272_v62  ;;  %v3200_v40 = vld [vmem:[#allocation2 + $0x140] sm:$0xf]  ;;  %v3966_v62 = vld [vmem:[#allocation2 + $0x160] sm:$0xf0] }
  0x5c   :  { %687 = vmatpush.bf16.msra.mxu2 %v4695_v14  ;;  %v3048_v14 = vld [vmem:[#allocation2 + $0x18] sm:$0xf]  ;;  %6010 = vst [vmem:[#allocation49_spill] sm:$0xff] %v4717_v60  ;;  %813 = vperm.xlu1 %4173, %v4580_v21  }
  0x5d   :  { %v4719_v52 = vor.u32 %v3929_v42, %v3048_v14  ;;  %6014 = vst [vmem:[#allocation53_spill] sm:$0xff] %v4735_v6 }
  0x5e   :  { %702 = vmatpush.bf16.msrb.mxu3 %v4707_v34  ;;  %717 = vmatpush.bf16.msrb.mxu0 %v4721_v48  ;;  %v3975_v48 = vld [vmem:[#allocation2 + $0x1a8] sm:$0xf0] }
  0x5f   :  { %6011 = vst [vmem:[#allocation50_spill] sm:$0xff] %v4719_v52 }
  0x60   :  { %688 = vmatpush.bf16.msra.mxu2 %v4704_v28  ;;  %v4732_v28 = vor.u32 %v3993_v15, %v3308_v0  ;;  %v4743_v0 = vor.u32 %v3975_v48, %v3236_v16  ;;  %v4746_v15 = vor.u32 %v3966_v62, %v3200_v40  ;;  %v3128_v48 = vld [vmem:[#allocation2 + $0xb0] sm:$0xf]  ;;  %v3092_v62 = vld [vmem:[#allocation2 + $0x68] sm:$0xf] }
  0x61   :  { %769 = vperm.xlu2 %4166, %v4649_v58  }
  0x62   :  { %703 = vmatpush.bf16.msrb.mxu3 %v4719_v52  ;;  %6013 = vst [vmem:[#allocation52_spill] sm:$0xff] %v4732_v28  ;;  %v5790_v52 = vmov 5  }
  0x63   :  { %4172 = vset.pattern.permute.xlu0 %v5790_v52  ;;  %6016 = vst [vmem:[#allocation54_spill] sm:$0xff] %v4743_v0 }
  0x64   :  { %689 = vmatpush.bf16.msra.mxu2 %v4717_v60  ;;  %4175 = vset.pattern.permute.xlu1 %v4391_v13  ;;  %6017 = vst [vmem:[#allocation55_spill] sm:$0xff] %v4746_v15 }
  0x65   :  { %825 = vperm.xlu1 %4175, %v4580_v21   ;;  %805 = vperm.xlu0 %4172, %v4649_v58  }
  0x69   :  { %4169 = vset.pattern.permute.xlu2 %v6015_v23 }
  0x6a   :  { %789 = vperm.xlu2 %4169, %v4580_v21  }
  0x72   :  { %4171 = vset.pattern.permute.xlu2 %v5790_v52  ;;  %v6021_v52 = vmov 6  }
  0x73   :  { %801 = vperm.xlu2 %4171, %v4580_v21  }
  0x7b   :  { %4174 = vset.pattern.permute.xlu2 %v6021_v52 }
  0x7c   :  { %817 = vperm.xlu2 %4174, %v4649_v58  }
  0x84   :  { %4176 = vset.pattern.permute.xlu2 %v4391_v13 }
  0x85   :  { %829 = vperm.xlu2 %4176, %v4649_v58  }
  0x8d   :  { %4179 = vset.pattern.permute.xlu2 %v6018_v59 }
  0xaa   :  { %v158_v14 = vpop.f32.mrf.mxu2 }
  0xb2   :  { %v160_v42 = vpop.f32.mrf.mxu2 }
  0xb3   :  { %v243_v60 = vpack.c.bf16 %v160_v42, %v158_v14  ;;  %v4393_v14 = vmov 8   ;;  %v3164_v42 = vld [vmem:[#allocation2 + $0xf8] sm:$0xf] }
  0xb4   :  { %4178 = vset.pattern.permute.xlu1 %v4393_v14  ;;  %4177 = vset.pattern.permute.xlu0 %v4393_v14  ;;  %v3939_v14 = vld [vmem:[#allocation2 + $0x88] sm:$0xf0] }
  0xb5   :  { %620 = vmatmul.bf16.vlgmr.msra.gmra.mxu1 %v243_v60  ;;  %634 = vmatmul.bf16.vlgmr.msrb.gmra.mxu2 %v243_v60 }
  0xb6   :  { %648 = vmatmul.bf16.vlgmr.msra.gmra.mxu3 %v243_v60  ;;  %662 = vmatmul.bf16.vlgmr.msra.gmra.mxu0 %v243_v60 }
  0xb7   :  { %724 = vmatpush.bf16.msra.mxu1 %v4732_v28  ;;  %841 = vperm.xlu1 %4178, %v4649_v58   ;;  %v3957_v28 = vld [vmem:[#allocation2 + $0x118] sm:$0xf0] }
  0xb8   :  { %837 = vperm.xlu0 %4177, %v4580_v21   ;;  %v4753_v16 = vor.u32 %v3957_v28, %v3164_v42  ;;  %v6022_v21 = vmov 1   ;;  %v4762_v28 = vor.u32 %v3939_v14, %v3092_v62  ;;  %v3056_v42 = vld [vmem:[#allocation2 + $0x20] sm:$0xf] }
  0xba   :  { %6019 = vst [vmem:[#allocation56_spill] sm:$0xff] %v4753_v16 }
  0xbb   :  { %725 = vmatpush.bf16.msra.mxu1 %v4735_v6  ;;  %v3948_v6 = vld [vmem:[#allocation2 + $0xd0] sm:$0xf0]  ;;  %6023 = vst [vmem:[#allocation58_spill] sm:$0xff] %v4762_v28 }
  0xbc   :  { %v4756_v40 = vor.u32 %v3948_v6, %v3128_v48  ;;  %v4770_v6 = vpop.permute.xlu1 %753  ;;  %v4772_v48 = vpop.permute.xlu2 %765 }
  0xbd   :  { %6025 = vst [vmem:[#allocation60_spill] sm:$0xff] %v4770_v6 }
  0xbe   :  { %6020 = vst [vmem:[#allocation57_spill] sm:$0xff] %v4756_v40 }
  0xbf   :  { %726 = vmatpush.bf16.msra.mxu1 %v4743_v0  ;;  %4180 = vset.pattern.permute.xlu1 %v6018_v59  ;;  %6026 = vst [vmem:[#allocation61_spill] sm:$0xff] %v4772_v48 }
  0xc0   :  { %4182 = vset.pattern.permute.xlu0 %v6022_v21 }
  0xc3   :  { %727 = vmatpush.bf16.msra.mxu1 %v4746_v15  ;;  %v3930_v15 = vld [vmem:[#allocation2 + $0x40] sm:$0xf0] }
  0xc4   :  { %v4765_v0 = vor.u32 %v3930_v15, %v3056_v42  ;;  %v4774_v62 = vpop.permute.xlu1 %757  ;;  %v4776_v14 = vpop.permute.xlu2 %769 }
  0xc5   :  { %676 = vmatmul.bf16.vlgmr.msrb.gmra.mxu1 %v243_v60  ;;  %690 = vmatmul.bf16.vlgmr.msra.gmra.mxu2 %v243_v60  ;;  %6027 = vst [vmem:[#allocation62_spill] sm:$0xff] %v4774_v62 }
  0xc6   :  { %704 = vmatmul.bf16.vlgmr.msrb.gmra.mxu3 %v243_v60  ;;  %718 = vmatmul.bf16.vlgmr.msrb.gmra.mxu0 %v243_v60  ;;  %6024 = vst [vmem:[#allocation59_spill] sm:$0xff] %v4765_v0 }
  0xc7   :  { %728 = vmatpush.bf16.msra.mxu1 %v4753_v16  ;;  %6028 = vst [vmem:[#allocation63_spill] sm:$0xff] %v4776_v14 }
  0xcb   :  { %729 = vmatpush.bf16.msra.mxu1 %v4756_v40  ;;  %v4778_v40 = vpop.permute.xlu0 %742 }
  0xcc   :  { %6029 = vst [vmem:[#allocation64_spill] sm:$0xff] %v4778_v40  ;;  %v4780_v42 = vpop.permute.xlu1 %781  ;;  %v4782_v13 = vpop.permute.xlu2 %789 }
  0xcd   :  { %6030 = vst [vmem:[#allocation65_spill] sm:$0xff] %v4780_v42 }
  0xce   :  { %6031 = vst [vmem:[#allocation66_spill] sm:$0xff] %v4782_v13 }
  0xcf   :  { %730 = vmatpush.bf16.msra.mxu1 %v4762_v28 }
  0xd3   :  { %731 = vmatpush.bf16.msra.mxu1 %v4765_v0  ;;  %v4784_v16 = vpop.permute.xlu0 %747 }
  0xd4   :  { %6032 = vst [vmem:[#allocation67_spill] sm:$0xff] %v4784_v16  ;;  %v4786_v34 = vpop.permute.xlu1 %793  ;;  %v4788_v46 = vpop.permute.xlu2 %801 }
  0xd5   :  { %6033 = vst [vmem:[#allocation68_spill] sm:$0xff] %v4786_v34 }
  0xd6   :  { %732 = vmatmul.bf16.vlgmr.msra.gmra.mxu1 %v243_v60  ;;  %6034 = vst [vmem:[#allocation69_spill] sm:$0xff] %v4788_v46 }
  0xdb   :  { %v4792_v36 = vpop.permute.xlu0 %777 }
  0xdc   :  { %6035 = vst [vmem:[#allocation70_spill] sm:$0xff] %v4792_v36  ;;  %v4796_v50 = vpop.permute.xlu1 %813 }
  0xdd   :  { %6036 = vst [vmem:[#allocation71_spill] sm:$0xff] %v4796_v50 }
  0xe3   :  { %v4802_v61 = vpop.permute.xlu0 %805 }
  0xe4   :  { %6038 = vst [vmem:[#allocation73_spill] sm:$0xff] %v4802_v61 }
 0x132   :  { %v621_v15 = vpop.f32.mrf.mxu1 }
 0x133   :  { %v663_v58 = vpop.f32.mrf.mxu0  ;;  %v750_v57 = vmul.f32 %v4778_v40, %v621_v15  ;;  %v3995_v40 = vld [vmem:[%s5743_s6] sm:$0xff] }
 0x138   :  { %v635_v0 = vpop.f32.mrf.mxu2 }
 0x139   :  { %v649_v60 = vpop.f32.mrf.mxu3  ;;  %v760_v31 = vmul.f32 %v4770_v6, %v635_v0 }
 0x13a   :  { %v623_v28 = vpop.f32.mrf.mxu1  ;;  %v772_v49 = vmul.f32 %v4772_v48, %v649_v60 }
 0x13b   :  { %v665_v33 = vpop.f32.mrf.mxu0  ;;  %v751_v54 = vmul.f32 %v4784_v16, %v623_v28  ;;  %v762_v19 = vadd.f32 %v760_v31, %v750_v57  ;;  %v784_v28 = vmul.f32 %v4792_v36, %v663_v58  ;;  %v3536_v16 = vld [vmem:[#allocation4 + $0x1b4] sm:$0xf0] }
 0x13c   :  { %v785_v15 = vmul.f32 %v4780_v42, %v665_v33  ;;  %v4018_v42 = vld [vmem:[#allocation4 + $0xb4] sm:$0xf] }
 0x13d   :  { %v774_v0 = vadd.f32 %v772_v49, %v762_v19  ;;  %v4809_v19 = vpop.permute.xlu1 %825 }
 0x13e   :  { %6039 = vst [vmem:[#allocation74_spill] sm:$0xff] %v4809_v19 }
 0x140   :  { %v637_v26 = vpop.f32.mrf.mxu2 }
 0x141   :  { %v651_v37 = vpop.f32.mrf.mxu3  ;;  %v761_v39 = vmul.f32 %v4774_v62, %v637_v26  ;;  %v4800_v26 = vpop.permute.xlu2 %817 }
 0x142   :  { %v677_v3 = vpop.f32.mrf.mxu1  ;;  %v773_v47 = vmul.f32 %v4776_v14, %v651_v37  ;;  %6037 = vst [vmem:[#allocation72_spill] sm:$0xff] %v4800_v26 }
 0x143   :  { %v763_v12 = vadd.f32 %v761_v39, %v751_v54  ;;  %v719_v62 = vpop.f32.mrf.mxu0  ;;  %v796_v54 = vmul.f32 %v4782_v13, %v677_v3  ;;  %v786_v39 = vadd.f32 %v784_v28, %v774_v0 }
 0x145   :  { %v775_v6 = vadd.f32 %v773_v47, %v763_v12  ;;  %v798_v12 = vadd.f32 %v796_v54, %v786_v39  ;;  %v832_v54 = vmul.f32 %v4809_v19, %v719_v62  ;;  %v3518_v62 = vld [vmem:[#allocation4 + $0x188] sm:$0xf] }
 0x146   :  { %v3444_v19 = vld [vmem:[#allocation4 + $0x104] sm:$0xf0] }
 0x147   :  { %v787_v37 = vadd.f32 %v785_v15, %v775_v6  ;;  %v4818_v15 = vpop.permute.xlu1 %841 }
 0x148   :  { %v691_v8 = vpop.f32.mrf.mxu2  ;;  %6042 = vst [vmem:[#allocation77_spill] sm:$0xff] %v4818_v15 }
 0x149   :  { %v705_v63 = vpop.f32.mrf.mxu3  ;;  %v808_v31 = vmul.f32 %v4788_v46, %v691_v8  ;;  %v4813_v3 = vpop.permute.xlu2 %829  ;;  %v3324_v46 = vld [vmem:[#allocation4 + $0x1c] sm:$0xf0] }
 0x14a   :  { %v679_v38 = vpop.f32.mrf.mxu1  ;;  %v820_v33 = vmul.f32 %v4796_v50, %v705_v63  ;;  %6040 = vst [vmem:[#allocation75_spill] sm:$0xff] %v4813_v3  ;;  %v4816_v8 = vpop.permute.xlu0 %837  ;;  %v4049_v50 = vld [vmem:[#allocation4 + $0x1a8] sm:$0xf0] }
 0x14b   :  { %v797_v57 = vmul.f32 %v4786_v34, %v679_v38  ;;  %v810_v58 = vadd.f32 %v808_v31, %v798_v12  ;;  %v721_v0 = vpop.f32.mrf.mxu0  ;;  %6041 = vst [vmem:[#allocation76_spill] sm:$0xff] %v4816_v8 }
 0x14d   :  { %v799_v49 = vadd.f32 %v797_v57, %v787_v37  ;;  %v822_v6 = vadd.f32 %v820_v33, %v810_v58  ;;  %v833_v57 = vmul.f32 %v4813_v3, %v721_v0  ;;  %v4045_v58 = vld [vmem:[#allocation4 + $0x18c] sm:$0xf]  ;;  %v3490_v0 = vld [vmem:[#allocation4 + $0x150] sm:$0xf] }
 0x14f   :  { %v834_v37 = vadd.f32 %v832_v54, %v822_v6  ;;  %v4041_v6 = vld [vmem:[#allocation4 + $0x168] sm:$0xf0] }
 0x150   :  { %v693_v60 = vpop.f32.mrf.mxu2  ;;  %v4833_v54 = vor.u32 %v4041_v6, %v3490_v0 }
 0x151   :  { %v809_v47 = vmul.f32 %v4802_v61, %v693_v60  ;;  %v707_v14 = vpop.f32.mrf.mxu3  ;;  %v3996_v61 = vld [vmem:[#allocation4 + $0x4] sm:$0xf] }
 0x152   :  { %v821_v38 = vmul.f32 %v4800_v26, %v707_v14  ;;  %v3526_v26 = vld [vmem:[#allocation4 + $0x190] sm:$0xf] }
 0x153   :  { %v733_v48 = vpop.f32.mrf.mxu1  ;;  %v811_v36 = vadd.f32 %v809_v47, %v799_v49  ;;  %v4048_v49 = vld [vmem:[#allocation4 + $0x1a0] sm:$0xf0]  ;;  %v4880_v13 = vor.u32 %v4049_v50, %v3526_v26  ;;  %v4891_v50 = vor.u32 %v3996_v61, %v3324_v46  ;;  %v3442_v61 = vld [vmem:[#allocation4 + $0xe8] sm:$0xf] }
 0x154   :  { %v844_v39 = vmul.f32 %v4816_v8, %v733_v48  ;;  %v4828_v33 = vor.u32 %v4048_v49, %v3518_v62  ;;  %v3520_v48 = vld [vmem:[#allocation4 + $0x1a4] sm:$0xf0]  ;;  %v4024_v62 = vld [vmem:[#allocation4 + $0xe4] sm:$0xf]  ;;  %v3436_v49 = vld [vmem:[#allocation4 + $0xfc] sm:$0xf0] }
 0x155   :  { %v823_v28 = vadd.f32 %v821_v38, %v811_v36  ;;  %v3994_v36 = vld [vmem:[%s5740_s3] sm:$0xff]  ;;  %v4830_v38 = vor.u32 %v4045_v58, %v3520_v48  ;;  %v4046_v58 = vld [vmem:[#allocation4 + $0x194] sm:$0xf]  ;;  %v3528_v48 = vld [vmem:[#allocation4 + $0x1ac] sm:$0xf0]  ;;  %6054 = vst [vmem:[#allocation89_spill] sm:$0xff] %v4880_v13 }
 0x156   :  { %v846_v47 = vadd.f32 %v844_v39, %v834_v37  ;;  %1251 = vmatpush.bf16.msra.mxu0 %v4828_v33  ;;  %v4034_v37 = vld [vmem:[#allocation4 + $0x130] sm:$0xf0]  ;;  %v4847_v6 = vor.u32 %v4046_v58, %v3528_v48  ;;  %v3380_v48 = vld [vmem:[#allocation4 + $0x8c] sm:$0xf0]  ;;  %v3472_v8 = vld [vmem:[#allocation4 + $0x13c] sm:$0xf0] }
 0x157   :  { %v835_v63 = vadd.f32 %v833_v57, %v823_v28  ;;  %6043 = vst [vmem:[#allocation78_spill] sm:$0xff] %v4830_v38  ;;  %v4038_v28 = vld [vmem:[#allocation4 + $0x154] sm:$0xf]  ;;  %v3492_v57 = vld [vmem:[#allocation4 + $0x16c] sm:$0xf0] }
 0x158   :  { %v4836_v39 = vor.u32 %v4038_v28, %v3492_v57  ;;  %6046 = vst [vmem:[#allocation81_spill] sm:$0xff] %v4847_v6  ;;  %v4850_v28 = vor.u32 %v4024_v62, %v3436_v49  ;;  %v3406_v57 = vld [vmem:[#allocation4 + $0xa8] sm:$0xf]  ;;  %1293 = vmatpush.bf16.msrb.mxu1 %v4847_v6  ;;  %v3378_v62 = vld [vmem:[#allocation4 + $0x70] sm:$0xf] }
 0x159   :  { %v4013_v49 = vld [vmem:[#allocation4 + $0x88] sm:$0xf0]  ;;  %v4010_v58 = vld [vmem:[#allocation4 + $0x74] sm:$0xf]  ;;  %6056 = vst [vmem:[#allocation91_spill] sm:$0xff] %v4891_v50 }
 0x15a   :  { %6044 = vst [vmem:[#allocation79_spill] sm:$0xff] %v4836_v39  ;;  %1252 = vmatpush.bf16.msra.mxu0 %v4833_v54  ;;  %v4863_v3 = vor.u32 %v4013_v49, %v3378_v62  ;;  %v3322_v49 = vld [vmem:[#allocation4] sm:$0xf] }
 0x15b   :  { %v735_v31 = vpop.f32.mrf.mxu1  ;;  %6047 = vst [vmem:[#allocation82_spill] sm:$0xff] %v4850_v28 }
 0x15c   :  { %v845_v60 = vmul.f32 %v4818_v15, %v735_v31  ;;  %v3462_v31 = vld [vmem:[#allocation4 + $0x118] sm:$0xf]  ;;  %v4032_v15 = vld [vmem:[#allocation4 + $0x124] sm:$0xf] }
 0x15e   :  { %v847_v14 = vadd.f32 %v845_v60, %v835_v63  ;;  %v4031_v63 = vld [vmem:[#allocation4 + $0x11c] sm:$0xf]  ;;  %v3464_v60 = vld [vmem:[#allocation4 + $0x134] sm:$0xf0] }
 0x160   :  { %v850_v12 = vpack.c.bf16 %v847_v14, %v846_v47  ;;  %v4839_v47 = vor.u32 %v4034_v37, %v3462_v31  ;;  %v4842_v14 = vor.u32 %v4031_v63, %v3464_v60  ;;  %v4020_v31 = vld [vmem:[#allocation4 + $0xc0] sm:$0xf0]  ;;  %v4017_v37 = vld [vmem:[#allocation4 + $0xac] sm:$0xf]  ;;  %v3408_v63 = vld [vmem:[#allocation4 + $0xc4] sm:$0xf0] }
 0x161   :  { %v4039_v60 = vld [vmem:[#allocation4 + $0x15c] sm:$0xf] }
 0x162   :  { %866 = vmatpush.bf16.msrb.mxu2 %v850_v12  ;;  %6045 = vst [vmem:[#allocation80_spill] sm:$0xff] %v4842_v14  ;;  %v3434_v12 = vld [vmem:[#allocation4 + $0xe0] sm:$0xf]  ;;  %1253 = vmatpush.bf16.msra.mxu0 %v4839_v47 }
 0x165   :  { %3314 = vmatmul.msk.bf16.vlgmr.msrb.gmra.mxu2 %vm145_vm0, %v3994_v36  ;;  %v4027_v36 = vld [vmem:[#allocation4 + $0xf8] sm:$0xf0] }
 0x166   :  { %1265 = vmatpush.bf16.msra.mxu2 %v4830_v38  ;;  %v4845_v0 = vor.u32 %v4027_v36, %v3434_v12  ;;  %v4854_v38 = vor.u32 %v4020_v31, %v3406_v57  ;;  %v4859_v36 = vor.u32 %v4017_v37, %v3408_v63  ;;  %v4865_v57 = vor.u32 %v4032_v15, %v3472_v8  ;;  %v3350_v31 = vld [vmem:[#allocation4 + $0x38] sm:$0xf]  ;;  %v4006_v37 = vld [vmem:[#allocation4 + $0x50] sm:$0xf0]  ;;  %v4003_v63 = vld [vmem:[#allocation4 + $0x3c] sm:$0xf] }
 0x167   :  { %v4872_v62 = vor.u32 %v4006_v37, %v3350_v31  ;;  %v3416_v31 = vld [vmem:[#allocation4 + $0xcc] sm:$0xf0]  ;;  %v3534_v37 = vld [vmem:[#allocation4 + $0x198] sm:$0xf] }
 0x168   :  { %1254 = vmatpush.bf16.msra.mxu0 %v4845_v0  ;;  %6049 = vst [vmem:[#allocation84_spill] sm:$0xff] %v4859_v36 }
 0x169   :  { %6050 = vst [vmem:[#allocation85_spill] sm:$0xff] %v4865_v57 }
 0x16a   :  { %1266 = vmatpush.bf16.msra.mxu2 %v4836_v39  ;;  %v3500_v39 = vld [vmem:[#allocation4 + $0x174] sm:$0xf0] }
 0x16b   :  { %v4856_v12 = vor.u32 %v4039_v60, %v3500_v39  ;;  %v4868_v39 = vor.u32 %v4010_v58, %v3380_v48  ;;  %v3352_v60 = vld [vmem:[#allocation4 + $0x54] sm:$0xf0]  ;;  %v3999_v58 = vld [vmem:[#allocation4 + $0x18] sm:$0xf0] }
 0x16c   :  { %1255 = vmatpush.bf16.msra.mxu0 %v4854_v38  ;;  %v4877_v15 = vor.u32 %v4003_v63, %v3352_v60  ;;  %v3498_v48 = vld [vmem:[#allocation4 + $0x158] sm:$0xf]  ;;  %v4885_v63 = vor.u32 %v4018_v42, %v3416_v31  ;;  %v4050_v60 = vld [vmem:[#allocation4 + $0x1b0] sm:$0xf0] }
 0x16d   :  { %6048 = vst [vmem:[#allocation83_spill] sm:$0xff] %v4856_v12  ;;  %1294 = vmatpush.bf16.msrb.mxu1 %v4856_v12  ;;  %v4014_v31 = vld [vmem:[#allocation4 + $0x90] sm:$0xf0] }
 0x16e   :  { %1267 = vmatpush.bf16.msra.mxu2 %v4842_v14  ;;  %6051 = vst [vmem:[#allocation86_spill] sm:$0xff] %v4868_v39 }
 0x16f   :  { %6053 = vst [vmem:[#allocation88_spill] sm:$0xff] %v4877_v15 }
 0x170   :  { %1256 = vmatpush.bf16.msra.mxu0 %v4863_v3  ;;  %6055 = vst [vmem:[#allocation90_spill] sm:$0xff] %v4885_v63 }
 0x171   :  { %1295 = vmatpush.bf16.msrb.mxu1 %v4865_v57  ;;  %v4002_v57 = vld [vmem:[#allocation4 + $0x30] sm:$0xf0] }
 0x172   :  { %1268 = vmatpush.bf16.msra.mxu2 %v4850_v28  ;;  %v4025_v28 = vld [vmem:[#allocation4 + $0xec] sm:$0xf] }
 0x173   :  { %v4874_v8 = vor.u32 %v4025_v28, %v3444_v19  ;;  %v4883_v28 = vor.u32 %v3999_v58, %v3322_v49  ;;  %v4035_v49 = vld [vmem:[#allocation4 + $0x138] sm:$0xf0]  ;;  %v4021_v58 = vld [vmem:[#allocation4 + $0xc8] sm:$0xf0] }
 0x174   :  { %1257 = vmatpush.bf16.msra.mxu0 %v4872_v62 }
 0x175   :  { %6052 = vst [vmem:[#allocation87_spill] sm:$0xff] %v4874_v8  ;;  %1296 = vmatpush.bf16.msrb.mxu1 %v4874_v8  ;;  %v3374_v8 = vld [vmem:[#allocation4 + $0x50] sm:$0xf] }
 0x176   :  { %1269 = vmatpush.bf16.msra.mxu2 %v4859_v36  ;;  %v4042_v36 = vld [vmem:[#allocation4 + $0x170] sm:$0xf0] }
 0x177   :  { %v4899_v42 = vor.u32 %v4042_v36, %v3498_v48  ;;  %v3386_v48 = vld [vmem:[#allocation4 + $0x78] sm:$0xf] }
 0x178   :  { %1258 = vmatpush.bf16.msra.mxu0 %v4883_v28 }
 0x179   :  { %1297 = vmatpush.bf16.msrb.mxu1 %v4885_v63  ;;  %6059 = vst [vmem:[#allocation94_spill] sm:$0xff] %v4899_v42 }
 0x17a   :  { %1270 = vmatpush.bf16.msra.mxu2 %v4868_v39  ;;  %v4047_v39 = vld [vmem:[#allocation4 + $0x19c] sm:$0xf] }
 0x17b   :  { %v4896_v26 = vor.u32 %v4047_v39, %v3536_v16  ;;  %v4028_v16 = vld [vmem:[#allocation4 + $0x100] sm:$0xf0]  ;;  %v3414_v39 = vld [vmem:[#allocation4 + $0xb0] sm:$0xf] }
 0x17c   :  { %v4910_v36 = vor.u32 %v4028_v16, %v3442_v61  ;;  %v4000_v61 = vld [vmem:[#allocation4 + $0x20] sm:$0xf0]  ;;  %v3542_v16 = vld [vmem:[#allocation4 + $0x1a0] sm:$0xf] }
 0x17d   :  { %6058 = vst [vmem:[#allocation93_spill] sm:$0xff] %v4896_v26 }
 0x17e   :  { %1271 = vmatpush.bf16.msra.mxu2 %v4877_v15  ;;  %6061 = vst [vmem:[#allocation96_spill] sm:$0xff] %v4910_v36 }
 0x182   :  { %1272 = vmatpush.bf16.msra.mxu2 %v4891_v50  ;;  %v4030_v50 = vld [vmem:[#allocation4 + $0x110] sm:$0xf0] }
 0x186   :  { %1321 = vmatpush.bf16.msrb.mxu2 %v4896_v26 }
 0x1e8   :  { %v868_v14 = vpop.f32.mrf.mxu2 }
 0x1f0   :  { %v870_v34 = vpop.f32.mrf.mxu2 }
 0x1f1   :  { %v875_v19 = vpack.c.bf16 %v870_v34, %v868_v14  ;;  %v4894_v34 = vor.u32 %v4050_v60, %v3534_v37  ;;  %v3470_v14 = vld [vmem:[#allocation4 + $0x120] sm:$0xf]  ;;  %v4916_v37 = vor.u32 %v4014_v31, %v3386_v48  ;;  %v4007_v60 = vld [vmem:[#allocation4 + $0x58] sm:$0xf0]  ;;  %v3388_v31 = vld [vmem:[#allocation4 + $0x94] sm:$0xf0] }
 0x1f2   :  { %v4907_v46 = vor.u32 %v4035_v49, %v3470_v14  ;;  %v3330_v49 = vld [vmem:[#allocation4 + $0x8] sm:$0xf]  ;;  %v4011_v48 = vld [vmem:[#allocation4 + $0x7c] sm:$0xf] }
 0x1f3   :  { %891 = vmatpush.bf16.msra.mxu3 %v875_v19  ;;  %6057 = vst [vmem:[#allocation92_spill] sm:$0xff] %v4894_v34  ;;  %1307 = vmatpush.bf16.msrb.mxu0 %v4894_v34  ;;  %v3358_v19 = vld [vmem:[#allocation4 + $0x40] sm:$0xf] }
 0x1f4   :  { %6060 = vst [vmem:[#allocation95_spill] sm:$0xff] %v4907_v46  ;;  %v4919_v14 = vor.u32 %v4007_v60, %v3358_v19  ;;  %v4043_v19 = vld [vmem:[#allocation4 + $0x178] sm:$0xf0]  ;;  %v4040_v60 = vld [vmem:[#allocation4 + $0x164] sm:$0xf] }
 0x1f5   :  { %6063 = vst [vmem:[#allocation98_spill] sm:$0xff] %v4916_v37 }
 0x1f6   :  { %3319 = vmatmul.msk.bf16.vlgmr.msra.gmra.mxu3 %vm145_vm0, %v3995_v40  ;;  %v4913_v40 = vor.u32 %v4021_v58, %v3414_v39  ;;  %6064 = vst [vmem:[#allocation99_spill] sm:$0xff] %v4919_v14  ;;  %v4922_v39 = vor.u32 %v4000_v61, %v3330_v49  ;;  %v3514_v49 = vld [vmem:[#allocation4 + $0x168] sm:$0xf]  ;;  %v4044_v61 = vld [vmem:[#allocation4 + $0x180] sm:$0xf0] }
 0x1f7   :  { %1279 = vmatpush.bf16.msrb.mxu3 %v4880_v13 }
 0x1f8   :  { %6062 = vst [vmem:[#allocation97_spill] sm:$0xff] %v4913_v40 }
 0x1f9   :  { %6065 = vst [vmem:[#allocation100_spill] sm:$0xff] %v4922_v39 }
 0x1fb   :  { %1280 = vmatpush.bf16.msrb.mxu3 %v4899_v42 }
 0x1ff   :  { %1281 = vmatpush.bf16.msrb.mxu3 %v4907_v46  ;;  %v4051_v46 = vld [vmem:[#allocation4 + $0x1b8] sm:$0xf0] }
 0x200   :  { %v4924_v58 = vor.u32 %v4051_v46, %v3542_v16  ;;  %v4935_v46 = vor.u32 %v4044_v61, %v3514_v49  ;;  %v4940_v16 = vld [vmem:[%s5742_s5 + $0x8] sm:$0xff] }
 0x201   :  { %1358 = vperm.xlu1 %4180, %v4940_v16   ;;  %v3480_v61 = vld [vmem:[#allocation4 + $0x144] sm:$0xf0]  ;;  %1368 = vperm.xlu0 %4182, %v4940_v16  }
 0x202   :  { %6066 = vst [vmem:[#allocation101_spill] sm:$0xff] %v4924_v58 }
 0x203   :  { %1282 = vmatpush.bf16.msrb.mxu3 %v4910_v36  ;;  %v3508_v36 = vld [vmem:[#allocation4 + $0x17c] sm:$0xf0]  ;;  %6070 = vst [vmem:[#allocation105_spill] sm:$0xff] %v4935_v46 }
 0x204   :  { %v4932_v13 = vor.u32 %v4040_v60, %v3508_v36  ;;  %v3478_v36 = vld [vmem:[#allocation4 + $0x128] sm:$0xf]  ;;  %v4033_v60 = vld [vmem:[#allocation4 + $0x12c] sm:$0xf] }
 0x206   :  { %6069 = vst [vmem:[#allocation104_spill] sm:$0xff] %v4932_v13  ;;  %1322 = vmatpush.bf16.msrb.mxu2 %v4932_v13  ;;  %v3458_v13 = vld [vmem:[#allocation4 + $0xf8] sm:$0xf] }
 0x207   :  { %1283 = vmatpush.bf16.msrb.mxu3 %v4913_v40  ;;  %v3506_v40 = vld [vmem:[#allocation4 + $0x160] sm:$0xf]  ;;  %v4966_v15 = vor.u32 %v4030_v50, %v3458_v13 }
 0x208   :  { %v4930_v42 = vor.u32 %v4043_v19, %v3506_v40  ;;  %v4036_v19 = vld [vmem:[#allocation4 + $0x140] sm:$0xf0] }
 0x209   :  { %v4948_v49 = vor.u32 %v4036_v19, %v3478_v36  ;;  %v4029_v19 = vld [vmem:[#allocation4 + $0x108] sm:$0xf0]  ;;  %6078 = vst [vmem:[#allocation113_spill] sm:$0xff] %v4966_v15  ;;  %4187 = vset.pattern.permute.xlu0 %v6015_v23 }
 0x20a   :  { %6068 = vst [vmem:[#allocation103_spill] sm:$0xff] %v4930_v42  ;;  %1308 = vmatpush.bf16.msrb.mxu0 %v4930_v42 }
 0x20b   :  { %1284 = vmatpush.bf16.msrb.mxu3 %v4916_v37  ;;  %v4928_v37 = vor.u32 %v4011_v48, %v3388_v31  ;;  %v4004_v48 = vld [vmem:[#allocation4 + $0x44] sm:$0xf]  ;;  %v3360_v31 = vld [vmem:[#allocation4 + $0x5c] sm:$0xf0]  ;;  %6072 = vst [vmem:[#allocation107_spill] sm:$0xff] %v4948_v49 }
 0x20c   :  { %v4944_v40 = vor.u32 %v4004_v48, %v3360_v31  ;;  %v3997_v48 = vld [vmem:[#allocation4 + $0xc] sm:$0xf]  ;;  %v3332_v31 = vld [vmem:[#allocation4 + $0x24] sm:$0xf0] }
 0x20d   :  { %6067 = vst [vmem:[#allocation102_spill] sm:$0xff] %v4928_v37  ;;  %1298 = vmatpush.bf16.msrb.mxu1 %v4928_v37  ;;  %v4959_v36 = vor.u32 %v3997_v48, %v3332_v31  ;;  %v6079_v48 = vmov 2   ;;  %v3422_v31 = vld [vmem:[#allocation4 + $0xb8] sm:$0xf]  ;;  %v3402_v37 = vld [vmem:[#allocation4 + $0x88] sm:$0xf] }
 0x20e   :  { %6071 = vst [vmem:[#allocation106_spill] sm:$0xff] %v4944_v40  ;;  %1309 = vmatpush.bf16.msrb.mxu0 %v4948_v49  ;;  %4183 = vset.pattern.permute.xlu1 %v6079_v48  ;;  %v3346_v49 = vld [vmem:[#allocation4 + $0x18] sm:$0xf] }
 0x20f   :  { %1285 = vmatpush.bf16.msrb.mxu3 %v4919_v14  ;;  %v4950_v14 = vor.u32 %v4033_v60, %v3480_v61  ;;  %6075 = vst [vmem:[#allocation110_spill] sm:$0xff] %v4959_v36  ;;  %v4026_v60 = vld [vmem:[#allocation4 + $0xf4] sm:$0xf]  ;;  %v3452_v61 = vld [vmem:[#allocation4 + $0x10c] sm:$0xf0] }
 0x211   :  { %6073 = vst [vmem:[#allocation108_spill] sm:$0xff] %v4950_v14  ;;  %1299 = vmatpush.bf16.msrb.mxu1 %v4944_v40  ;;  %1323 = vmatpush.bf16.msrb.mxu2 %v4950_v14  ;;  %v4023_v14 = vld [vmem:[#allocation4 + $0xd8] sm:$0xf0]  ;;  %v3396_v40 = vld [vmem:[#allocation4 + $0x9c] sm:$0xf0] }
 0x213   :  { %1286 = vmatpush.bf16.msrb.mxu3 %v4922_v39  ;;  %v4037_v39 = vld [vmem:[#allocation4 + $0x148] sm:$0xf0] }
 0x215   :  { %1300 = vmatpush.bf16.msrb.mxu1 %v4959_v36  ;;  %v4015_v36 = vld [vmem:[#allocation4 + $0x98] sm:$0xf0] }
 0x217   :  { %1335 = vmatpush.bf16.msra.mxu3 %v4924_v58  ;;  %v3486_v58 = vld [vmem:[#allocation4 + $0x130] sm:$0xf] }
 0x218   :  { %v4952_v26 = vor.u32 %v4037_v39, %v3486_v58  ;;  %v4963_v58 = vor.u32 %v4026_v60, %v3452_v61  ;;  %v3424_v60 = vld [vmem:[#allocation4 + $0xd4] sm:$0xf0]  ;;  %v3430_v61 = vld [vmem:[#allocation4 + $0xc0] sm:$0xf] }
 0x219   :  { %v4977_v50 = vor.u32 %v4023_v14, %v3430_v61  ;;  %v4008_v61 = vld [vmem:[#allocation4 + $0x60] sm:$0xf0] }
 0x21a   :  { %6074 = vst [vmem:[#allocation109_spill] sm:$0xff] %v4952_v26  ;;  %1324 = vmatpush.bf16.msrb.mxu2 %v4963_v58 }
 0x21b   :  { %1336 = vmatpush.bf16.msra.mxu3 %v4935_v46  ;;  %v3450_v46 = vld [vmem:[#allocation4 + $0xf0] sm:$0xf]  ;;  %6077 = vst [vmem:[#allocation112_spill] sm:$0xff] %v4963_v58  ;;  %v3394_v58 = vld [vmem:[#allocation4 + $0x80] sm:$0xf] }
 0x21c   :  { %v4961_v39 = vor.u32 %v4029_v19, %v3450_v46  ;;  %v4019_v46 = vld [vmem:[#allocation4 + $0xbc] sm:$0xf]  ;;  %6082 = vst [vmem:[#allocation116_spill] sm:$0xff] %v4977_v50 }
 0x21d   :  { %v4975_v13 = vor.u32 %v4019_v46, %v3424_v60  ;;  %v4016_v46 = vld [vmem:[#allocation4 + $0xa0] sm:$0xf0]  ;;  %v3366_v60 = vld [vmem:[#allocation4 + $0x48] sm:$0xf] }
 0x21e   :  { %6076 = vst [vmem:[#allocation111_spill] sm:$0xff] %v4961_v39  ;;  %1310 = vmatpush.bf16.msrb.mxu0 %v4961_v39  ;;  %v4992_v63 = vor.u32 %v4016_v46, %v3402_v37  ;;  %v4005_v39 = vld [vmem:[#allocation4 + $0x4c] sm:$0xf] }
 0x21f   :  { %1337 = vmatpush.bf16.msra.mxu3 %v4952_v26  ;;  %v4022_v26 = vld [vmem:[#allocation4 + $0xd0] sm:$0xf0]  ;;  %6081 = vst [vmem:[#allocation115_spill] sm:$0xff] %v4975_v13  ;;  %1325 = vmatpush.bf16.msrb.mxu2 %v4975_v13  ;;  %v4001_v46 = vld [vmem:[#allocation4 + $0x28] sm:$0xf0] }
 0x220   :  { %v4972_v19 = vor.u32 %v4022_v26, %v3422_v31  ;;  %v4986_v26 = vor.u32 %v4015_v36, %v3394_v58  ;;  %v4012_v31 = vld [vmem:[#allocation4 + $0x84] sm:$0xf]  ;;  %6085 = vst [vmem:[#allocation119_spill] sm:$0xff] %v4992_v63  ;;  %v4009_v36 = vld [vmem:[#allocation4 + $0x68] sm:$0xf0]  ;;  %v4997_v58 = vor.u32 %v4008_v61, %v3366_v60 }
 0x221   :  { %v4990_v14 = vor.u32 %v4012_v31, %v3396_v40  ;;  %v5003_v37 = vor.u32 %v4009_v36, %v3374_v8  ;;  %v3338_v31 = vld [vmem:[#allocation4 + $0x10] sm:$0xf]  ;;  %v5013_v8 = vor.u32 %v4002_v57, %v3346_v49 }
 0x222   :  { %6080 = vst [vmem:[#allocation114_spill] sm:$0xff] %v4972_v19  ;;  %1311 = vmatpush.bf16.msrb.mxu0 %v4972_v19  ;;  %v3368_v19 = vld [vmem:[#allocation4 + $0x64] sm:$0xf0]  ;;  %v3340_v13 = vld [vmem:[#allocation4 + $0x2c] sm:$0xf0]  ;;  %v5007_v60 = vor.u32 %v4001_v46, %v3338_v31 }
 0x223   :  { %1338 = vmatpush.bf16.msra.mxu3 %v4966_v15  ;;  %v4982_v15 = vld [vmem:[%s5742_s5] sm:$0xff]  ;;  %6083 = vst [vmem:[#allocation117_spill] sm:$0xff] %v4986_v26  ;;  %1326 = vmatpush.bf16.msrb.mxu2 %v4990_v14  ;;  %v5001_v40 = vor.u32 %v4005_v39, %v3368_v19  ;;  %v6092_v19 = vmov 5  }
 0x224   :  { %1376 = vperm.xlu1 %4183, %v4982_v15   ;;  %6084 = vst [vmem:[#allocation118_spill] sm:$0xff] %v4990_v14  ;;  %1353 = vperm.xlu2 %4179, %v4982_v15  }
 0x225   :  { %1400 = vperm.xlu0 %4187, %v4982_v15   ;;  %6086 = vst [vmem:[#allocation120_spill] sm:$0xff] %v4997_v58 }
 0x226   :  { %1312 = vmatpush.bf16.msrb.mxu0 %v4986_v26  ;;  %6087 = vst [vmem:[#allocation121_spill] sm:$0xff] %v5001_v40 }
 0x227   :  { %1339 = vmatpush.bf16.msra.mxu3 %v4977_v50  ;;  %6088 = vst [vmem:[#allocation122_spill] sm:$0xff] %v5003_v37  ;;  %v3998_v50 = vld [vmem:[#allocation4 + $0x14] sm:$0xf]  ;;  %1327 = vmatpush.bf16.msrb.mxu2 %v5001_v40 }
 0x228   :  { %6089 = vst [vmem:[#allocation123_spill] sm:$0xff] %v5007_v60  ;;  %v5011_v39 = vor.u32 %v3998_v50, %v3340_v13 }
 0x229   :  { %6091 = vst [vmem:[#allocation125_spill] sm:$0xff] %v5013_v8 }
 0x22a   :  { %1313 = vmatpush.bf16.msrb.mxu0 %v4997_v58  ;;  %6090 = vst [vmem:[#allocation124_spill] sm:$0xff] %v5011_v39 }
 0x22b   :  { %1340 = vmatpush.bf16.msra.mxu3 %v4992_v63  ;;  %1328 = vmatpush.bf16.msrb.mxu2 %v5011_v39 }
 0x22c   :  { %4185 = vset.pattern.permute.xlu1 %v6008_v9  ;;  %4181 = vset.pattern.permute.xlu2 %v6022_v21 }
 0x22d   :  { %1388 = vperm.xlu1 %4185, %v4982_v15   ;;  %1364 = vperm.xlu2 %4181, %v4982_v15  }
 0x22e   :  { %4192 = vset.pattern.permute.xlu0 %v6021_v52  ;;  %1314 = vmatpush.bf16.msrb.mxu0 %v5007_v60 }
 0x22f   :  { %1341 = vmatpush.bf16.msra.mxu3 %v5003_v37  ;;  %1428 = vperm.xlu0 %4192, %v4940_v16  }
 0x233   :  { %1342 = vmatpush.bf16.msra.mxu3 %v5013_v8 }
 0x235   :  { %4188 = vset.pattern.permute.xlu1 %v6015_v23  ;;  %4184 = vset.pattern.permute.xlu2 %v6079_v48 }
 0x236   :  { %1404 = vperm.xlu1 %4188, %v4940_v16   ;;  %1380 = vperm.xlu2 %4184, %v4940_v16  }
 0x237   :  { %4197 = vset.pattern.permute.xlu0 %v6015_v23 }
 0x23e   :  { %4190 = vset.pattern.permute.xlu1 %v6092_v19  ;;  %4186 = vset.pattern.permute.xlu2 %v6008_v9 }
 0x23f   :  { %1416 = vperm.xlu1 %4190, %v4940_v16   ;;  %1392 = vperm.xlu2 %4186, %v4940_v16  }
 0x247   :  { %4193 = vset.pattern.permute.xlu1 %v6018_v59  ;;  %4189 = vset.pattern.permute.xlu2 %v6092_v19 }
 0x248   :  { %1412 = vperm.xlu2 %4189, %v4982_v15  }
 0x250   :  { %4191 = vset.pattern.permute.xlu2 %v6021_v52 }
 0x251   :  { %1424 = vperm.xlu2 %4191, %v4982_v15  }
 0x259   :  { %4194 = vset.pattern.permute.xlu2 %v6022_v21 }
 0x273   :  { %v5042_v50 = vpop.permute.xlu1 %1358  ;;  %v5052_v15 = vpop.permute.xlu0 %1368 }
 0x274   :  { %6095 = vst [vmem:[#allocation128_spill] sm:$0xff] %v5042_v50 }
 0x275   :  { %6100 = vst [vmem:[#allocation133_spill] sm:$0xff] %v5052_v15 }
 0x279   :  { %v893_v57 = vpop.f32.mrf.mxu3 }
 0x27e   :  { %v5038_v23 = vpop.permute.xlu2 %1353 }
 0x27f   :  { %6093 = vst [vmem:[#allocation126_spill] sm:$0xff] %v5038_v23 }
 0x281   :  { %v895_v49 = vpop.f32.mrf.mxu3 }
 0x282   :  { %v962_v13 = vpack.c.bf16 %v895_v49, %v893_v57 }
 0x284   :  { %1259 = vmatmul.bf16.vlgmr.msra.gmra.mxu0 %v962_v13  ;;  %1273 = vmatmul.bf16.vlgmr.msra.gmra.mxu2 %v962_v13 }
 0x285   :  { %1287 = vmatmul.bf16.vlgmr.msrb.gmra.mxu3 %v962_v13  ;;  %1301 = vmatmul.bf16.vlgmr.msrb.gmra.mxu1 %v962_v13 }
 0x287   :  { %v5040_v16 = vpop.permute.xlu2 %1364 }
 0x288   :  { %6094 = vst [vmem:[#allocation127_spill] sm:$0xff] %v5040_v16 }
 0x290   :  { %v5044_v59 = vpop.permute.xlu2 %1380 }
 0x291   :  { %6096 = vst [vmem:[#allocation129_spill] sm:$0xff] %v5044_v59 }
 0x294   :  { %1315 = vmatmul.bf16.vlgmr.msrb.gmra.mxu0 %v962_v13  ;;  %1329 = vmatmul.bf16.vlgmr.msrb.gmra.mxu2 %v962_v13 }
 0x295   :  { %1343 = vmatmul.bf16.vlgmr.msra.gmra.mxu3 %v962_v13 }
 0x296   :  { %v5046_v61 = vpop.permute.xlu1 %1376 }
 0x297   :  { %6097 = vst [vmem:[#allocation130_spill] sm:$0xff] %v5046_v61  ;;  %v5063_v12 = vpop.permute.xlu0 %1400 }
 0x298   :  { %6103 = vst [vmem:[#allocation136_spill] sm:$0xff] %v5063_v12 }
 0x299   :  { %v5048_v49 = vpop.permute.xlu2 %1392 }
 0x29a   :  { %6098 = vst [vmem:[#allocation131_spill] sm:$0xff] %v5048_v49 }
 0x29f   :  { %v5050_v52 = vpop.permute.xlu1 %1388 }
 0x2a0   :  { %6099 = vst [vmem:[#allocation132_spill] sm:$0xff] %v5050_v52 }
 0x2a2   :  { %v5060_v58 = vpop.permute.xlu2 %1412 }
 0x2a3   :  { %6102 = vst [vmem:[#allocation135_spill] sm:$0xff] %v5060_v58 }
 0x2a8   :  { %v5057_v40 = vpop.permute.xlu1 %1404 }
 0x2a9   :  { %6101 = vst [vmem:[#allocation134_spill] sm:$0xff] %v5057_v40 }
 0x301   :  { %v1260_v36 = vpop.f32.mrf.mxu0 }
 0x302   :  { %v1302_v21 = vpop.f32.mrf.mxu1  ;;  %v1361_v63 = vmul.f32 %v5038_v23, %v1260_v36 }
 0x307   :  { %v1274_v31 = vpop.f32.mrf.mxu2 }
 0x308   :  { %v1288_v46 = vpop.f32.mrf.mxu3  ;;  %v1371_v13 = vmul.f32 %v5040_v16, %v1274_v31 }
 0x309   :  { %v1262_v57 = vpop.f32.mrf.mxu0  ;;  %v1383_v26 = vmul.f32 %v5046_v61, %v1288_v46 }
 0x30a   :  { %v1373_v14 = vadd.f32 %v1371_v13, %v1361_v63  ;;  %v1362_v60 = vmul.f32 %v5042_v50, %v1262_v57  ;;  %v1304_v36 = vpop.f32.mrf.mxu1  ;;  %v3580_v50 = vld [vmem:[#allocation6 + $0x30] sm:$0xf] }
 0x30b   :  { %v1396_v57 = vmul.f32 %v5048_v49, %v1304_v36  ;;  %v4060_v49 = vld [vmem:[#allocation6 + $0x38] sm:$0xf0] }
 0x30c   :  { %v1385_v31 = vadd.f32 %v1383_v26, %v1373_v14  ;;  %v5073_v14 = vpop.permute.xlu2 %1424 }
 0x30d   :  { %6105 = vst [vmem:[#allocation138_spill] sm:$0xff] %v5073_v14 }
 0x30f   :  { %v1276_v19 = vpop.f32.mrf.mxu2 }
 0x310   :  { %v1290_v8 = vpop.f32.mrf.mxu3  ;;  %v1372_v39 = vmul.f32 %v5052_v15, %v1276_v19  ;;  %v1395_v19 = vmul.f32 %v5050_v52, %v1302_v21  ;;  %v3702_v52 = vld [vmem:[#allocation6 + $0x134] sm:$0xf0] }
 0x311   :  { %v1316_v37 = vpop.f32.mrf.mxu0  ;;  %v1384_v16 = vmul.f32 %v5044_v59, %v1290_v8  ;;  %v5075_v59 = vpop.permute.xlu0 %1428 }
 0x312   :  { %v1374_v42 = vadd.f32 %v1372_v39, %v1362_v60  ;;  %v1407_v63 = vmul.f32 %v5063_v12, %v1316_v37  ;;  %v1397_v13 = vadd.f32 %v1395_v19, %v1385_v31  ;;  %v5071_v39 = vpop.permute.xlu1 %1416  ;;  %6106 = vst [vmem:[#allocation139_spill] sm:$0xff] %v5075_v59  ;;  %v4089_v12 = vld [vmem:[#allocation6 + $0x124] sm:$0xf] }
 0x313   :  { %6104 = vst [vmem:[#allocation137_spill] sm:$0xff] %v5071_v39 }
 0x314   :  { %v1386_v15 = vadd.f32 %v1384_v16, %v1374_v42  ;;  %v1409_v26 = vadd.f32 %v1407_v63, %v1397_v13  ;;  %v3692_v63 = vld [vmem:[#allocation6 + $0x118] sm:$0xf]  ;;  %v3672_v13 = vld [vmem:[#allocation6 + $0xf0] sm:$0xf] }
 0x316   :  { %v1398_v8 = vadd.f32 %v1396_v57, %v1386_v15  ;;  %v4052_v15 = vld [vmem:[%s5744_s7] sm:$0xff]  ;;  %v4090_v57 = vld [vmem:[#allocation6 + $0x128] sm:$0xf0] }
 0x317   :  { %v1330_v34 = vpop.f32.mrf.mxu2 }
 0x318   :  { %v1344_v6 = vpop.f32.mrf.mxu3  ;;  %v1419_v46 = vmul.f32 %v5060_v58, %v1330_v34 }
 0x319   :  { %v1318_v23 = vpop.f32.mrf.mxu0  ;;  %v1431_v31 = vmul.f32 %v5073_v14, %v1344_v6  ;;  %v4088_v6 = vld [vmem:[#allocation6 + $0x11c] sm:$0xf]  ;;  %v4065_v14 = vld [vmem:[#allocation6 + $0x60] sm:$0xf0] }
 0x31a   :  { %v1408_v60 = vmul.f32 %v5057_v40, %v1318_v23  ;;  %v1421_v21 = vadd.f32 %v1419_v46, %v1409_v26  ;;  %v4085_v46 = vld [vmem:[#allocation6 + $0x100] sm:$0xf0]  ;;  %v3694_v26 = vld [vmem:[#allocation6 + $0x12c] sm:$0xf0] }
 0x31c   :  { %v1410_v42 = vadd.f32 %v1408_v60, %v1398_v8  ;;  %v1433_v23 = vadd.f32 %v1431_v31, %v1421_v21  ;;  %v5087_v60 = vor.u32 %v4085_v46, %v3672_v13  ;;  %v3700_v8 = vld [vmem:[#allocation6 + $0x120] sm:$0xf]  ;;  %v4091_v21 = vld [vmem:[#allocation6 + $0x130] sm:$0xf0]  ;;  %v4078_v46 = vld [vmem:[#allocation6 + $0xcc] sm:$0xf] }
 0x31d   :  { %v4083_v31 = vld [vmem:[#allocation6 + $0xf4] sm:$0xf] }
 0x31e   :  { %6108 = vst [vmem:[#allocation141_spill] sm:$0xff] %v5087_v60 }
 0x31f   :  { %v1332_v61 = vpop.f32.mrf.mxu2 }
 0x320   :  { %v1420_v37 = vmul.f32 %v5071_v39, %v1332_v61  ;;  %v1346_v16 = vpop.f32.mrf.mxu3  ;;  %v5084_v61 = vor.u32 %v4090_v57, %v3692_v63  ;;  %v3632_v63 = vld [vmem:[#allocation6 + $0xa0] sm:$0xf]  ;;  %v4075_v57 = vld [vmem:[#allocation6 + $0xb0] sm:$0xf0] }
 0x321   :  { %v1432_v34 = vmul.f32 %v5075_v59, %v1346_v16  ;;  %v5089_v16 = vor.u32 %v4088_v6, %v3694_v26  ;;  %v3654_v6 = vld [vmem:[#allocation6 + $0xdc] sm:$0xf0]  ;;  %v3660_v26 = vld [vmem:[#allocation6 + $0xd0] sm:$0xf] }
 0x322   :  { %v1422_v36 = vadd.f32 %v1420_v37, %v1410_v42  ;;  %6107 = vst [vmem:[#allocation140_spill] sm:$0xff] %v5084_v61  ;;  %v3652_v42 = vld [vmem:[#allocation6 + $0xc8] sm:$0xf]  ;;  %v4080_v37 = vld [vmem:[#allocation6 + $0xd8] sm:$0xf0] }
 0x323   :  { %1748 = vmatpush.bf16.msra.mxu2 %v5089_v16 }
 0x324   :  { %v1434_v19 = vadd.f32 %v1432_v34, %v1422_v36  ;;  %v3674_v36 = vld [vmem:[#allocation6 + $0x104] sm:$0xf0] }
 0x325   :  { %v5095_v34 = vor.u32 %v4083_v31, %v3674_v36  ;;  %v4073_v36 = vld [vmem:[#allocation6 + $0xa4] sm:$0xf] }
 0x326   :  { %v1437_v40 = vpack.c.bf16 %v1434_v19, %v1433_v23  ;;  %v3680_v23 = vld [vmem:[#allocation6 + $0xf8] sm:$0xf]  ;;  %v4086_v19 = vld [vmem:[#allocation6 + $0x108] sm:$0xf0] }
 0x327   :  { %v5100_v13 = vor.u32 %v4086_v19, %v3680_v23  ;;  %1749 = vmatpush.bf16.msra.mxu2 %v5095_v34  ;;  %v3640_v23 = vld [vmem:[#allocation6 + $0xa8] sm:$0xf]  ;;  %v4076_v19 = vld [vmem:[#allocation6 + $0xb8] sm:$0xf0] }
 0x328   :  { %1453 = vmatpush.bf16.msra.mxu1 %v1437_v40  ;;  %v5091_v40 = vor.u32 %v4091_v21, %v3700_v8  ;;  %v4081_v8 = vld [vmem:[#allocation6 + $0xe0] sm:$0xf0]  ;;  %v5104_v21 = vor.u32 %v4078_v46, %v3654_v6  ;;  %v5115_v46 = vor.u32 %v4076_v19, %v3640_v23  ;;  %v4068_v6 = vld [vmem:[#allocation6 + $0x7c] sm:$0xf]  ;;  %v4066_v19 = vld [vmem:[#allocation6 + $0x68] sm:$0xf0] }
 0x329   :  { %v5106_v31 = vor.u32 %v4081_v8, %v3660_v26  ;;  %v4071_v8 = vld [vmem:[#allocation6 + $0x90] sm:$0xf0] }
 0x32a   :  { %1761 = vmatpush.bf16.msrb.mxu3 %v5091_v40  ;;  %6110 = vst [vmem:[#allocation143_spill] sm:$0xff] %v5104_v21 }
 0x32b   :  { %3548 = vmatmul.msk.bf16.vlgmr.msra.gmra.mxu1 %vm145_vm0, %v4052_v15  ;;  %v5098_v15 = vor.u32 %v4080_v37, %v3652_v42  ;;  %6111 = vst [vmem:[#allocation144_spill] sm:$0xff] %v5106_v31  ;;  %v5109_v42 = vor.u32 %v4075_v57, %v3632_v63  ;;  %v3634_v37 = vld [vmem:[#allocation6 + $0xb4] sm:$0xf0]  ;;  %1750 = vmatpush.bf16.msra.mxu2 %v5104_v21  ;;  %v3614_v63 = vld [vmem:[#allocation6 + $0x8c] sm:$0xf0] }
 0x32c   :  { %1735 = vmatpush.bf16.msrb.mxu1 %v5084_v61  ;;  %v4070_v61 = vld [vmem:[#allocation6 + $0x88] sm:$0xf0]  ;;  %v5113_v59 = vor.u32 %v4073_v36, %v3634_v37  ;;  %6114 = vst [vmem:[#allocation147_spill] sm:$0xff] %v5115_v46  ;;  %v3620_v57 = vld [vmem:[#allocation6 + $0x80] sm:$0xf]  ;;  %v5122_v58 = vor.u32 %v4068_v6, %v3614_v63 }
 0x32d   :  { %6109 = vst [vmem:[#allocation142_spill] sm:$0xff] %v5098_v15  ;;  %v5124_v36 = vor.u32 %v4071_v8, %v3620_v57  ;;  %v4063_v37 = vld [vmem:[#allocation6 + $0x54] sm:$0xf]  ;;  %v3574_v8 = vld [vmem:[#allocation6 + $0x3c] sm:$0xf0] }
 0x32e   :  { %1762 = vmatpush.bf16.msrb.mxu3 %v5100_v13  ;;  %6112 = vst [vmem:[#allocation145_spill] sm:$0xff] %v5109_v42 }
 0x32f   :  { %6113 = vst [vmem:[#allocation146_spill] sm:$0xff] %v5113_v59  ;;  %1751 = vmatpush.bf16.msra.mxu2 %v5113_v59  ;;  %v3708_v59 = vld [vmem:[#allocation6 + $0x128] sm:$0xf] }
 0x330   :  { %1736 = vmatpush.bf16.msrb.mxu1 %v5087_v60  ;;  %v3612_v60 = vld [vmem:[#allocation6 + $0x78] sm:$0xf]  ;;  %6116 = vst [vmem:[#allocation149_spill] sm:$0xff] %v5122_v58 }
 0x331   :  { %v5118_v26 = vor.u32 %v4070_v61, %v3612_v60  ;;  %v3594_v61 = vld [vmem:[#allocation6 + $0x64] sm:$0xf0]  ;;  %v3600_v60 = vld [vmem:[#allocation6 + $0x58] sm:$0xf] }
 0x332   :  { %1763 = vmatpush.bf16.msrb.mxu3 %v5106_v31  ;;  %v5131_v6 = vor.u32 %v4063_v37, %v3594_v61  ;;  %v5133_v63 = vor.u32 %v4066_v19, %v3600_v60  ;;  %v4092_v31 = vld [vmem:[#allocation6 + $0x138] sm:$0xf0] }
 0x333   :  { %6115 = vst [vmem:[#allocation148_spill] sm:$0xff] %v5118_v26  ;;  %1752 = vmatpush.bf16.msra.mxu2 %v5122_v58  ;;  %v5138_v58 = vor.u32 %v4089_v12, %v3702_v52  ;;  %v1460_v12 = vld [vmem:[%s5747_s10] sm:$0xf] }
 0x334   :  { %1737 = vmatpush.bf16.msrb.mxu1 %v5098_v15  ;;  %v3592_v15 = vld [vmem:[#allocation6 + $0x50] sm:$0xf]  ;;  %6118 = vst [vmem:[#allocation151_spill] sm:$0xff] %v5131_v6  ;;  %v3688_v52 = vld [vmem:[#allocation6 + $0x100] sm:$0xf] }
 0x335   :  { %v5127_v23 = vor.u32 %v4065_v14, %v3592_v15  ;;  %6119 = vst [vmem:[#allocation152_spill] sm:$0xff] %v5133_v63  ;;  %v3552_v14 = vld [vmem:[#allocation6] sm:$0xf]  ;;  %v4058_v15 = vld [vmem:[#allocation6 + $0x2c] sm:$0xf] }
 0x336   :  { %1764 = vmatpush.bf16.msrb.mxu3 %v5115_v46  ;;  %v4061_v46 = vld [vmem:[#allocation6 + $0x40] sm:$0xf0]  ;;  %6121 = vst [vmem:[#allocation154_spill] sm:$0xff] %v5138_v58  ;;  %v5142_v37 = vor.u32 %v4058_v15, %v3574_v8  ;;  %v3642_v15 = vld [vmem:[#allocation6 + $0xbc] sm:$0xf0] }
 0x337   :  { %6117 = vst [vmem:[#allocation150_spill] sm:$0xff] %v5127_v23  ;;  %1753 = vmatpush.bf16.msra.mxu2 %v5131_v6  ;;  %v5147_v19 = vor.u32 %v4061_v46, %v3580_v50  ;;  %v3741_v6 = vld [vmem:[#allocation7 + $0x30] sm:$0xf] }
 0x338   :  { %1738 = vmatpush.bf16.msrb.mxu1 %v5109_v42  ;;  %v3572_v42 = vld [vmem:[#allocation6 + $0x28] sm:$0xf]  ;;  %6122 = vst [vmem:[#allocation155_spill] sm:$0xff] %v5142_v37 }
 0x339   :  { %v5136_v57 = vor.u32 %v4060_v49, %v3572_v42  ;;  %v4084_v49 = vld [vmem:[#allocation6 + $0xfc] sm:$0xf]  ;;  %v3682_v42 = vld [vmem:[#allocation6 + $0x10c] sm:$0xf0]  ;;  %6124 = vst [vmem:[#allocation157_spill] sm:$0xff] %v5147_v19 }
 0x33a   :  { %1765 = vmatpush.bf16.msrb.mxu3 %v5124_v36 }
 0x33b   :  { %6120 = vst [vmem:[#allocation153_spill] sm:$0xff] %v5136_v57  ;;  %1754 = vmatpush.bf16.msra.mxu2 %v5142_v37  ;;  %v3753_v37 = vld [vmem:[#allocation7 + $0x48] sm:$0xf] }
 0x33c   :  { %1739 = vmatpush.bf16.msrb.mxu1 %v5118_v26  ;;  %v4055_v26 = vld [vmem:[#allocation6 + $0x10] sm:$0xf0] }
 0x33d   :  { %v5145_v60 = vor.u32 %v4055_v26, %v3552_v14  ;;  %v3662_v26 = vld [vmem:[#allocation6 + $0xe4] sm:$0xf0]  ;;  %v4074_v14 = vld [vmem:[#allocation6 + $0xac] sm:$0xf] }
 0x33e   :  { %1766 = vmatpush.bf16.msrb.mxu3 %v5133_v63  ;;  %v4087_v63 = vld [vmem:[#allocation6 + $0x110] sm:$0xf0] }
 0x33f   :  { %6123 = vst [vmem:[#allocation156_spill] sm:$0xff] %v5145_v60  ;;  %v5162_v50 = vor.u32 %v4087_v63, %v3688_v52  ;;  %v3602_v52 = vld [vmem:[#allocation6 + $0x6c] sm:$0xf0] }
 0x340   :  { %1740 = vmatpush.bf16.msrb.mxu1 %v5127_v23  ;;  %v5149_v23 = vor.u32 %v4092_v31, %v3708_v59  ;;  %v3668_v59 = vld [vmem:[#allocation6 + $0xd8] sm:$0xf]  ;;  %v4082_v31 = vld [vmem:[#allocation6 + $0xe8] sm:$0xf0] }
 0x341   :  { %6127 = vst [vmem:[#allocation160_spill] sm:$0xff] %v5162_v50  ;;  %v5168_v8 = vor.u32 %v4082_v31, %v3668_v59  ;;  %v3582_v59 = vld [vmem:[#allocation6 + $0x44] sm:$0xf0] }
 0x342   :  { %6125 = vst [vmem:[#allocation158_spill] sm:$0xff] %v5149_v23  ;;  %1767 = vmatpush.bf16.msrb.mxu3 %v5147_v19 }
 0x343   :  { %6129 = vst [vmem:[#allocation162_spill] sm:$0xff] %v5168_v8 }
 0x344   :  { %1741 = vmatpush.bf16.msrb.mxu1 %v5136_v57  ;;  %v4107_v57 = vld [vmem:[#allocation7 + $0x68] sm:$0xf0] }
 0x348   :  { %1742 = vmatpush.bf16.msrb.mxu1 %v5145_v60  ;;  %v3765_v60 = vld [vmem:[#allocation7 + $0x60] sm:$0xf] }
 0x34c   :  { %1787 = vmatpush.bf16.msra.mxu1 %v5149_v23 }
 0x350   :  { %1788 = vmatpush.bf16.msra.mxu1 %v5162_v50  ;;  %v4140_v50 = vld [vmem:[#allocation9 + $0xb0] sm:$0xf0] }
 0x354   :  { %1789 = vmatpush.bf16.msra.mxu1 %v5168_v8 }
 0x3a8   :  { %v1455_v39 = vpop.f32.mrf.mxu1 }
 0x3b0   :  { %v1457_v21 = vpop.f32.mrf.mxu1 }
 0x3b1   :  { %v1461_v61 = vpack.c.bf16 %v1457_v21, %v1455_v39  ;;  %v5155_v39 = vor.u32 %v4084_v49, %v3682_v42  ;;  %v4079_v21 = vld [vmem:[#allocation6 + $0xd4] sm:$0xf]  ;;  %v4069_v49 = vld [vmem:[#allocation6 + $0x84] sm:$0xf]  ;;  %v3622_v42 = vld [vmem:[#allocation6 + $0x94] sm:$0xf0] }
 0x3b2   :  { %v5165_v46 = vor.u32 %v4079_v21, %v3662_v26  ;;  %v5175_v63 = vor.u32 %v4069_v49, %v3622_v42  ;;  %v4059_v26 = vld [vmem:[#allocation6 + $0x34] sm:$0xf]  ;;  %v4056_v49 = vld [vmem:[#allocation6 + $0x18] sm:$0xf0]  ;;  %v4054_v42 = vld [vmem:[#allocation6 + $0xc] sm:$0xf] }
 0x3b3   :  { %1472 = vmatpush.bf16.msra.mxu0 %v1461_v61  ;;  %6126 = vst [vmem:[#allocation159_spill] sm:$0xff] %v5155_v39  ;;  %v5171_v61 = vor.u32 %v4074_v14, %v3642_v15  ;;  %v5181_v31 = vor.u32 %v4059_v26, %v3582_v59  ;;  %v4053_v14 = vld [vmem:[#allocation6 + $0x4] sm:$0xf]  ;;  %v3554_v15 = vld [vmem:[#allocation6 + $0x14] sm:$0xf0] }
 0x3b4   :  { %6128 = vst [vmem:[#allocation161_spill] sm:$0xff] %v5165_v46  ;;  %v3628_v59 = vld [vmem:[#allocation6 + $0x88] sm:$0xf] }
 0x3b5   :  { %6130 = vst [vmem:[#allocation163_spill] sm:$0xff] %v5171_v61 }
 0x3b6   :  { %3549 = vmatmul.msk.bf16.vlgmr.msra.gmra.mxu0 %vm145_vm0, %v1460_v12  ;;  %6131 = vst [vmem:[#allocation164_spill] sm:$0xff] %v5175_v63  ;;  %v4064_v12 = vld [vmem:[#allocation6 + $0x5c] sm:$0xf] }
 0x3b7   :  { %1774 = vmatpush.bf16.msrb.mxu0 %v5138_v58  ;;  %v5178_v21 = vor.u32 %v4064_v12, %v3602_v52  ;;  %6133 = vst [vmem:[#allocation166_spill] sm:$0xff] %v5181_v31  ;;  %v3648_v52 = vld [vmem:[#allocation6 + $0xb0] sm:$0xf] }
 0x3b9   :  { %6132 = vst [vmem:[#allocation165_spill] sm:$0xff] %v5178_v21 }
 0x3bb   :  { %1775 = vmatpush.bf16.msrb.mxu0 %v5155_v39  ;;  %v3562_v39 = vld [vmem:[#allocation6 + $0x1c] sm:$0xf0] }
 0x3bc   :  { %v5188_v12 = vor.u32 %v4054_v42, %v3562_v39  ;;  %v3588_v42 = vld [vmem:[#allocation6 + $0x38] sm:$0xf] }
 0x3be   :  { %6136 = vst [vmem:[#allocation169_spill] sm:$0xff] %v5188_v12 }
 0x3bf   :  { %1776 = vmatpush.bf16.msrb.mxu0 %v5165_v46  ;;  %v3560_v46 = vld [vmem:[#allocation6 + $0x8] sm:$0xf] }
 0x3c0   :  { %v5186_v58 = vor.u32 %v4056_v49, %v3560_v46  ;;  %v3608_v46 = vld [vmem:[#allocation6 + $0x60] sm:$0xf]  ;;  %v4067_v49 = vld [vmem:[#allocation6 + $0x70] sm:$0xf0] }
 0x3c1   :  { %v5199_v39 = vor.u32 %v4067_v49, %v3608_v46 }
 0x3c2   :  { %6135 = vst [vmem:[#allocation168_spill] sm:$0xff] %v5186_v58  ;;  %1768 = vmatpush.bf16.msrb.mxu3 %v5186_v58  ;;  %v4106_v58 = vld [vmem:[#allocation7 + $0x64] sm:$0xf] }
 0x3c3   :  { %1777 = vmatpush.bf16.msrb.mxu0 %v5171_v61  ;;  %v5184_v61 = vor.u32 %v4053_v14, %v3554_v15  ;;  %v4072_v14 = vld [vmem:[#allocation6 + $0x98] sm:$0xf0]  ;;  %6139 = vst [vmem:[#allocation172_spill] sm:$0xff] %v5199_v39 }
 0x3c4   :  { %v5196_v15 = vor.u32 %v4072_v14, %v3628_v59  ;;  %v3568_v59 = vld [vmem:[#allocation6 + $0x10] sm:$0xf]  ;;  %v4057_v14 = vld [vmem:[#allocation6 + $0x20] sm:$0xf0] }
 0x3c5   :  { %6134 = vst [vmem:[#allocation167_spill] sm:$0xff] %v5184_v61  ;;  %1755 = vmatpush.bf16.msra.mxu2 %v5184_v61 }
 0x3c6   :  { %6138 = vst [vmem:[#allocation171_spill] sm:$0xff] %v5196_v15 }
 0x3c7   :  { %1778 = vmatpush.bf16.msrb.mxu0 %v5175_v63  ;;  %v4077_v63 = vld [vmem:[#allocation6 + $0xc0] sm:$0xf0] }
 0x3c8   :  { %v5191_v26 = vor.u32 %v4077_v63, %v3648_v52  ;;  %v1800_v63 = vld [vmem:[%s5746_s9] sm:$0xff]  ;;  %v4062_v52 = vld [vmem:[#allocation6 + $0x48] sm:$0xf0] }
 0x3c9   :  { %1803 = vperm.xlu1 %4193, %v1800_v63   ;;  %1808 = vperm.xlu2 %4194, %v1800_v63  }
 0x3ca   :  { %6137 = vst [vmem:[#allocation170_spill] sm:$0xff] %v5191_v26  ;;  %1790 = vmatpush.bf16.msra.mxu1 %v5191_v26  ;;  %1826 = vperm.xlu0 %4197, %v1800_v63   ;;  %v3791_v26 = vld [vmem:[#allocation7 + $0x9c] sm:$0xf0] }
 0x3cb   :  { %1779 = vmatpush.bf16.msrb.mxu0 %v5178_v21  ;;  %v4116_v21 = vld [vmem:[#allocation7 + $0xb0] sm:$0xf0] }
 0x3ce   :  { %1791 = vmatpush.bf16.msra.mxu1 %v5196_v15 }
 0x3cf   :  { %1780 = vmatpush.bf16.msrb.mxu0 %v5181_v31  ;;  %v5208_v31 = vor.u32 %v4057_v14, %v3568_v59  ;;  %v3789_v59 = vld [vmem:[#allocation7 + $0x90] sm:$0xf] }
 0x3d1   :  { %6141 = vst [vmem:[#allocation174_spill] sm:$0xff] %v5208_v31  ;;  %4195 = vset.pattern.permute.xlu1 %v6079_v48  ;;  %4196 = vset.pattern.permute.xlu2 %v6008_v9  ;;  %v4113_v48 = vld [vmem:[#allocation7 + $0x98] sm:$0xf0] }
 0x3d2   :  { %1792 = vmatpush.bf16.msra.mxu1 %v5199_v39  ;;  %1814 = vperm.xlu1 %4195, %v1800_v63   ;;  %v4110_v39 = vld [vmem:[#allocation7 + $0x80] sm:$0xf0] }
 0x3d3   :  { %1781 = vmatpush.bf16.msrb.mxu0 %v5188_v12  ;;  %v5205_v12 = vor.u32 %v4062_v52, %v3588_v42  ;;  %1820 = vperm.xlu2 %4196, %v1800_v63   ;;  %v3801_v52 = vld [vmem:[#allocation7 + $0xa8] sm:$0xf]  ;;  %v5218_v63 = vor.u32 %v4113_v48, %v3789_v59 }
 0x3d4   :  { %v5213_v14 = vor.u32 %v4116_v21, %v3801_v52  ;;  %v3897_v52 = vld [vmem:[#allocation9 + $0xa8] sm:$0xf] }
 0x3d5   :  { %6140 = vst [vmem:[#allocation173_spill] sm:$0xff] %v5205_v12  ;;  %v5230_v48 = vor.u32 %v4140_v50, %v3897_v52  ;;  %v5239_v50 = vor.u32 %v4107_v57, %v3765_v60  ;;  %v4134_v52 = vld [vmem:[#allocation9 + $0x80] sm:$0xf0] }
 0x3d6   :  { %1793 = vmatpush.bf16.msra.mxu1 %v5205_v12  ;;  %6142 = vst [vmem:[#allocation175_spill] sm:$0xff] %v5213_v14  ;;  %v4115_v12 = vld [vmem:[#allocation7 + $0xac] sm:$0xf]  ;;  %2030 = vmatpush.bf16.msra.mxu3 %v5213_v14  ;;  %v3885_v14 = vld [vmem:[#allocation9 + $0x90] sm:$0xf] }
 0x3d7   :  { %6144 = vst [vmem:[#allocation177_spill] sm:$0xff] %v5218_v63 }
 0x3d8   :  { %6149 = vst [vmem:[#allocation182_spill] sm:$0xff] %v5230_v48 }
 0x3da   :  { %1794 = vmatpush.bf16.msra.mxu1 %v5208_v31  ;;  %v3777_v31 = vld [vmem:[#allocation7 + $0x78] sm:$0xf]  ;;  %2031 = vmatpush.bf16.msra.mxu3 %v5218_v63 }
 0x3db   :  { %v5228_v59 = vor.u32 %v4110_v39, %v3777_v31  ;;  %v3767_v31 = vld [vmem:[#allocation7 + $0x6c] sm:$0xf0]  ;;  %v3873_v39 = vld [vmem:[#allocation9 + $0x78] sm:$0xf] }
 0x3dc   :  { %v5249_v60 = vor.u32 %v4106_v58, %v3767_v31 }
 0x3dd   :  { %6148 = vst [vmem:[#allocation181_spill] sm:$0xff] %v5228_v59 }
 0x3de   :  { %2032 = vmatpush.bf16.msra.mxu3 %v5228_v59  ;;  %v3861_v59 = vld [vmem:[#allocation9 + $0x60] sm:$0xf] }
 0x3e2   :  { %2033 = vmatpush.bf16.msra.mxu3 %v5239_v50 }
 0x423   :  { %v5225_v23 = vpop.permute.xlu2 %1808 }
 0x424   :  { %6147 = vst [vmem:[#allocation180_spill] sm:$0xff] %v5225_v23 }
 0x433   :  { %v1474_v46 = vpop.f32.mrf.mxu0 }
 0x434   :  { %v1526_v49 = vpack.c.bf16 %v1474_v46, %v1474_v46  ;;  %v3803_v46 = vld [vmem:[#allocation7 + $0xb4] sm:$0xf0] }
 0x435   :  { %v5220_v15 = vor.u32 %v4115_v12, %v3803_v46  ;;  %v4109_v12 = vld [vmem:[#allocation7 + $0x7c] sm:$0xf]  ;;  %v3779_v46 = vld [vmem:[#allocation7 + $0x84] sm:$0xf0] }
 0x436   :  { %1743 = vmatmul.bf16.vlgmr.msrb.gmra.mxu1 %v1526_v49  ;;  %1756 = vmatmul.bf16.vlgmr.msra.gmra.mxu2 %v1526_v49 }
 0x437   :  { %1769 = vmatmul.bf16.vlgmr.msrb.gmra.mxu3 %v1526_v49  ;;  %1782 = vmatmul.bf16.vlgmr.msrb.gmra.mxu0 %v1526_v49  ;;  %6145 = vst [vmem:[#allocation178_spill] sm:$0xff] %v5220_v15 }
 0x438   :  { %2044 = vmatpush.bf16.msra.mxu0 %v5220_v15  ;;  %2240 = vmatpush.bf16.msrb.mxu1 %v5230_v48  ;;  %v4137_v15 = vld [vmem:[#allocation9 + $0x98] sm:$0xf0] }
 0x43b   :  { %v1476_v42 = vpop.f32.mrf.mxu0  ;;  %v5215_v9 = vpop.permute.xlu1 %1803 }
 0x43c   :  { %6143 = vst [vmem:[#allocation176_spill] sm:$0xff] %v5215_v9  ;;  %v4112_v42 = vld [vmem:[#allocation7 + $0x94] sm:$0xf] }
 0x43d   :  { %v5223_v21 = vor.u32 %v4112_v42, %v3791_v26  ;;  %v5234_v26 = vor.u32 %v4109_v12, %v3779_v46  ;;  %v5236_v42 = vor.u32 %v4137_v15, %v3885_v14  ;;  %v5246_v14 = vor.u32 %v4134_v52, %v3873_v39  ;;  %v5255_v39 = vpop.permute.xlu2 %1820 }
 0x43e   :  { %6153 = vst [vmem:[#allocation186_spill] sm:$0xff] %v5255_v39 }
 0x43f   :  { %6146 = vst [vmem:[#allocation179_spill] sm:$0xff] %v5223_v21  ;;  %2045 = vmatpush.bf16.msra.mxu0 %v5223_v21  ;;  %v4104_v21 = vld [vmem:[#allocation7 + $0x50] sm:$0xf0]  ;;  %2241 = vmatpush.bf16.msrb.mxu1 %v5236_v42 }
 0x440   :  { %6150 = vst [vmem:[#allocation183_spill] sm:$0xff] %v5236_v42  ;;  %v4101_v42 = vld [vmem:[#allocation7 + $0x38] sm:$0xf0] }
 0x441   :  { %6152 = vst [vmem:[#allocation185_spill] sm:$0xff] %v5246_v14  ;;  %v5266_v31 = vor.u32 %v4101_v42, %v3741_v6  ;;  %v3717_v42 = vld [vmem:[#allocation7] sm:$0xf] }
 0x443   :  { %2046 = vmatpush.bf16.msra.mxu0 %v5234_v26  ;;  %2242 = vmatpush.bf16.msrb.mxu1 %v5246_v14 }
 0x444   :  { %v5243_v12 = vpop.permute.xlu1 %1814 }
 0x445   :  { %6151 = vst [vmem:[#allocation184_spill] sm:$0xff] %v5243_v12 }
 0x446   :  { %1795 = vmatmul.bf16.vlgmr.msra.gmra.mxu1 %v1526_v49 }
 0x447   :  { %2047 = vmatpush.bf16.msra.mxu0 %v5249_v60 }
 0x4b3   :  { %v1744_v49 = vpop.f32.mrf.mxu1 }
 0x4b4   :  { %v1783_v8 = vpop.f32.mrf.mxu0  ;;  %v1806_v61 = vmul.f32 %v5215_v9, %v1744_v49  ;;  %v4103_v49 = vld [vmem:[#allocation7 + $0x4c] sm:$0xf] }
 0x4b5   :  { %v4131_v9 = vld [vmem:[#allocation9 + $0x68] sm:$0xf0] }
 0x4b9   :  { %v1757_v63 = vpop.f32.mrf.mxu2 }
 0x4ba   :  { %v1811_v48 = vmul.f32 %v5225_v23, %v1757_v63  ;;  %v1770_v19 = vpop.f32.mrf.mxu3  ;;  %v5252_v63 = vor.u32 %v4104_v21, %v3753_v37  ;;  %v3755_v23 = vld [vmem:[#allocation7 + $0x54] sm:$0xf0]  ;;  %v5263_v21 = vpop.permute.xlu0 %1826 }
 0x4bb   :  { %v1746_v15 = vpop.f32.mrf.mxu1  ;;  %6155 = vst [vmem:[#allocation188_spill] sm:$0xff] %v5263_v21 }
 0x4bc   :  { %v1812_v46 = vadd.f32 %v1811_v48, %v1806_v61  ;;  %v1785_v57 = vpop.f32.mrf.mxu0  ;;  %v1817_v15 = vmul.f32 %v5243_v12, %v1770_v19  ;;  %v5258_v61 = vor.u32 %v4131_v9, %v3861_v59  ;;  %v5261_v48 = vor.u32 %v4103_v49, %v3755_v23  ;;  %2034 = vmatpush.bf16.msra.mxu3 %v5252_v63  ;;  %v4098_v12 = vld [vmem:[#allocation7 + $0x20] sm:$0xf0]  ;;  %v3809_v23 = vld [vmem:[#allocation7 + $0xb0] sm:$0xf] }
 0x4bd   :  { %v1823_v19 = vmul.f32 %v5255_v39, %v1783_v8  ;;  %v3729_v57 = vld [vmem:[#allocation7 + $0x18] sm:$0xf]  ;;  %v4095_v8 = vld [vmem:[#allocation7 + $0x8] sm:$0xf0] }
 0x4be   :  { %6154 = vst [vmem:[#allocation187_spill] sm:$0xff] %v5258_v61  ;;  %v1818_v58 = vadd.f32 %v1817_v15, %v1812_v46  ;;  %2243 = vmatpush.bf16.msrb.mxu1 %v5258_v61  ;;  %2048 = vmatpush.bf16.msra.mxu0 %v5261_v48  ;;  %v4117_v46 = vld [vmem:[#allocation7 + $0xb8] sm:$0xf0]  ;;  %v5273_v49 = vor.u32 %v4098_v12, %v3729_v57  ;;  %v4139_v15 = vld [vmem:[#allocation9 + $0xac] sm:$0xf]  ;;  %v4093_v12 = vld [vmem:[%s5748_s11] sm:$0xff] }
 0x4bf   :  { %v5275_v39 = vor.u32 %v4117_v46, %v3809_v23  ;;  %v3785_v23 = vld [vmem:[#allocation7 + $0x80] sm:$0xf]  ;;  %v4111_v46 = vld [vmem:[#allocation7 + $0x88] sm:$0xf0]  ;;  %v4097_v61 = vld [vmem:[#allocation7 + $0x1c] sm:$0xf] }
 0x4c0   :  { %v1824_v9 = vadd.f32 %v1823_v19, %v1818_v58  ;;  %2035 = vmatpush.bf16.msra.mxu3 %v5266_v31  ;;  %v3797_v58 = vld [vmem:[#allocation7 + $0x98] sm:$0xf]  ;;  %v4114_v19 = vld [vmem:[#allocation7 + $0xa0] sm:$0xf0] }
 0x4c1   :  { %v1759_v37 = vpop.f32.mrf.mxu2  ;;  %6156 = vst [vmem:[#allocation189_spill] sm:$0xff] %v5275_v39 }
 0x4c2   :  { %v1772_v52 = vpop.f32.mrf.mxu3  ;;  %v3899_v37 = vld [vmem:[#allocation9 + $0xb4] sm:$0xf0] }
 0x4c3   :  { %v1796_v14 = vpop.f32.mrf.mxu1  ;;  %v5284_v57 = vor.u32 %v4139_v15, %v3899_v37  ;;  %v3761_v15 = vld [vmem:[#allocation7 + $0x50] sm:$0xf]  ;;  %v4105_v37 = vld [vmem:[#allocation7 + $0x58] sm:$0xf0] }
 0x4c4   :  { %v1829_v59 = vmul.f32 %v5263_v21, %v1796_v14  ;;  %2036 = vmatpush.bf16.msra.mxu3 %v5273_v49  ;;  %v5278_v14 = vor.u32 %v4095_v8, %v3717_v42  ;;  %v3773_v42 = vld [vmem:[#allocation7 + $0x68] sm:$0xf]  ;;  %v4108_v8 = vld [vmem:[#allocation7 + $0x70] sm:$0xf0] }
 0x4c5   :  { %6157 = vst [vmem:[#allocation190_spill] sm:$0xff] %v5284_v57 }
 0x4c6   :  { %v1830_v6 = vadd.f32 %v1829_v59, %v1824_v9  ;;  %v5287_v59 = vor.u32 %v4114_v19, %v3797_v58  ;;  %v4100_v58 = vld [vmem:[#allocation7 + $0x34] sm:$0xf]  ;;  %v3743_v19 = vld [vmem:[#allocation7 + $0x3c] sm:$0xf0] }
 0x4c8   :  { %v1833_v52 = vpack.c.bf16 %v1830_v6, %v1830_v6  ;;  %6158 = vst [vmem:[#allocation191_spill] sm:$0xff] %v5287_v59  ;;  %2037 = vmatpush.bf16.msra.mxu3 %v5278_v14  ;;  %v5293_v6 = vor.u32 %v4111_v46, %v3785_v23  ;;  %v4102_v23 = vld [vmem:[#allocation7 + $0x40] sm:$0xf0]  ;;  %v4136_v46 = vld [vmem:[#allocation9 + $0x94] sm:$0xf] }
 0x4ca   :  { %v1845_v21 = vsel %vm1843_vm1, %v1833_v52, 0  ;;  %6159 = vst [vmem:[#allocation192_spill] sm:$0xff] %v5293_v6  ;;  %v5299_v52 = vor.u32 %v4105_v37, %v3761_v15  ;;  %v3731_v37 = vld [vmem:[#allocation7 + $0x24] sm:$0xf0] }
 0x4cb   :  { %v1798_v9 = vpop.f32.mrf.mxu1  ;;  %1854 = vmatpush.bf16.msrb.mxu2 %v1845_v21  ;;  %v5296_v21 = vor.u32 %v4108_v8, %v3773_v42  ;;  %v3849_v8 = vld [vmem:[#allocation9 + $0x48] sm:$0xf] }
 0x4cc   :  { %2254 = vmatpush.bf16.msrb.mxu3 %v5284_v57  ;;  %6161 = vst [vmem:[#allocation194_spill] sm:$0xff] %v5299_v52  ;;  %v5302_v9 = vor.u32 %v4100_v58, %v3743_v19  ;;  %v5313_v58 = vor.u32 %v4097_v61, %v3731_v37  ;;  %v4094_v61 = vld [vmem:[#allocation7 + $0x4] sm:$0xf]  ;;  %v3719_v37 = vld [vmem:[#allocation7 + $0xc] sm:$0xf0] }
 0x4cd   :  { %6160 = vst [vmem:[#allocation193_spill] sm:$0xff] %v5296_v21  ;;  %v4124_v57 = vld [vmem:[#allocation9 + $0x34] sm:$0xf] }
 0x4ce   :  { %3714 = vmatmul.msk.bf16.vlgmr.msrb.gmra.mxu2 %vm1839_vm2, %v4093_v12  ;;  %v3749_v12 = vld [vmem:[#allocation7 + $0x38] sm:$0xf]  ;;  %2049 = vmatpush.bf16.msra.mxu0 %v5302_v9 }
 0x4cf   :  { %2058 = vmatpush.bf16.msra.mxu2 %v5275_v39  ;;  %v5304_v39 = vor.u32 %v4102_v23, %v3749_v12  ;;  %v3875_v12 = vld [vmem:[#allocation9 + $0x84] sm:$0xf0]  ;;  %v3837_v23 = vld [vmem:[#allocation9 + $0x30] sm:$0xf] }
 0x4d1   :  { %6162 = vst [vmem:[#allocation195_spill] sm:$0xff] %v5304_v39 }
 0x4d2   :  { %2050 = vmatpush.bf16.msra.mxu0 %v5313_v58 }
 0x4d3   :  { %2059 = vmatpush.bf16.msra.mxu2 %v5287_v59  ;;  %v3887_v59 = vld [vmem:[#allocation9 + $0x9c] sm:$0xf0] }
 0x4d4   :  { %v5306_v42 = vor.u32 %v4136_v46, %v3887_v59  ;;  %v4133_v59 = vld [vmem:[#allocation9 + $0x7c] sm:$0xf] }
 0x4d5   :  { %v5318_v46 = vor.u32 %v4133_v59, %v3875_v12  ;;  %v3863_v59 = vld [vmem:[#allocation9 + $0x6c] sm:$0xf0] }
 0x4d6   :  { %6163 = vst [vmem:[#allocation196_spill] sm:$0xff] %v5306_v42  ;;  %2255 = vmatpush.bf16.msrb.mxu3 %v5306_v42  ;;  %v4122_v42 = vld [vmem:[#allocation9 + $0x20] sm:$0xf0] }
 0x4d7   :  { %2060 = vmatpush.bf16.msra.mxu2 %v5293_v6  ;;  %v4128_v6 = vld [vmem:[#allocation9 + $0x50] sm:$0xf0]  ;;  %6166 = vst [vmem:[#allocation199_spill] sm:$0xff] %v5318_v46 }
 0x4d8   :  { %v5309_v15 = vor.u32 %v4128_v6, %v3849_v8  ;;  %v4125_v6 = vld [vmem:[#allocation9 + $0x38] sm:$0xf0] }
 0x4d9   :  { %v5320_v8 = vor.u32 %v4125_v6, %v3837_v23  ;;  %v3825_v6 = vld [vmem:[#allocation9 + $0x18] sm:$0xf] }
 0x4da   :  { %6164 = vst [vmem:[#allocation197_spill] sm:$0xff] %v5309_v15  ;;  %2244 = vmatpush.bf16.msrb.mxu1 %v5309_v15  ;;  %2256 = vmatpush.bf16.msrb.mxu3 %v5318_v46  ;;  %v4130_v15 = vld [vmem:[#allocation9 + $0x64] sm:$0xf]  ;;  %v4141_v46 = vld [vmem:[#allocation9 + $0xb8] sm:$0xf0] }
 0x4db   :  { %2061 = vmatpush.bf16.msra.mxu2 %v5296_v21  ;;  %v4099_v21 = vld [vmem:[#allocation7 + $0x28] sm:$0xf0]  ;;  %6167 = vst [vmem:[#allocation200_spill] sm:$0xff] %v5320_v8  ;;  %v5330_v23 = vor.u32 %v4130_v15, %v3863_v59  ;;  %v3905_v59 = vld [vmem:[#allocation9 + $0xb0] sm:$0xf] }
 0x4dd   :  { %6170 = vst [vmem:[#allocation203_spill] sm:$0xff] %v5330_v23 }
 0x4de   :  { %2245 = vmatpush.bf16.msrb.mxu1 %v5320_v8  ;;  %2257 = vmatpush.bf16.msrb.mxu3 %v5330_v23  ;;  %v4127_v8 = vld [vmem:[#allocation9 + $0x4c] sm:$0xf] }
 0x4df   :  { %2062 = vmatpush.bf16.msra.mxu2 %v5299_v52  ;;  %v3737_v52 = vld [vmem:[#allocation7 + $0x20] sm:$0xf] }
 0x4e0   :  { %v5315_v19 = vor.u32 %v4099_v21, %v3737_v52  ;;  %v3725_v21 = vld [vmem:[#allocation7 + $0x8] sm:$0xf]  ;;  %v5326_v52 = vor.u32 %v4094_v61, %v3719_v37  ;;  %v3851_v61 = vld [vmem:[#allocation9 + $0x54] sm:$0xf0] }
 0x4e1   :  { %v5338_v37 = vor.u32 %v4127_v8, %v3851_v61  ;;  %v4121_v61 = vld [vmem:[#allocation9 + $0x1c] sm:$0xf] }
 0x4e2   :  { %6165 = vst [vmem:[#allocation198_spill] sm:$0xff] %v5315_v19  ;;  %2051 = vmatpush.bf16.msra.mxu0 %v5326_v52 }
 0x4e3   :  { %2063 = vmatpush.bf16.msra.mxu2 %v5304_v39  ;;  %6168 = vst [vmem:[#allocation201_spill] sm:$0xff] %v5326_v52  ;;  %v4096_v39 = vld [vmem:[#allocation7 + $0x10] sm:$0xf0]  ;;  %v5342_v52 = vor.u32 %v4141_v46, %v3905_v59  ;;  %2258 = vmatpush.bf16.msrb.mxu3 %v5338_v37  ;;  %v4118_v59 = vld [vmem:[#allocation9 + $0x4] sm:$0xf] }
 0x4e4   :  { %v5328_v12 = vor.u32 %v4096_v39, %v3725_v21  ;;  %v3813_v39 = vld [vmem:[#allocation9] sm:$0xf]  ;;  %v4119_v21 = vld [vmem:[#allocation9 + $0x8] sm:$0xf0] }
 0x4e5   :  { %v5340_v15 = vor.u32 %v4119_v21, %v3813_v39  ;;  %v3827_v39 = vld [vmem:[#allocation9 + $0x24] sm:$0xf0]  ;;  %v3881_v21 = vld [vmem:[#allocation9 + $0x80] sm:$0xf] }
 0x4e6   :  { %6169 = vst [vmem:[#allocation202_spill] sm:$0xff] %v5328_v12  ;;  %2268 = vmatpush.bf16.msrb.mxu0 %v5342_v52  ;;  %v5354_v46 = vor.u32 %v4121_v61, %v3827_v39  ;;  %v4129_v39 = vld [vmem:[#allocation9 + $0x58] sm:$0xf0] }
 0x4e7   :  { %2064 = vmatpush.bf16.msra.mxu2 %v5315_v19  ;;  %v5333_v19 = vor.u32 %v4122_v42, %v3825_v6  ;;  %6172 = vst [vmem:[#allocation205_spill] sm:$0xff] %v5340_v15  ;;  %v3839_v42 = vld [vmem:[#allocation9 + $0x3c] sm:$0xf0]  ;;  %v3893_v6 = vld [vmem:[#allocation9 + $0x98] sm:$0xf] }
 0x4e8   :  { %v5345_v23 = vor.u32 %v4124_v57, %v3839_v42  ;;  %v3815_v42 = vld [vmem:[#allocation9 + $0xc] sm:$0xf0] }
 0x4e9   :  { %6171 = vst [vmem:[#allocation204_spill] sm:$0xff] %v5333_v19  ;;  %2246 = vmatpush.bf16.msrb.mxu1 %v5333_v19  ;;  %v4135_v19 = vld [vmem:[#allocation9 + $0x88] sm:$0xf0] }
 0x4ea   :  { %2259 = vmatpush.bf16.msrb.mxu3 %v5345_v23  ;;  %v5357_v57 = vor.u32 %v4135_v19, %v3881_v21  ;;  %v3857_v19 = vld [vmem:[#allocation9 + $0x50] sm:$0xf] }
 0x4eb   :  { %2065 = vmatpush.bf16.msra.mxu2 %v5328_v12  ;;  %v4138_v12 = vld [vmem:[#allocation9 + $0xa0] sm:$0xf0]  ;;  %v5369_v21 = vor.u32 %v4129_v39, %v3857_v19  ;;  %v3821_v19 = vld [vmem:[#allocation9 + $0x8] sm:$0xf]  ;;  %v4120_v39 = vld [vmem:[#allocation9 + $0x10] sm:$0xf0] }
 0x4ec   :  { %v5349_v8 = vor.u32 %v4138_v12, %v3893_v6  ;;  %v5361_v12 = vor.u32 %v4118_v59, %v3815_v42  ;;  %v4132_v6 = vld [vmem:[#allocation9 + $0x70] sm:$0xf0]  ;;  %v4126_v59 = vld [vmem:[#allocation9 + $0x40] sm:$0xf0] }
 0x4ed   :  { %2247 = vmatpush.bf16.msrb.mxu1 %v5340_v15  ;;  %v5381_v15 = vor.u32 %v4120_v39, %v3821_v19  ;;  %v5436_v19 = vld [vmem:[%s5752_s15] sm:$0x7] }
 0x4ee   :  { %2269 = vmatpush.bf16.msrb.mxu0 %v5349_v8  ;;  %2260 = vmatpush.bf16.msrb.mxu3 %v5354_v46  ;;  %6173 = vst [vmem:[#allocation206_spill] sm:$0xff] %v5361_v12  ;;  %v5439_v39 = vperm.slane %v5436_v19, 0 }
 0x4f0   :  { %2248 = vmatmul.bf16.vlgmr.msrb.gmra.mxu1 %v4505_v2 }
 0x4f1   :  { %2392 = vmatpush.bf16.msra.mxu1 %v4510_v7  ;;  %v3869_v7 = vld [vmem:[#allocation9 + $0x68] sm:$0xf] }
 0x4f2   :  { %2270 = vmatpush.bf16.msrb.mxu0 %v5357_v57  ;;  %2261 = vmatpush.bf16.msrb.mxu3 %v5361_v12  ;;  %v5366_v61 = vor.u32 %v4132_v6, %v3869_v7  ;;  %v3833_v12 = vld [vmem:[#allocation9 + $0x20] sm:$0xf]  ;;  %v4123_v7 = vld [vmem:[#allocation9 + $0x28] sm:$0xf0] }
 0x4f3   :  { %v5377_v6 = vor.u32 %v4123_v7, %v3833_v12  ;;  %v6196_v12 = vld [vmem:[#allocation51_spill] sm:$0xff] }
 0x4f5   :  { %2393 = vmatpush.bf16.msra.mxu1 %v4514_v11  ;;  %v3845_v11 = vld [vmem:[#allocation9 + $0x38] sm:$0xf] }
 0x4f6   :  { %2271 = vmatpush.bf16.msrb.mxu0 %v5366_v61 }
 0x4f9   :  { %2394 = vmatpush.bf16.msra.mxu1 %v4528_v27  ;;  %v5373_v27 = vor.u32 %v4126_v59, %v3845_v11  ;;  %v2104_v59 = vld [vmem:[%s5753_s16] sm:$0x7] }
 0x4fa   :  { %2272 = vmatpush.bf16.msrb.mxu0 %v5369_v21  ;;  %v5431_v7 = vperm.slane %v2104_v59, 0 }
 0x4fd   :  { %2395 = vmatpush.bf16.msra.mxu1 %v4542_v43 }
 0x4fe   :  { %2273 = vmatpush.bf16.msrb.mxu0 %v5373_v27 }
 0x501   :  { %2396 = vmatpush.bf16.msra.mxu1 %v4554_v55  ;;  %v6182_v55 = vld [vmem:[#allocation39_spill] sm:$0xff] }
 0x502   :  { %2274 = vmatpush.bf16.msrb.mxu0 %v5377_v6 }
 0x505   :  { %2397 = vmatpush.bf16.msra.mxu1 %v4566_v4  ;;  %v6185_v4 = vld [vmem:[#allocation33_spill] sm:$0xff] }
 0x506   :  { %2275 = vmatpush.bf16.msrb.mxu0 %v5381_v15 }
 0x509   :  { %2398 = vmatpush.bf16.msra.mxu1 %v4583_v22  ;;  %v6188_v22 = vld [vmem:[#allocation38_spill] sm:$0xff] }
 0x50d   :  { %2399 = vmatpush.bf16.msra.mxu1 %v4597_v45  ;;  %v6190_v45 = vld [vmem:[#allocation42_spill] sm:$0xff] }
 0x511   :  { %2448 = vmatpush.bf16.msrb.mxu1 %v4602_v51  ;;  %v6191_v51 = vld [vmem:[#allocation44_spill] sm:$0xff] }
 0x515   :  { %2449 = vmatpush.bf16.msrb.mxu1 %v4617_v10  ;;  %v6192_v10 = vld [vmem:[#allocation45_spill] sm:$0xff] }
 0x519   :  { %2450 = vmatpush.bf16.msrb.mxu1 %v4628_v25  ;;  %v6193_v25 = vld [vmem:[#allocation47_spill] sm:$0xff] }
 0x51d   :  { %2451 = vmatpush.bf16.msrb.mxu1 %v4633_v29  ;;  %v6194_v29 = vld [vmem:[#allocation48_spill] sm:$0xff] }
 0x521   :  { %2452 = vmatpush.bf16.msrb.mxu1 %v4636_v35  ;;  %v6195_v35 = vld [vmem:[#allocation50_spill] sm:$0xff] }
 0x551   :  { %v1856_v42 = vpop.f32.mrf.mxu2 }
 0x559   :  { %v1858_v43 = vpop.f32.mrf.mxu2 }
 0x55a   :  { %v1893_v11 = vpack.c.bf16 %v1858_v43, %v1856_v42 }
 0x55c   :  { %2038 = vmatmul.bf16.vlgmr.msra.gmra.mxu3 %v1893_v11  ;;  %2052 = vmatmul.bf16.vlgmr.msra.gmra.mxu0 %v1893_v11 }
 0x55d   :  { %2066 = vmatmul.bf16.vlgmr.msra.gmra.mxu2 %v1893_v11  ;;  %2420 = vmatpush.bf16.msra.mxu3 %v4518_v17  ;;  %v6174_v17 = vld [vmem:[#allocation31_spill] sm:$0xff] }
 0x55e   :  { %2434 = vmatpush.bf16.msra.mxu0 %v4521_v20  ;;  %2453 = vmatpush.bf16.msrb.mxu1 %v6174_v17  ;;  %v6175_v20 = vld [vmem:[#allocation20_spill] sm:$0xff] }
 0x561   :  { %2421 = vmatpush.bf16.msra.mxu3 %v4531_v30  ;;  %v6176_v30 = vld [vmem:[#allocation21_spill] sm:$0xff] }
 0x562   :  { %2435 = vmatpush.bf16.msra.mxu0 %v4533_v32  ;;  %v6177_v32 = vld [vmem:[#allocation35_spill] sm:$0xff] }
 0x563   :  { %2454 = vmatpush.bf16.msrb.mxu1 %v6177_v32 }
 0x565   :  { %2422 = vmatpush.bf16.msra.mxu3 %v4539_v41  ;;  %v6179_v41 = vld [vmem:[#allocation24_spill] sm:$0xff] }
 0x566   :  { %2436 = vmatpush.bf16.msra.mxu0 %v4545_v44  ;;  %v6180_v44 = vld [vmem:[#allocation26_spill] sm:$0xff] }
 0x567   :  { %2455 = vmatpush.bf16.msrb.mxu1 %v6182_v55 }
 0x569   :  { %2423 = vmatpush.bf16.msra.mxu3 %v4551_v53  ;;  %v6181_v53 = vld [vmem:[#allocation27_spill] sm:$0xff] }
 0x56a   :  { %2437 = vmatpush.bf16.msra.mxu0 %v4557_v56  ;;  %v6183_v56 = vld [vmem:[#allocation29_spill] sm:$0xff] }
 0x56c   :  { %2262 = vmatmul.bf16.vlgmr.msrb.gmra.mxu3 %v4505_v2  ;;  %2276 = vmatmul.bf16.vlgmr.msrb.gmra.mxu0 %v4505_v2  ;;  %v6178_v2 = vld [vmem:[#allocation23_spill] sm:$0xff] }
 0x56d   :  { %2424 = vmatpush.bf16.msra.mxu3 %v4563_v1  ;;  %v6184_v1 = vld [vmem:[#allocation30_spill] sm:$0xff]  ;;  %v2249_v42 = vpop.f32.mrf.mxu1 }
 0x56e   :  { %2438 = vmatpush.bf16.msra.mxu0 %v4569_v5  ;;  %v6186_v5 = vld [vmem:[#allocation34_spill] sm:$0xff]  ;;  %v2250_v43 = vadd.f32 %v2249_v42, %v5431_v7 }
 0x571   :  { %2425 = vmatpush.bf16.msra.mxu3 %v4575_v18  ;;  %v6187_v18 = vld [vmem:[#allocation37_spill] sm:$0xff] }
 0x572   :  { %2439 = vmatpush.bf16.msra.mxu0 %v4586_v24  ;;  %v6189_v24 = vld [vmem:[#allocation41_spill] sm:$0xff] }
 0x575   :  { %2426 = vmatpush.bf16.msra.mxu3 %v6175_v20 }
 0x576   :  { %2440 = vmatpush.bf16.msra.mxu0 %v6176_v30  ;;  %v2251_v30 = vpop.f32.mrf.mxu1 }
 0x579   :  { %2427 = vmatpush.bf16.msra.mxu3 %v6178_v2  ;;  %v2252_v2 = vadd.f32 %v2251_v30, %v5431_v7 }
 0x57a   :  { %2441 = vmatpush.bf16.msra.mxu0 %v6179_v41 }
 0x57d   :  { %2476 = vmatpush.bf16.msrb.mxu3 %v6180_v44 }
 0x57e   :  { %2490 = vmatpush.bf16.msrb.mxu0 %v6181_v53 }
 0x581   :  { %2477 = vmatpush.bf16.msrb.mxu3 %v6183_v56 }
 0x582   :  { %2491 = vmatpush.bf16.msrb.mxu0 %v6184_v1  ;;  %v5446_v1 = vperm.slane %v5436_v19, 1 }
 0x584   :  { %6197 = vst [vmem:[#allocation31_spill] sm:$0xff] %v5446_v1 }
 0x585   :  { %2478 = vmatpush.bf16.msrb.mxu3 %v6185_v4 }
 0x586   :  { %2492 = vmatpush.bf16.msrb.mxu0 %v6186_v5  ;;  %v5448_v5 = vperm.slane %v2104_v59, 1 }
 0x588   :  { %6198 = vst [vmem:[#allocation20_spill] sm:$0xff] %v5448_v5 }
 0x589   :  { %2479 = vmatpush.bf16.msrb.mxu3 %v6187_v18 }
 0x58a   :  { %2493 = vmatpush.bf16.msrb.mxu0 %v6188_v22 }
 0x58d   :  { %2480 = vmatpush.bf16.msrb.mxu3 %v6189_v24 }
 0x58e   :  { %2494 = vmatpush.bf16.msrb.mxu0 %v6190_v45 }
 0x591   :  { %2481 = vmatpush.bf16.msrb.mxu3 %v6191_v51 }
 0x592   :  { %2495 = vmatpush.bf16.msrb.mxu0 %v6192_v10 }
 0x595   :  { %2482 = vmatpush.bf16.msrb.mxu3 %v6193_v25 }
 0x596   :  { %2496 = vmatpush.bf16.msrb.mxu0 %v6194_v29 }
 0x599   :  { %2483 = vmatpush.bf16.msrb.mxu3 %v6195_v35 }
 0x59a   :  { %2497 = vmatpush.bf16.msrb.mxu0 %v6196_v12 }
 0x5d9   :  { %v2053_v44 = vpop.f32.mrf.mxu0 }
 0x5da   :  { %v2054_v24 = vadd.f32 %v2053_v44, %v5446_v1 }
 0x5df   :  { %v2039_v11 = vpop.f32.mrf.mxu3 }
 0x5e0   :  { %v2040_v17 = vadd.f32 %v2039_v11, %v5439_v39 }
 0x5e1   :  { %v2055_v51 = vpop.f32.mrf.mxu0 }
 0x5e2   :  { %v2282_v20 = vadd.f32 %v2250_v43, %v2040_v17  ;;  %v2056_v11 = vadd.f32 %v2055_v51, %v5446_v1  ;;  %v5464_v1 = vperm.slane %v5436_v19, 2 }
 0x5e4   :  { %v3907_v32 = vmul.f32 -1.442695, %v2282_v20 }
 0x5e6   :  { %4198 = vpow2.f32 %v3907_v32 }
 0x5e7   :  { %v2041_v41 = vpop.f32.mrf.mxu3 }
 0x5e8   :  { %v2042_v53 = vadd.f32 %v2041_v41, %v5439_v39 }
 0x5e9   :  { %v2277_v32 = vpop.f32.mrf.mxu0 }
 0x5ea   :  { %v2283_v55 = vadd.f32 %v2252_v2, %v2042_v53 }
 0x5ec   :  { %v4199_v56 = vpop.eup %4198  ;;  %v3908_v4 = vmul.f32 -1.442695, %v2283_v55 }
 0x5ed   :  { %v2290_v18 = vadd.f32 1.0, %v4199_v56 }
 0x5ee   :  { %4200 = vpow2.f32 %v3908_v4 }
 0x5ef   :  { %4202 = vrcp.f32 %v2290_v18  ;;  %v2263_v22 = vpop.f32.mrf.mxu3  ;;  %vm2297_vm4 = vweird.f32 %v2290_v18  ;;  %v2301_v51 = vand.u32 2147483647, %v2290_v18 }
 0x5f0   :  { %v2264_v45 = vadd.f32 %v2263_v22, %v5448_v5  ;;  %v2067_v22 = vpop.f32.mrf.mxu2 }
 0x5f1   :  { %vm2302_vm8 = vcmp.eq.f32.partialorder %v2301_v51, 8.507059e+37 }
 0x5f2   :  { %v2322_v10 = vadd.f32 %v2264_v45, %v2054_v24  ;;  %v2303_v24 = vand.u32 2147483648, %v2290_v18 }
 0x5f4   :  { %v4201_v25 = vpop.eup %4200  ;;  %v3909_v29 = vmul.f32 -1.442695, %v2322_v10  ;;  %v5454_v10 = vperm.slane %v2104_v59, 2 }
 0x5f5   :  { %v4203_v35 = vpop.eup %4202  ;;  %v2291_v12 = vadd.f32 1.0, %v4201_v25 }
 0x5f6   :  { %4204 = vpow2.f32 %v3909_v29  ;;  %v2293_v42 = vmul.f32 %v4203_v35, %v2290_v18  ;;  %vm2298_vm3 = vweird.f32 %v4203_v35  ;;  %v2278_v18 = vadd.f32 %v2277_v32, %v5454_v10 }
 0x5f7   :  { %4206 = vrcp.f32 %v2291_v12  ;;  %v2265_v43 = vpop.f32.mrf.mxu3  ;;  %vm5456_vm5 = vmor %vm2297_vm4, %vm2298_vm3  ;;  %vm2312_vm7 = vweird.f32 %v2291_v12  ;;  %v2068_v32 = vadd.f32 %v2067_v22, %v5464_v1 }
 0x5f8   :  { %v2266_v17 = vadd.f32 %v2265_v43, %v5448_v5  ;;  %v2294_v20 = vsub.f32 1.0, %v2293_v42  ;;  %v2318_v42 = vand.u32 2147483648, %v2291_v12  ;;  %v2069_v25 = vpop.f32.mrf.mxu2 }
 0x5f9   :  { %v2070_v19 = vadd.f32 %v2069_v25, %v5464_v1 }
 0x5fa   :  { %v2323_v30 = vadd.f32 %v2266_v17, %v2056_v11  ;;  %v2295_v2 = vmul.f32 %v4203_v35, %v2294_v20  ;;  %v2316_v11 = vand.u32 2147483647, %v2291_v12  ;;  %v2304_v20 = vor.u32 1.1754944e-38, %v2303_v24 }
 0x5fb   :  { %v2319_v5 = vor.u32 1.1754944e-38, %v2318_v42 }
 0x5fc   :  { %v4205_v41 = vpop.eup %4204  ;;  %v3910_v44 = vmul.f32 -1.442695, %v2323_v30  ;;  %v2296_v4 = vadd.f32 %v4203_v35, %v2295_v2  ;;  %v2279_v30 = vpop.f32.mrf.mxu0  ;;  %vm2317_vm10 = vcmp.eq.f32.partialorder %v2316_v11, 8.507059e+37 }
 0x5fd   :  { %v4207_v53 = vpop.eup %4206  ;;  %v2330_v55 = vadd.f32 1.0, %v4205_v41 }
 0x5fe   :  { %4208 = vpow2.f32 %v3910_v44  ;;  %v2308_v56 = vmul.f32 %v4207_v53, %v2291_v12  ;;  %vm2313_vm6 = vweird.f32 %v4207_v53  ;;  %v2300_v43 = vsel %vm5456_vm5, %v4203_v35, %v2296_v4 }
 0x5ff   :  { %4210 = vrcp.f32 %v2330_v55  ;;  %vm2314_vm9 = vmor %vm2312_vm7, %vm2313_vm6  ;;  %v2280_v35 = vadd.f32 %v2279_v30, %v5454_v10  ;;  %vm2337_vm12 = vweird.f32 %v2330_v55  ;;  %v2341_v42 = vand.u32 2147483647, %v2330_v55 }
 0x600   :  { %v2309_v45 = vsub.f32 1.0, %v2308_v56  ;;  %v2305_v56 = vsel %vm2302_vm8, %v2304_v20, %v2300_v43 }
 0x601   :  { %v2362_v12 = vmul.f32 %v2305_v56, %v2278_v18  ;;  %vm2342_vm14 = vcmp.eq.f32.partialorder %v2341_v42, 8.507059e+37 }
 0x602   :  { %v2310_v29 = vmul.f32 %v4207_v53, %v2309_v45 }
 0x603   :  { %v2364_v20 = vadd.f32 %v2362_v12, %v2068_v32 }
 0x604   :  { %v4209_v17 = vpop.eup %4208  ;;  %v2311_v2 = vadd.f32 %v4207_v53, %v2310_v29 }
 0x605   :  { %v4211_v59 = vpop.eup %4210  ;;  %v2331_v41 = vadd.f32 1.0, %v4209_v17  ;;  %v2343_v17 = vand.u32 2147483648, %v2330_v55 }
 0x606   :  { %v2333_v44 = vmul.f32 %v4211_v59, %v2330_v55  ;;  %v2315_v45 = vsel %vm2314_vm9, %v4207_v53, %v2311_v2  ;;  %vm2338_vm11 = vweird.f32 %v4211_v59 }
 0x607   :  { %4212 = vrcp.f32 %v2331_v41  ;;  %v2320_v24 = vsel %vm2317_vm10, %v2319_v5, %v2315_v45  ;;  %vm2339_vm13 = vmor %vm2337_vm12, %vm2338_vm11  ;;  %v2344_v5 = vor.u32 1.1754944e-38, %v2343_v17  ;;  %v2358_v56 = vand.u32 2147483648, %v2331_v41  ;;  %v4238_v17 = vld [vmem:[%s5971_s27] sm:$0xff] }
 0x608   :  { %v2334_v4 = vsub.f32 1.0, %v2333_v44  ;;  %v2363_v51 = vmul.f32 %v2320_v24, %v2280_v35  ;;  %4214 = vtanh.f32 %v2364_v20  ;;  %v2356_v45 = vand.u32 2147483647, %v2331_v41 }
 0x609   :  { %vm2352_vm3 = vweird.f32 %v2331_v41 }
 0x60a   :  { %v2335_v29 = vmul.f32 %v4211_v59, %v2334_v4  ;;  %v2365_v2 = vadd.f32 %v2363_v51, %v2070_v19  ;;  %v2359_v4 = vor.u32 1.1754944e-38, %v2358_v56  ;;  %vm2357_vm5 = vcmp.eq.f32.partialorder %v2356_v45, 8.507059e+37  ;;  %v6206_v56 = vld [vmem:[#allocation18_spill] sm:$0xff] }
 0x60b   :  { %v6208_v45 = vld [vmem:[#allocation22_spill] sm:$0xff] }
 0x60c   :  { %v2336_v53 = vadd.f32 %v4211_v59, %v2335_v29  ;;  %4216 = vtanh.f32 %v2365_v2  ;;  %v6202_v2 = vld [vmem:[#allocation14_spill] sm:$0xff] }
 0x60d   :  { %v4213_v43 = vpop.eup %4212 }
 0x60e   :  { %v2348_v30 = vmul.f32 %v4213_v43, %v2331_v41  ;;  %v2340_v11 = vsel %vm2339_vm13, %v4211_v59, %v2336_v53  ;;  %vm2353_vm15 = vweird.f32 %v4213_v43  ;;  %v4215_v12 = vpop.eup %4214  ;;  %v4239_v41 = vld [vmem:[%s5971_s27 + $0x8] sm:$0xff] }
 0x60f   :  { %v2345_v44 = vsel %vm2342_vm14, %v2344_v5, %v2340_v11  ;;  %vm2354_vm4 = vmor %vm2352_vm3, %vm2353_vm15  ;;  %v4240_v11 = vld [vmem:[%s5739_s2] sm:$0xff]  ;;  %v6203_v5 = vld [vmem:[#allocation15_spill] sm:$0xff] }
 0x610   :  { %v2349_v18 = vsub.f32 1.0, %v2348_v30  ;;  %v2368_v35 = vsub.f32 1.0, %v2345_v44  ;;  %v2372_v53 = vmul.f32 %v4238_v17, %v2345_v44  ;;  %v6201_v30 = vld [vmem:[#allocation13_spill] sm:$0xff] }
 0x611   :  { %v6205_v44 = vld [vmem:[#allocation17_spill] sm:$0xff] }
 0x612   :  { %v2350_v22 = vmul.f32 %v4213_v43, %v2349_v18  ;;  %v2370_v29 = vmul.f32 %v4215_v12, %v2368_v35  ;;  %v4217_v32 = vpop.eup %4216  ;;  %v6204_v18 = vld [vmem:[#allocation16_spill] sm:$0xff] }
 0x613   :  { %v6210_v35 = vld [vmem:[#allocation28_spill] sm:$0xff] }
 0x614   :  { %v2351_v55 = vadd.f32 %v4213_v43, %v2350_v22  ;;  %v5475_v19 = vadd.f32 %v2372_v53, %v2370_v29  ;;  %v6207_v22 = vld [vmem:[#allocation19_spill] sm:$0xff]  ;;  %v6213_v12 = vld [vmem:[#allocation40_spill] sm:$0xff]  ;;  %v6216_v29 = vld [vmem:[#allocation49_spill] sm:$0xff] }
 0x615   :  { %v6217_v53 = vld [vmem:[#allocation52_spill] sm:$0xff] }
 0x616   :  { %v2355_v24 = vsel %vm2354_vm4, %v4213_v43, %v2351_v55  ;;  %v6209_v55 = vld [vmem:[#allocation25_spill] sm:$0xff] }
 0x617   :  { %v2360_v59 = vsel %vm2357_vm5, %v2359_v4, %v2355_v24  ;;  %v6211_v4 = vld [vmem:[#allocation32_spill] sm:$0xff] }
 0x618   :  { %v2369_v25 = vsub.f32 1.0, %v2360_v59  ;;  %v2373_v42 = vmul.f32 %v4239_v41, %v2360_v59  ;;  %v6212_v24 = vld [vmem:[#allocation36_spill] sm:$0xff]  ;;  %v6214_v59 = vld [vmem:[#allocation43_spill] sm:$0xff]  ;;  %v6218_v41 = vld [vmem:[#allocation53_spill] sm:$0xff] }
 0x61a   :  { %v2371_v51 = vmul.f32 %v4217_v32, %v2369_v25  ;;  %v6215_v25 = vld [vmem:[#allocation46_spill] sm:$0xff] }
 0x61c   :  { %v5477_v43 = vadd.f32 %v2373_v42, %v2371_v51  ;;  %v6219_v42 = vld [vmem:[#allocation54_spill] sm:$0xff] }
 0x61e   :  { %v5481_v20 = vpack.c.bf16 %v5477_v43, %v5475_v19 }
 0x620   :  { %2384 = vmatpush.bf16.msrb.mxu2 %v5481_v20 }
 0x623   :  { %3911 = vmatmul.msk.bf16.vlgmr.msrb.gmra.mxu2 %vm145_vm0, %v4240_v11  ;;  %v6221_v11 = vld [vmem:[#allocation56_spill] sm:$0xff] }
 0x624   :  { %2406 = vmatpush.bf16.msra.mxu2 %v6201_v30  ;;  %v6220_v30 = vld [vmem:[#allocation55_spill] sm:$0xff] }
 0x628   :  { %2407 = vmatpush.bf16.msra.mxu2 %v6202_v2  ;;  %v6226_v2 = vld [vmem:[#allocation92_spill] sm:$0xff] }
 0x62c   :  { %2408 = vmatpush.bf16.msra.mxu2 %v6203_v5  ;;  %v6227_v5 = vld [vmem:[#allocation83_spill] sm:$0xff] }
 0x630   :  { %2409 = vmatpush.bf16.msra.mxu2 %v6204_v18  ;;  %v6229_v18 = vld [vmem:[#allocation85_spill] sm:$0xff] }
 0x634   :  { %2410 = vmatpush.bf16.msra.mxu2 %v6205_v44  ;;  %v6231_v44 = vld [vmem:[#allocation87_spill] sm:$0xff] }
 0x638   :  { %2411 = vmatpush.bf16.msra.mxu2 %v6206_v56  ;;  %v6233_v56 = vld [vmem:[#allocation90_spill] sm:$0xff] }
 0x63c   :  { %2412 = vmatpush.bf16.msra.mxu2 %v6207_v22  ;;  %v6235_v22 = vld [vmem:[#allocation102_spill] sm:$0xff] }
 0x640   :  { %2413 = vmatpush.bf16.msra.mxu2 %v6208_v45  ;;  %v6236_v45 = vld [vmem:[#allocation117_spill] sm:$0xff] }
 0x644   :  { %2462 = vmatpush.bf16.msrb.mxu2 %v6209_v55  ;;  %v6237_v55 = vld [vmem:[#allocation106_spill] sm:$0xff] }
 0x648   :  { %2463 = vmatpush.bf16.msrb.mxu2 %v6210_v35  ;;  %v6238_v35 = vld [vmem:[#allocation120_spill] sm:$0xff] }
 0x64c   :  { %2464 = vmatpush.bf16.msrb.mxu2 %v6211_v4  ;;  %v6239_v4 = vld [vmem:[#allocation110_spill] sm:$0xff] }
 0x650   :  { %2465 = vmatpush.bf16.msrb.mxu2 %v6212_v24  ;;  %v6240_v24 = vld [vmem:[#allocation123_spill] sm:$0xff] }
 0x654   :  { %2466 = vmatpush.bf16.msrb.mxu2 %v6213_v12 }
 0x658   :  { %2467 = vmatpush.bf16.msrb.mxu2 %v6214_v59 }
 0x65c   :  { %2468 = vmatpush.bf16.msrb.mxu2 %v6215_v25 }
 0x660   :  { %2469 = vmatpush.bf16.msrb.mxu2 %v6216_v29 }
 0x6a6   :  { %v2386_v32 = vpop.f32.mrf.mxu2 }
 0x6ae   :  { %v2388_v51 = vpop.f32.mrf.mxu2 }
 0x6af   :  { %v2391_v17 = vpack.c.bf16 %v2388_v51, %v2386_v32 }
 0x6b1   :  { %2400 = vmatmul.bf16.vlgmr.msra.gmra.mxu1 %v2391_v17  ;;  %2414 = vmatmul.bf16.vlgmr.msra.gmra.mxu2 %v2391_v17 }
 0x6b2   :  { %2428 = vmatmul.bf16.vlgmr.msra.gmra.mxu3 %v2391_v17  ;;  %2442 = vmatmul.bf16.vlgmr.msra.gmra.mxu0 %v2391_v17 }
 0x6b3   :  { %2504 = vmatpush.bf16.msra.mxu1 %v6217_v53  ;;  %2583 = vmatpush.bf16.msra.mxu0 %v4828_v33  ;;  %v6222_v33 = vld [vmem:[#allocation57_spill] sm:$0xff] }
 0x6b7   :  { %2505 = vmatpush.bf16.msra.mxu1 %v6218_v41  ;;  %2584 = vmatpush.bf16.msra.mxu0 %v4833_v54  ;;  %v6223_v54 = vld [vmem:[#allocation58_spill] sm:$0xff] }
 0x6bb   :  { %2506 = vmatpush.bf16.msra.mxu1 %v6219_v42  ;;  %2585 = vmatpush.bf16.msra.mxu0 %v4839_v47  ;;  %v6224_v47 = vld [vmem:[#allocation59_spill] sm:$0xff]  ;;  %v6241_v42 = vld [vmem:[#allocation60_spill] sm:$0xff] }
 0x6bf   :  { %2507 = vmatpush.bf16.msra.mxu1 %v6220_v30  ;;  %2586 = vmatpush.bf16.msra.mxu0 %v4845_v0  ;;  %v6225_v0 = vld [vmem:[#allocation81_spill] sm:$0xff] }
 0x6c1   :  { %2456 = vmatmul.bf16.vlgmr.msrb.gmra.mxu1 %v2391_v17  ;;  %2470 = vmatmul.bf16.vlgmr.msrb.gmra.mxu2 %v2391_v17 }
 0x6c2   :  { %2484 = vmatmul.bf16.vlgmr.msrb.gmra.mxu3 %v2391_v17  ;;  %2498 = vmatmul.bf16.vlgmr.msrb.gmra.mxu0 %v2391_v17 }
 0x6c3   :  { %2508 = vmatpush.bf16.msra.mxu1 %v6221_v11  ;;  %2587 = vmatpush.bf16.msra.mxu0 %v4854_v38  ;;  %v6228_v38 = vld [vmem:[#allocation103_spill] sm:$0xff]  ;;  %v6242_v11 = vld [vmem:[#allocation62_spill] sm:$0xff] }
 0x6c7   :  { %2509 = vmatpush.bf16.msra.mxu1 %v6222_v33  ;;  %2588 = vmatpush.bf16.msra.mxu0 %v4863_v3  ;;  %v6230_v3 = vld [vmem:[#allocation107_spill] sm:$0xff] }
 0x6cb   :  { %2510 = vmatpush.bf16.msra.mxu1 %v6223_v54  ;;  %2589 = vmatpush.bf16.msra.mxu0 %v4872_v62  ;;  %v6232_v62 = vld [vmem:[#allocation111_spill] sm:$0xff]  ;;  %v6243_v54 = vld [vmem:[#allocation64_spill] sm:$0xff] }
 0x6cf   :  { %2511 = vmatpush.bf16.msra.mxu1 %v6224_v47  ;;  %2590 = vmatpush.bf16.msra.mxu0 %v4883_v28  ;;  %v6234_v28 = vld [vmem:[#allocation114_spill] sm:$0xff] }
 0x6d2   :  { %2512 = vmatmul.bf16.vlgmr.msra.gmra.mxu1 %v2391_v17 }
 0x6d3   :  { %2625 = vmatpush.bf16.msrb.mxu1 %v6225_v0  ;;  %2639 = vmatpush.bf16.msrb.mxu0 %v6226_v2  ;;  %v6244_v0 = vld [vmem:[#allocation67_spill] sm:$0xff] }
 0x6d7   :  { %2626 = vmatpush.bf16.msrb.mxu1 %v6227_v5  ;;  %2640 = vmatpush.bf16.msrb.mxu0 %v6228_v38 }
 0x6db   :  { %2627 = vmatpush.bf16.msrb.mxu1 %v6229_v18  ;;  %2641 = vmatpush.bf16.msrb.mxu0 %v6230_v3 }
 0x6df   :  { %2628 = vmatpush.bf16.msrb.mxu1 %v6231_v44  ;;  %2642 = vmatpush.bf16.msrb.mxu0 %v6232_v62  ;;  %v6245_v44 = vld [vmem:[#allocation61_spill] sm:$0xff] }
 0x6e3   :  { %2629 = vmatpush.bf16.msrb.mxu1 %v6233_v56  ;;  %2643 = vmatpush.bf16.msrb.mxu0 %v6234_v28  ;;  %v6246_v56 = vld [vmem:[#allocation63_spill] sm:$0xff] }
 0x6e7   :  { %2630 = vmatpush.bf16.msrb.mxu1 %v6235_v22  ;;  %2644 = vmatpush.bf16.msrb.mxu0 %v6236_v45 }
 0x6eb   :  { %2631 = vmatpush.bf16.msrb.mxu1 %v6237_v55  ;;  %2645 = vmatpush.bf16.msrb.mxu0 %v6238_v35 }
 0x6ef   :  { %2632 = vmatpush.bf16.msrb.mxu1 %v6239_v4  ;;  %2646 = vmatpush.bf16.msrb.mxu0 %v6240_v24  ;;  %v6247_v4 = vld [vmem:[#allocation70_spill] sm:$0xff] }
 0x72e   :  { %v2401_v12 = vpop.f32.mrf.mxu1 }
 0x72f   :  { %v2443_v25 = vpop.f32.mrf.mxu0  ;;  %v2518_v47 = vmul.f32 %v2401_v12, %v6243_v54 }
 0x730   :  { %v2528_v24 = vmul.f32 %v2443_v25, %v6247_v4  ;;  %v6253_v25 = vld [vmem:[#allocation71_spill] sm:$0xff] }
 0x734   :  { %v2415_v59 = vpop.f32.mrf.mxu2 }
 0x735   :  { %v2429_v29 = vpop.f32.mrf.mxu3  ;;  %v2520_v30 = vmul.f32 %v2415_v59, %v6241_v42  ;;  %v6248_v59 = vld [vmem:[#allocation65_spill] sm:$0xff]  ;;  %v6249_v42 = vld [vmem:[#allocation66_spill] sm:$0xff] }
 0x736   :  { %v2403_v32 = vpop.f32.mrf.mxu1  ;;  %v2524_v62 = vmul.f32 %v2429_v29, %v6245_v44  ;;  %v6252_v29 = vld [vmem:[#allocation73_spill] sm:$0xff] }
 0x737   :  { %v2445_v41 = vpop.f32.mrf.mxu0  ;;  %v2519_v2 = vmul.f32 %v2403_v32, %v6244_v0  ;;  %v2522_v5 = vadd.f32 %v2520_v30, %v2518_v47 }
 0x739   :  { %v2526_v45 = vadd.f32 %v2524_v62, %v2522_v5 }
 0x73b   :  { %v2530_v30 = vadd.f32 %v2528_v24, %v2526_v45  ;;  %v6255_v45 = vld [vmem:[#allocation74_spill] sm:$0xff] }
 0x73c   :  { %v2417_v51 = vpop.f32.mrf.mxu2 }
 0x73d   :  { %v2431_v17 = vpop.f32.mrf.mxu3  ;;  %v2521_v33 = vmul.f32 %v2417_v51, %v6242_v11  ;;  %v2529_v51 = vmul.f32 %v2445_v41, %v6248_v59  ;;  %v6250_v11 = vld [vmem:[#allocation68_spill] sm:$0xff] }
 0x73e   :  { %v2457_v53 = vpop.f32.mrf.mxu1  ;;  %v2525_v28 = vmul.f32 %v2431_v17, %v6246_v56  ;;  %v6254_v41 = vld [vmem:[#allocation72_spill] sm:$0xff] }
 0x73f   :  { %v2523_v38 = vadd.f32 %v2521_v33, %v2519_v2  ;;  %v2499_v35 = vpop.f32.mrf.mxu0  ;;  %v2532_v12 = vmul.f32 %v2457_v53, %v6249_v42  ;;  %v6251_v33 = vld [vmem:[#allocation69_spill] sm:$0xff] }
 0x740   :  { %v2544_v24 = vmul.f32 %v2499_v35, %v6255_v45  ;;  %v6260_v35 = vld [vmem:[#allocation79_spill] sm:$0xff] }
 0x741   :  { %v2527_v55 = vadd.f32 %v2525_v28, %v2523_v38  ;;  %v2534_v17 = vadd.f32 %v2532_v12, %v2530_v30  ;;  %v6258_v30 = vld [vmem:[#allocation77_spill] sm:$0xff] }
 0x743   :  { %v2531_v47 = vadd.f32 %v2529_v51, %v2527_v55  ;;  %v6257_v51 = vld [vmem:[#allocation76_spill] sm:$0xff] }
 0x744   :  { %v2471_v18 = vpop.f32.mrf.mxu2 }
 0x745   :  { %v2485_v3 = vpop.f32.mrf.mxu3  ;;  %v2536_v54 = vmul.f32 %v2471_v18, %v6251_v33  ;;  %v6256_v18 = vld [vmem:[#allocation75_spill] sm:$0xff] }
 0x746   :  { %v2459_v22 = vpop.f32.mrf.mxu1  ;;  %v2540_v28 = vmul.f32 %v2485_v3, %v6253_v25  ;;  %v6259_v3 = vld [vmem:[#allocation78_spill] sm:$0xff]  ;;  %v6268_v25 = vld [vmem:[#allocation104_spill] sm:$0xff] }
 0x747   :  { %v2533_v32 = vmul.f32 %v2459_v22, %v6250_v11  ;;  %v2538_v62 = vadd.f32 %v2536_v54, %v2534_v17  ;;  %v2501_v53 = vpop.f32.mrf.mxu0  ;;  %v6262_v17 = vld [vmem:[#allocation82_spill] sm:$0xff] }
 0x748   :  { %v2545_v55 = vmul.f32 %v2501_v53, %v6256_v18  ;;  %v6272_v53 = vld [vmem:[#allocation118_spill] sm:$0xff] }
 0x749   :  { %v2535_v44 = vadd.f32 %v2533_v32, %v2531_v47  ;;  %v2542_v59 = vadd.f32 %v2540_v28, %v2538_v62  ;;  %v6266_v62 = vld [vmem:[#allocation91_spill] sm:$0xff]  ;;  %v6269_v28 = vld [vmem:[#allocation108_spill] sm:$0xff] }
 0x74b   :  { %v2546_v12 = vadd.f32 %v2544_v24, %v2542_v59  ;;  %v6273_v59 = vld [vmem:[#allocation121_spill] sm:$0xff] }
 0x74c   :  { %v2473_v0 = vpop.f32.mrf.mxu2 }
 0x74d   :  { %v2537_v2 = vmul.f32 %v2473_v0, %v6252_v29  ;;  %v2487_v5 = vpop.f32.mrf.mxu3  ;;  %v4241_v29 = vld [vmem:[%s5740_s3] sm:$0xff] }
 0x74e   :  { %v2541_v4 = vmul.f32 %v2487_v5, %v6254_v41  ;;  %v6264_v5 = vld [vmem:[#allocation86_spill] sm:$0xff]  ;;  %v6270_v41 = vld [vmem:[#allocation112_spill] sm:$0xff] }
 0x74f   :  { %v2513_v38 = vpop.f32.mrf.mxu1  ;;  %v2539_v56 = vadd.f32 %v2537_v2, %v2535_v44  ;;  %v6261_v2 = vld [vmem:[#allocation80_spill] sm:$0xff] }
 0x750   :  { %v2548_v42 = vmul.f32 %v2513_v38, %v6257_v51  ;;  %v6263_v44 = vld [vmem:[#allocation84_spill] sm:$0xff]  ;;  %v4242_v51 = vld [vmem:[%s5743_s6] sm:$0xff] }
 0x751   :  { %v2543_v22 = vadd.f32 %v2541_v4, %v2539_v56  ;;  %v6265_v38 = vld [vmem:[#allocation88_spill] sm:$0xff]  ;;  %v6267_v56 = vld [vmem:[#allocation93_spill] sm:$0xff]  ;;  %v6271_v4 = vld [vmem:[#allocation115_spill] sm:$0xff] }
 0x752   :  { %v2550_v54 = vadd.f32 %v2548_v42, %v2546_v12  ;;  %v6276_v42 = vld [vmem:[#allocation94_spill] sm:$0xff]  ;;  %v6278_v12 = vld [vmem:[#allocation96_spill] sm:$0xff] }
 0x753   :  { %v2547_v32 = vadd.f32 %v2545_v55, %v2543_v22  ;;  %v6274_v22 = vld [vmem:[#allocation124_spill] sm:$0xff]  ;;  %v6275_v55 = vld [vmem:[#allocation89_spill] sm:$0xff] }
 0x757   :  { %v2515_v11 = vpop.f32.mrf.mxu1 }
 0x758   :  { %v2549_v33 = vmul.f32 %v2515_v11, %v6258_v30  ;;  %v6277_v11 = vld [vmem:[#allocation95_spill] sm:$0xff]  ;;  %v6280_v30 = vld [vmem:[#allocation98_spill] sm:$0xff] }
 0x75a   :  { %v2551_v47 = vadd.f32 %v2549_v33, %v2547_v32  ;;  %v6279_v32 = vld [vmem:[#allocation97_spill] sm:$0xff]  ;;  %v6281_v33 = vld [vmem:[#allocation99_spill] sm:$0xff] }
 0x75c   :  { %v2552_v0 = vpack.c.bf16 %v2551_v47, %v2550_v54  ;;  %v6282_v54 = vld [vmem:[#allocation100_spill] sm:$0xff]  ;;  %v6283_v47 = vld [vmem:[#allocation101_spill] sm:$0xff] }
 0x75e   :  { %2560 = vmatpush.bf16.msra.mxu2 %v2552_v0  ;;  %v6284_v0 = vld [vmem:[#allocation105_spill] sm:$0xff] }
 0x761   :  { %3912 = vmatmul.msk.bf16.vlgmr.msra.gmra.mxu2 %vm145_vm0, %v4241_v29  ;;  %v6286_v29 = vld [vmem:[#allocation113_spill] sm:$0xff] }
 0x762   :  { %2597 = vmatpush.bf16.msrb.mxu2 %v6259_v3  ;;  %v6285_v3 = vld [vmem:[#allocation109_spill] sm:$0xff] }
 0x766   :  { %2598 = vmatpush.bf16.msrb.mxu2 %v6260_v35  ;;  %v6287_v35 = vld [vmem:[#allocation116_spill] sm:$0xff] }
 0x76a   :  { %2599 = vmatpush.bf16.msrb.mxu2 %v6261_v2  ;;  %v6288_v2 = vld [vmem:[#allocation119_spill] sm:$0xff] }
 0x76e   :  { %2600 = vmatpush.bf16.msrb.mxu2 %v6262_v17  ;;  %v6289_v17 = vld [vmem:[#allocation122_spill] sm:$0xff] }
 0x772   :  { %2601 = vmatpush.bf16.msrb.mxu2 %v6263_v44  ;;  %v6290_v44 = vld [vmem:[#allocation125_spill] sm:$0xff] }
 0x776   :  { %2602 = vmatpush.bf16.msrb.mxu2 %v6264_v5 }
 0x77a   :  { %2603 = vmatpush.bf16.msrb.mxu2 %v6265_v38 }
 0x77e   :  { %2604 = vmatpush.bf16.msrb.mxu2 %v6266_v62 }
 0x782   :  { %2653 = vmatpush.bf16.msra.mxu2 %v6267_v56  ;;  %v6291_v56 = vld [vmem:[#allocation143_spill] sm:$0xff] }
 0x786   :  { %2654 = vmatpush.bf16.msra.mxu2 %v6268_v25  ;;  %v6292_v25 = vld [vmem:[#allocation144_spill] sm:$0xff] }
 0x78a   :  { %2655 = vmatpush.bf16.msra.mxu2 %v6269_v28  ;;  %v6293_v28 = vld [vmem:[#allocation146_spill] sm:$0xff] }
 0x78e   :  { %2656 = vmatpush.bf16.msra.mxu2 %v6270_v41  ;;  %v6294_v41 = vld [vmem:[#allocation147_spill] sm:$0xff] }
 0x792   :  { %2657 = vmatpush.bf16.msra.mxu2 %v6271_v4  ;;  %v6295_v4 = vld [vmem:[#allocation149_spill] sm:$0xff] }
 0x796   :  { %2658 = vmatpush.bf16.msra.mxu2 %v6272_v53  ;;  %v6300_v53 = vld [vmem:[#allocation167_spill] sm:$0xff] }
 0x79a   :  { %2659 = vmatpush.bf16.msra.mxu2 %v6273_v59  ;;  %v6301_v59 = vld [vmem:[#allocation168_spill] sm:$0xff] }
 0x79e   :  { %2660 = vmatpush.bf16.msra.mxu2 %v6274_v22  ;;  %v6302_v22 = vld [vmem:[#allocation175_spill] sm:$0xff] }
 0x7e4   :  { %v2562_v45 = vpop.f32.mrf.mxu2 }
 0x7ec   :  { %v2564_v24 = vpop.f32.mrf.mxu2 }
 0x7ed   :  { %v2567_v18 = vpack.c.bf16 %v2564_v24, %v2562_v45  ;;  %v6303_v45 = vld [vmem:[#allocation177_spill] sm:$0xff] }
 0x7ee   :  { %v6304_v24 = vld [vmem:[#allocation181_spill] sm:$0xff] }
 0x7ef   :  { %2575 = vmatpush.bf16.msra.mxu3 %v2567_v18 }
 0x7f2   :  { %3913 = vmatmul.msk.bf16.vlgmr.msra.gmra.mxu3 %vm145_vm0, %v4242_v51 }
 0x7f3   :  { %2611 = vmatpush.bf16.msrb.mxu3 %v6275_v55 }
 0x7f7   :  { %2612 = vmatpush.bf16.msrb.mxu3 %v6276_v42 }
 0x7fb   :  { %2613 = vmatpush.bf16.msrb.mxu3 %v6277_v11 }
 0x7ff   :  { %2614 = vmatpush.bf16.msrb.mxu3 %v6278_v12  ;;  %v6305_v12 = vld [vmem:[#allocation127_spill] sm:$0xff] }
 0x803   :  { %2615 = vmatpush.bf16.msrb.mxu3 %v6279_v32 }
 0x807   :  { %2616 = vmatpush.bf16.msrb.mxu3 %v6280_v30 }
 0x80b   :  { %2617 = vmatpush.bf16.msrb.mxu3 %v6281_v33 }
 0x80f   :  { %2618 = vmatpush.bf16.msrb.mxu3 %v6282_v54  ;;  %v6306_v54 = vld [vmem:[#allocation126_spill] sm:$0xff] }
 0x813   :  { %2667 = vmatpush.bf16.msra.mxu3 %v6283_v47  ;;  %v6307_v47 = vld [vmem:[#allocation133_spill] sm:$0xff] }
 0x817   :  { %2668 = vmatpush.bf16.msra.mxu3 %v6284_v0 }
 0x81b   :  { %2669 = vmatpush.bf16.msra.mxu3 %v6285_v3 }
 0x81f   :  { %2670 = vmatpush.bf16.msra.mxu3 %v6286_v29 }
 0x823   :  { %2671 = vmatpush.bf16.msra.mxu3 %v6287_v35 }
 0x827   :  { %2672 = vmatpush.bf16.msra.mxu3 %v6288_v2 }
 0x82b   :  { %2673 = vmatpush.bf16.msra.mxu3 %v6289_v17  ;;  %v6310_v17 = vld [vmem:[#allocation129_spill] sm:$0xff] }
 0x82f   :  { %2674 = vmatpush.bf16.msra.mxu3 %v6290_v44 }
 0x875   :  { %v2577_v5 = vpop.f32.mrf.mxu3 }
 0x87d   :  { %v2579_v38 = vpop.f32.mrf.mxu3 }
 0x87e   :  { %v2582_v62 = vpack.c.bf16 %v2579_v38, %v2577_v5 }
 0x880   :  { %2591 = vmatmul.bf16.vlgmr.msra.gmra.mxu0 %v2582_v62  ;;  %2605 = vmatmul.bf16.vlgmr.msrb.gmra.mxu2 %v2582_v62 }
 0x881   :  { %2619 = vmatmul.bf16.vlgmr.msrb.gmra.mxu3 %v2582_v62  ;;  %2633 = vmatmul.bf16.vlgmr.msrb.gmra.mxu1 %v2582_v62 }
 0x882   :  { %2750 = vmatpush.bf16.msrb.mxu2 %v5089_v16  ;;  %2763 = vmatpush.bf16.msrb.mxu3 %v5091_v40  ;;  %v6296_v16 = vld [vmem:[#allocation151_spill] sm:$0xff]  ;;  %v6297_v40 = vld [vmem:[#allocation152_spill] sm:$0xff] }
 0x886   :  { %2751 = vmatpush.bf16.msrb.mxu2 %v5095_v34  ;;  %2764 = vmatpush.bf16.msrb.mxu3 %v5100_v13  ;;  %v6298_v34 = vld [vmem:[#allocation155_spill] sm:$0xff]  ;;  %v6299_v13 = vld [vmem:[#allocation157_spill] sm:$0xff] }
 0x88a   :  { %2752 = vmatpush.bf16.msrb.mxu2 %v6291_v56  ;;  %2765 = vmatpush.bf16.msrb.mxu3 %v6292_v25  ;;  %v6311_v56 = vld [vmem:[#allocation132_spill] sm:$0xff] }
 0x88e   :  { %2753 = vmatpush.bf16.msrb.mxu2 %v6293_v28  ;;  %2766 = vmatpush.bf16.msrb.mxu3 %v6294_v41  ;;  %v6312_v41 = vld [vmem:[#allocation136_spill] sm:$0xff] }
 0x890   :  { %2647 = vmatmul.bf16.vlgmr.msrb.gmra.mxu0 %v2582_v62  ;;  %2661 = vmatmul.bf16.vlgmr.msra.gmra.mxu2 %v2582_v62 }
 0x891   :  { %2675 = vmatmul.bf16.vlgmr.msra.gmra.mxu3 %v2582_v62 }
 0x892   :  { %2754 = vmatpush.bf16.msrb.mxu2 %v6295_v4  ;;  %2767 = vmatpush.bf16.msrb.mxu3 %v5124_v36 }
 0x896   :  { %2755 = vmatpush.bf16.msrb.mxu2 %v6296_v16  ;;  %2768 = vmatpush.bf16.msrb.mxu3 %v6297_v40  ;;  %v6313_v16 = vld [vmem:[#allocation131_spill] sm:$0xff] }
 0x89a   :  { %2756 = vmatpush.bf16.msrb.mxu2 %v6298_v34  ;;  %2769 = vmatpush.bf16.msrb.mxu3 %v6299_v13  ;;  %v6314_v13 = vld [vmem:[#allocation135_spill] sm:$0xff] }
 0x89e   :  { %2757 = vmatpush.bf16.msrb.mxu2 %v6300_v53  ;;  %2770 = vmatpush.bf16.msrb.mxu3 %v6301_v59  ;;  %v6315_v59 = vld [vmem:[#allocation134_spill] sm:$0xff] }
 0x8a2   :  { %2830 = vmatpush.bf16.msra.mxu3 %v6302_v22 }
 0x8a6   :  { %2831 = vmatpush.bf16.msra.mxu3 %v6303_v45 }
 0x8aa   :  { %2832 = vmatpush.bf16.msra.mxu3 %v6304_v24 }
 0x8ae   :  { %2833 = vmatpush.bf16.msra.mxu3 %v5239_v50 }
 0x8b2   :  { %2834 = vmatpush.bf16.msra.mxu3 %v5252_v63 }
 0x8b6   :  { %2835 = vmatpush.bf16.msra.mxu3 %v5266_v31  ;;  %v6308_v31 = vld [vmem:[#allocation128_spill] sm:$0xff] }
 0x8ba   :  { %2836 = vmatpush.bf16.msra.mxu3 %v5273_v49  ;;  %v6309_v49 = vld [vmem:[#allocation130_spill] sm:$0xff] }
 0x8be   :  { %2837 = vmatpush.bf16.msra.mxu3 %v5278_v14 }
 0x8fd   :  { %v2592_v36 = vpop.f32.mrf.mxu0 }
 0x8fe   :  { %v2634_v42 = vpop.f32.mrf.mxu1  ;;  %v2681_v50 = vmul.f32 %v2592_v36, %v6306_v54  ;;  %v6318_v54 = vld [vmem:[#allocation139_spill] sm:$0xff] }
 0x8ff   :  { %v2691_v25 = vmul.f32 %v2634_v42, %v6311_v56  ;;  %v6331_v56 = vld [vmem:[#allocation171_spill] sm:$0xff] }
 0x903   :  { %v2606_v18 = vpop.f32.mrf.mxu2 }
 0x904   :  { %v2620_v55 = vpop.f32.mrf.mxu3  ;;  %v2683_v32 = vmul.f32 %v2606_v18, %v6305_v12 }
 0x905   :  { %v2594_v51 = vpop.f32.mrf.mxu0  ;;  %v2687_v29 = vmul.f32 %v2620_v55, %v6309_v49  ;;  %v6321_v49 = vld [vmem:[#allocation142_spill] sm:$0xff] }
 0x906   :  { %v2685_v0 = vadd.f32 %v2683_v32, %v2681_v50  ;;  %v2682_v3 = vmul.f32 %v2594_v51, %v6308_v31  ;;  %v2636_v38 = vpop.f32.mrf.mxu1  ;;  %v6316_v51 = vld [vmem:[#allocation137_spill] sm:$0xff]  ;;  %v6317_v32 = vld [vmem:[#allocation138_spill] sm:$0xff] }
 0x907   :  { %v2692_v40 = vmul.f32 %v2636_v38, %v6313_v16  ;;  %v4243_v31 = vld [vmem:[%s5744_s7] sm:$0xff]  ;;  %v6329_v38 = vld [vmem:[#allocation162_spill] sm:$0xff] }
 0x908   :  { %v2689_v2 = vadd.f32 %v2687_v29, %v2685_v0  ;;  %v6319_v0 = vld [vmem:[#allocation140_spill] sm:$0xff]  ;;  %v6322_v29 = vld [vmem:[#allocation145_spill] sm:$0xff] }
 0x90a   :  { %v2693_v34 = vadd.f32 %v2691_v25, %v2689_v2  ;;  %v6325_v2 = vld [vmem:[#allocation153_spill] sm:$0xff]  ;;  %v6332_v25 = vld [vmem:[#allocation172_spill] sm:$0xff] }
 0x90b   :  { %v2608_v11 = vpop.f32.mrf.mxu2 }
 0x90c   :  { %v2622_v30 = vpop.f32.mrf.mxu3  ;;  %v2684_v63 = vmul.f32 %v2608_v11, %v6307_v47 }
 0x90d   :  { %v2648_v33 = vpop.f32.mrf.mxu0  ;;  %v2688_v44 = vmul.f32 %v2622_v30, %v6310_v17  ;;  %v6326_v17 = vld [vmem:[#allocation156_spill] sm:$0xff] }
 0x90e   :  { %v2686_v14 = vadd.f32 %v2684_v63, %v2682_v3  ;;  %v2695_v4 = vmul.f32 %v2648_v33, %v6312_v41  ;;  %v6320_v3 = vld [vmem:[#allocation141_spill] sm:$0xff]  ;;  %v6334_v41 = vld [vmem:[#allocation174_spill] sm:$0xff] }
 0x910   :  { %v2690_v28 = vadd.f32 %v2688_v44, %v2686_v14  ;;  %v2697_v45 = vadd.f32 %v2695_v4, %v2693_v34  ;;  %v6323_v14 = vld [vmem:[#allocation148_spill] sm:$0xff]  ;;  %v6327_v44 = vld [vmem:[#allocation158_spill] sm:$0xff] }
 0x911   :  { %v6335_v34 = vld [vmem:[#allocation154_spill] sm:$0xff] }
 0x912   :  { %v2694_v24 = vadd.f32 %v2692_v40, %v2690_v28  ;;  %v6333_v28 = vld [vmem:[#allocation173_spill] sm:$0xff] }
 0x913   :  { %v2662_v35 = vpop.f32.mrf.mxu2 }
 0x914   :  { %v2676_v5 = vpop.f32.mrf.mxu3  ;;  %v2699_v53 = vmul.f32 %v2662_v35, %v6314_v13  ;;  %v6324_v35 = vld [vmem:[#allocation150_spill] sm:$0xff]  ;;  %v4244_v13 = vld [vmem:[%s5747_s10] sm:$0xf] }
 0x915   :  { %v2650_v62 = vpop.f32.mrf.mxu0  ;;  %v2703_v42 = vmul.f32 %v2676_v5, %v6317_v32  ;;  %v6328_v5 = vld [vmem:[#allocation160_spill] sm:$0xff] }
 0x916   :  { %v2696_v22 = vmul.f32 %v2650_v62, %v6315_v59  ;;  %v2701_v18 = vadd.f32 %v2699_v53, %v2697_v45  ;;  %v6330_v62 = vld [vmem:[#allocation170_spill] sm:$0xff]  ;;  %v6336_v53 = vld [vmem:[#allocation159_spill] sm:$0xff]  ;;  %v6337_v59 = vld [vmem:[#allocation161_spill] sm:$0xff] }
 0x917   :  { %v6339_v45 = vld [vmem:[#allocation164_spill] sm:$0xff] }
 0x918   :  { %v2698_v55 = vadd.f32 %v2696_v22, %v2694_v24  ;;  %v2705_v50 = vadd.f32 %v2703_v42, %v2701_v18  ;;  %v6338_v22 = vld [vmem:[#allocation163_spill] sm:$0xff]  ;;  %v6340_v24 = vld [vmem:[#allocation165_spill] sm:$0xff]  ;;  %v6346_v42 = vld [vmem:[#allocation182_spill] sm:$0xff] }
 0x919   :  { %v6342_v18 = vld [vmem:[#allocation169_spill] sm:$0xff] }
 0x91b   :  { %v2664_v36 = vpop.f32.mrf.mxu2 }
 0x91c   :  { %v2700_v11 = vmul.f32 %v2664_v36, %v6316_v51  ;;  %v2678_v12 = vpop.f32.mrf.mxu3  ;;  %v6341_v36 = vld [vmem:[#allocation166_spill] sm:$0xff]  ;;  %v6344_v51 = vld [vmem:[#allocation179_spill] sm:$0xff] }
 0x91d   :  { %v2704_v33 = vmul.f32 %v2678_v12, %v6318_v54  ;;  %v6352_v54 = vld [vmem:[#allocation187_spill] sm:$0xff] }
 0x91e   :  { %v2702_v30 = vadd.f32 %v2700_v11, %v2698_v55  ;;  %v6343_v55 = vld [vmem:[#allocation178_spill] sm:$0xff]  ;;  %v6345_v11 = vld [vmem:[#allocation201_spill] sm:$0xff] }
 0x920   :  { %v2706_v47 = vadd.f32 %v2704_v33, %v2702_v30  ;;  %v6347_v30 = vld [vmem:[#allocation190_spill] sm:$0xff]  ;;  %v6353_v33 = vld [vmem:[#allocation203_spill] sm:$0xff] }
 0x922   :  { %v2707_v63 = vpack.c.bf16 %v2706_v47, %v2705_v50  ;;  %v6358_v50 = vld [vmem:[#allocation206_spill] sm:$0xff] }
 0x924   :  { %2715 = vmatpush.bf16.msra.mxu1 %v2707_v63 }
 0x927   :  { %3914 = vmatmul.msk.bf16.vlgmr.msra.gmra.mxu1 %vm145_vm0, %v4243_v31 }
 0x928   :  { %2737 = vmatpush.bf16.msrb.mxu1 %v6319_v0 }
 0x92c   :  { %2738 = vmatpush.bf16.msrb.mxu1 %v6320_v3 }
 0x930   :  { %2739 = vmatpush.bf16.msrb.mxu1 %v6321_v49 }
 0x934   :  { %2740 = vmatpush.bf16.msrb.mxu1 %v6322_v29 }
 0x938   :  { %2741 = vmatpush.bf16.msrb.mxu1 %v6323_v14 }
 0x93c   :  { %2742 = vmatpush.bf16.msrb.mxu1 %v6324_v35 }
 0x940   :  { %2743 = vmatpush.bf16.msrb.mxu1 %v6325_v2  ;;  %v6362_v2 = vld [vmem:[#allocation186_spill] sm:$0xff] }
 0x944   :  { %2744 = vmatpush.bf16.msrb.mxu1 %v6326_v17 }
 0x948   :  { %2789 = vmatpush.bf16.msra.mxu1 %v6327_v44 }
 0x94c   :  { %2790 = vmatpush.bf16.msra.mxu1 %v6328_v5 }
 0x950   :  { %2791 = vmatpush.bf16.msra.mxu1 %v6329_v38  ;;  %v6363_v38 = vld [vmem:[#allocation188_spill] sm:$0xff] }
 0x954   :  { %2792 = vmatpush.bf16.msra.mxu1 %v6330_v62 }
 0x958   :  { %2793 = vmatpush.bf16.msra.mxu1 %v6331_v56 }
 0x95c   :  { %2794 = vmatpush.bf16.msra.mxu1 %v6332_v25 }
 0x960   :  { %2795 = vmatpush.bf16.msra.mxu1 %v6333_v28 }
 0x964   :  { %2796 = vmatpush.bf16.msra.mxu1 %v6334_v41 }
 0x9a4   :  { %v2717_v4 = vpop.f32.mrf.mxu1 }
 0x9ac   :  { %v2719_v16 = vpop.f32.mrf.mxu1 }
 0x9ad   :  { %v2722_v40 = vpack.c.bf16 %v2719_v16, %v2717_v4  ;;  %v6364_v4 = vld [vmem:[#allocation189_spill] sm:$0xff] }
 0x9ae   :  { %v4245_v16 = vld [vmem:[%s5748_s11] sm:$0xff] }
 0x9af   :  { %2730 = vmatpush.bf16.msra.mxu0 %v2722_v40  ;;  %v6365_v40 = vld [vmem:[#allocation191_spill] sm:$0xff] }
 0x9b2   :  { %3915 = vmatmul.msk.bf16.vlgmr.msra.gmra.mxu0 %vm145_vm0, %v4244_v13  ;;  %v6367_v13 = vld [vmem:[#allocation193_spill] sm:$0xff] }
 0x9b3   :  { %2776 = vmatpush.bf16.msrb.mxu0 %v6335_v34  ;;  %v6366_v34 = vld [vmem:[#allocation192_spill] sm:$0xff] }
 0x9b7   :  { %2777 = vmatpush.bf16.msrb.mxu0 %v6336_v53  ;;  %v6368_v53 = vld [vmem:[#allocation194_spill] sm:$0xff] }
 0x9bb   :  { %2778 = vmatpush.bf16.msrb.mxu0 %v6337_v59  ;;  %v6369_v59 = vld [vmem:[#allocation195_spill] sm:$0xff] }
 0x9bf   :  { %2779 = vmatpush.bf16.msrb.mxu0 %v6338_v22  ;;  %v6370_v22 = vld [vmem:[#allocation198_spill] sm:$0xff] }
 0x9c3   :  { %2780 = vmatpush.bf16.msrb.mxu0 %v6339_v45  ;;  %v6371_v45 = vld [vmem:[#allocation202_spill] sm:$0xff] }
 0x9c7   :  { %2781 = vmatpush.bf16.msrb.mxu0 %v6340_v24 }
 0x9cb   :  { %2782 = vmatpush.bf16.msrb.mxu0 %v6341_v36 }
 0x9cf   :  { %2783 = vmatpush.bf16.msrb.mxu0 %v6342_v18 }
 0x9d3   :  { %2844 = vmatpush.bf16.msra.mxu0 %v6343_v55 }
 0x9d7   :  { %2845 = vmatpush.bf16.msra.mxu0 %v6344_v51 }
 0x9db   :  { %2846 = vmatpush.bf16.msra.mxu0 %v5234_v26 }
 0x9df   :  { %2847 = vmatpush.bf16.msra.mxu0 %v5249_v60  ;;  %v6348_v60 = vld [vmem:[#allocation183_spill] sm:$0xff] }
 0x9e3   :  { %2848 = vmatpush.bf16.msra.mxu0 %v5261_v48  ;;  %v6349_v48 = vld [vmem:[#allocation196_spill] sm:$0xff] }
 0x9e7   :  { %2849 = vmatpush.bf16.msra.mxu0 %v5302_v9  ;;  %v6350_v9 = vld [vmem:[#allocation185_spill] sm:$0xff] }
 0x9eb   :  { %2850 = vmatpush.bf16.msra.mxu0 %v5313_v58  ;;  %v6351_v58 = vld [vmem:[#allocation199_spill] sm:$0xff] }
 0x9ef   :  { %2851 = vmatpush.bf16.msra.mxu0 %v6345_v11 }
 0xa2f   :  { %v2732_v12 = vpop.f32.mrf.mxu0 }
 0xa30   :  { %v2736_v32 = vpack.c.bf16 %v2732_v12, %v2732_v12 }
 0xa32   :  { %2745 = vmatmul.bf16.vlgmr.msrb.gmra.mxu1 %v2736_v32  ;;  %2758 = vmatmul.bf16.vlgmr.msrb.gmra.mxu2 %v2736_v32 }
 0xa33   :  { %2771 = vmatmul.bf16.vlgmr.msrb.gmra.mxu3 %v2736_v32  ;;  %2784 = vmatmul.bf16.vlgmr.msrb.gmra.mxu0 %v2736_v32 }
 0xa34   :  { %2872 = vmatpush.bf16.msrb.mxu1 %v6346_v42  ;;  %2886 = vmatpush.bf16.msrb.mxu3 %v6347_v30 }
 0xa35   :  { %2900 = vmatpush.bf16.msrb.mxu0 %v5342_v52  ;;  %v6354_v52 = vld [vmem:[#allocation197_spill] sm:$0xff] }
 0xa37   :  { %v2734_v26 = vpop.f32.mrf.mxu0 }
 0xa38   :  { %2873 = vmatpush.bf16.msrb.mxu1 %v6348_v60  ;;  %2887 = vmatpush.bf16.msrb.mxu3 %v6349_v48 }
 0xa39   :  { %2901 = vmatpush.bf16.msrb.mxu0 %v5349_v8  ;;  %v6355_v8 = vld [vmem:[#allocation200_spill] sm:$0xff] }
 0xa3c   :  { %2874 = vmatpush.bf16.msrb.mxu1 %v6350_v9  ;;  %2888 = vmatpush.bf16.msrb.mxu3 %v6351_v58 }
 0xa3d   :  { %2902 = vmatpush.bf16.msrb.mxu0 %v5357_v57  ;;  %v6356_v57 = vld [vmem:[#allocation204_spill] sm:$0xff] }
 0xa40   :  { %2875 = vmatpush.bf16.msrb.mxu1 %v6352_v54  ;;  %2889 = vmatpush.bf16.msrb.mxu3 %v6353_v33 }
 0xa41   :  { %2903 = vmatpush.bf16.msrb.mxu0 %v5366_v61  ;;  %v6357_v61 = vld [vmem:[#allocation205_spill] sm:$0xff] }
 0xa42   :  { %2797 = vmatmul.bf16.vlgmr.msra.gmra.mxu1 %v2736_v32 }
 0xa44   :  { %2876 = vmatpush.bf16.msrb.mxu1 %v6354_v52  ;;  %2890 = vmatpush.bf16.msrb.mxu3 %v5338_v37 }
 0xa45   :  { %2904 = vmatpush.bf16.msrb.mxu0 %v5369_v21 }
 0xa48   :  { %2877 = vmatpush.bf16.msrb.mxu1 %v6355_v8  ;;  %2891 = vmatpush.bf16.msrb.mxu3 %v5345_v23  ;;  %v6359_v23 = vld [vmem:[#allocation176_spill] sm:$0xff]  ;;  %v6372_v8 = vld [vmem:[#allocation31_spill] sm:$0xff] }
 0xa49   :  { %2905 = vmatpush.bf16.msrb.mxu0 %v5373_v27  ;;  %v6360_v27 = vld [vmem:[#allocation180_spill] sm:$0xff] }
 0xa4c   :  { %2878 = vmatpush.bf16.msrb.mxu1 %v6356_v57  ;;  %2892 = vmatpush.bf16.msrb.mxu3 %v5354_v46 }
 0xa4d   :  { %2906 = vmatpush.bf16.msrb.mxu0 %v5377_v6  ;;  %v6361_v6 = vld [vmem:[#allocation184_spill] sm:$0xff] }
 0xa50   :  { %2879 = vmatpush.bf16.msrb.mxu1 %v6357_v61  ;;  %2893 = vmatpush.bf16.msrb.mxu3 %v6358_v50  ;;  %v6373_v61 = vld [vmem:[#allocation20_spill] sm:$0xff] }
 0xa51   :  { %2907 = vmatpush.bf16.msrb.mxu0 %v5381_v15 }
 0xa53   :  { %2880 = vmatmul.bf16.vlgmr.msrb.gmra.mxu1 %v5481_v20 }
 0xaaf   :  { %v2746_v37 = vpop.f32.mrf.mxu1 }
 0xab0   :  { %v2785_v21 = vpop.f32.mrf.mxu0  ;;  %v2802_v63 = vmul.f32 %v2746_v37, %v6359_v23 }
 0xab1   :  { %v2807_v17 = vmul.f32 %v2785_v21, %v6362_v2 }
 0xab5   :  { %v2759_v47 = vpop.f32.mrf.mxu2 }
 0xab6   :  { %v2803_v0 = vmul.f32 %v2759_v47, %v6360_v27  ;;  %v2772_v31 = vpop.f32.mrf.mxu3 }
 0xab7   :  { %v2748_v3 = vpop.f32.mrf.mxu1  ;;  %v2805_v29 = vmul.f32 %v2772_v31, %v6361_v6 }
 0xab8   :  { %v2804_v46 = vadd.f32 %v2803_v0, %v2802_v63  ;;  %v2787_v49 = vpop.f32.mrf.mxu0 }
 0xaba   :  { %v2806_v14 = vadd.f32 %v2805_v29, %v2804_v46 }
 0xabc   :  { %v2808_v5 = vadd.f32 %v2807_v17, %v2806_v14 }
 0xabd   :  { %v2761_v35 = vpop.f32.mrf.mxu2 }
 0xabe   :  { %v2774_v15 = vpop.f32.mrf.mxu3 }
 0xabf   :  { %v2798_v44 = vpop.f32.mrf.mxu1 }
 0xac0   :  { %v2809_v62 = vmul.f32 %v2798_v44, %v6363_v38 }
 0xac2   :  { %v2810_v56 = vadd.f32 %v2809_v62, %v2808_v5 }
 0xac4   :  { %v2811_v25 = vpack.c.bf16 %v2810_v56, %v2810_v56 }
 0xac6   :  { %v2813_v28 = vsel %vm1843_vm1, %v2811_v25, 0 }
 0xac7   :  { %v2800_v41 = vpop.f32.mrf.mxu1  ;;  %2822 = vmatpush.bf16.msra.mxu2 %v2813_v28 }
 0xaca   :  { %3916 = vmatmul.msk.bf16.vlgmr.msra.gmra.mxu2 %vm1839_vm2, %v4245_v16 }
 0xacb   :  { %2858 = vmatpush.bf16.msrb.mxu2 %v6364_v4 }
 0xacf   :  { %2859 = vmatpush.bf16.msrb.mxu2 %v6365_v40 }
 0xad0   :  { %v2881_v55 = vpop.f32.mrf.mxu1 }
 0xad1   :  { %v2882_v11 = vadd.f32 %v2881_v55, %v5431_v7 }
 0xad3   :  { %2860 = vmatpush.bf16.msrb.mxu2 %v6366_v34 }
 0xad7   :  { %2861 = vmatpush.bf16.msrb.mxu2 %v6367_v13 }
 0xad8   :  { %v2883_v30 = vpop.f32.mrf.mxu1 }
 0xad9   :  { %v2884_v60 = vadd.f32 %v2883_v30, %v5431_v7 }
 0xadb   :  { %2862 = vmatpush.bf16.msrb.mxu2 %v6368_v53 }
 0xadf   :  { %2863 = vmatpush.bf16.msrb.mxu2 %v6369_v59 }
 0xae3   :  { %2864 = vmatpush.bf16.msrb.mxu2 %v6370_v22 }
 0xae7   :  { %2865 = vmatpush.bf16.msrb.mxu2 %v6371_v45 }
 0xb4d   :  { %v2824_v24 = vpop.f32.mrf.mxu2 }
 0xb55   :  { %v2826_v36 = vpop.f32.mrf.mxu2 }
 0xb56   :  { %v2829_v18 = vpack.c.bf16 %v2826_v36, %v2824_v24 }
 0xb58   :  { %2838 = vmatmul.bf16.vlgmr.msra.gmra.mxu3 %v2829_v18  ;;  %2852 = vmatmul.bf16.vlgmr.msra.gmra.mxu0 %v2829_v18 }
 0xb59   :  { %2866 = vmatmul.bf16.vlgmr.msrb.gmra.mxu2 %v2829_v18 }
 0xb68   :  { %2894 = vmatmul.bf16.vlgmr.msrb.gmra.mxu3 %v5481_v20  ;;  %2908 = vmatmul.bf16.vlgmr.msrb.gmra.mxu0 %v5481_v20 }
 0xbd5   :  { %v2853_v48 = vpop.f32.mrf.mxu0 }
 0xbd6   :  { %v2854_v57 = vadd.f32 %v2853_v48, %v6372_v8 }
 0xbdb   :  { %v2839_v51 = vpop.f32.mrf.mxu3 }
 0xbdc   :  { %v2840_v12 = vadd.f32 %v2839_v51, %v5439_v39  ;;  %v2867_v56 = vpop.f32.mrf.mxu2 }
 0xbdd   :  { %v2855_v37 = vpop.f32.mrf.mxu0  ;;  %v2868_v22 = vadd.f32 %v2867_v56, %v5464_v1 }
 0xbde   :  { %v2914_v32 = vadd.f32 %v2882_v11, %v2840_v12  ;;  %v2856_v0 = vadd.f32 %v2855_v37, %v6372_v8 }
 0xbe0   :  { %v3917_v42 = vmul.f32 -1.442695, %v2914_v32 }
 0xbe2   :  { %4218 = vpow2.f32 %v3917_v42 }
 0xbe3   :  { %v2841_v26 = vpop.f32.mrf.mxu3 }
 0xbe4   :  { %v2842_v9 = vadd.f32 %v2841_v26, %v5439_v39  ;;  %v2869_v30 = vpop.f32.mrf.mxu2 }
 0xbe5   :  { %v2909_v35 = vpop.f32.mrf.mxu0 }
 0xbe6   :  { %v2915_v58 = vadd.f32 %v2884_v60, %v2842_v9  ;;  %v2910_v41 = vadd.f32 %v2909_v35, %v5454_v10 }
 0xbe8   :  { %v4219_v54 = vpop.eup %4218  ;;  %v3918_v33 = vmul.f32 -1.442695, %v2915_v58 }
 0xbe9   :  { %v2922_v20 = vadd.f32 1.0, %v4219_v54  ;;  %v2870_v54 = vadd.f32 %v2869_v30, %v5464_v1 }
 0xbea   :  { %4220 = vpow2.f32 %v3918_v33 }
 0xbeb   :  { %4222 = vrcp.f32 %v2922_v20  ;;  %v2895_v52 = vpop.f32.mrf.mxu3  ;;  %v2935_v49 = vand.u32 2147483648, %v2922_v20  ;;  %v2933_v29 = vand.u32 2147483647, %v2922_v20  ;;  %vm2929_vm1 = vweird.f32 %v2922_v20 }
 0xbec   :  { %v2896_v50 = vadd.f32 %v2895_v52, %v6373_v61 }
 0xbed   :  { %v2936_v38 = vor.u32 1.1754944e-38, %v2935_v49  ;;  %vm2934_vm6 = vcmp.eq.f32.partialorder %v2933_v29, 8.507059e+37  ;;  %v2911_v36 = vpop.f32.mrf.mxu0 }
 0xbee   :  { %v2954_v21 = vadd.f32 %v2896_v50, %v2854_v57  ;;  %v2912_v42 = vadd.f32 %v2911_v36, %v5454_v10 }
 0xbf0   :  { %v4221_v47 = vpop.eup %4220  ;;  %v3919_v23 = vmul.f32 -1.442695, %v2954_v21 }
 0xbf1   :  { %v4223_v63 = vpop.eup %4222  ;;  %v2923_v7 = vadd.f32 1.0, %v4221_v47 }
 0xbf2   :  { %v2925_v27 = vmul.f32 %v4223_v63, %v2922_v20  ;;  %4224 = vpow2.f32 %v3919_v23  ;;  %vm2930_vm0 = vweird.f32 %v4223_v63 }
 0xbf3   :  { %4226 = vrcp.f32 %v2923_v7  ;;  %v2897_v39 = vpop.f32.mrf.mxu3  ;;  %vm2931_vm2 = vmor %vm2929_vm1, %vm2930_vm0  ;;  %v2950_v16 = vand.u32 2147483648, %v2923_v7  ;;  %v2948_v34 = vand.u32 2147483647, %v2923_v7  ;;  %vm2944_vm8 = vweird.f32 %v2923_v7 }
 0xbf4   :  { %v2926_v31 = vsub.f32 1.0, %v2925_v27  ;;  %v2898_v3 = vadd.f32 %v2897_v39, %v6373_v61 }
 0xbf5   :  { %v2951_v55 = vor.u32 1.1754944e-38, %v2950_v16  ;;  %vm2949_vm10 = vcmp.eq.f32.partialorder %v2948_v34, 8.507059e+37 }
 0xbf6   :  { %v2927_v46 = vmul.f32 %v4223_v63, %v2926_v31  ;;  %v2955_v6 = vadd.f32 %v2898_v3, %v2856_v0 }
 0xbf8   :  { %v4225_v14 = vpop.eup %4224  ;;  %v2928_v2 = vadd.f32 %v4223_v63, %v2927_v46  ;;  %v3920_v17 = vmul.f32 -1.442695, %v2955_v6 }
 0xbf9   :  { %v4227_v15 = vpop.eup %4226  ;;  %v2962_v44 = vadd.f32 1.0, %v4225_v14 }
 0xbfa   :  { %v2932_v5 = vsel %vm2931_vm2, %v4223_v63, %v2928_v2  ;;  %v2940_v62 = vmul.f32 %v4227_v15, %v2923_v7  ;;  %4228 = vpow2.f32 %v3920_v17  ;;  %vm2945_vm7 = vweird.f32 %v4227_v15 }
 0xbfb   :  { %4230 = vrcp.f32 %v2962_v44  ;;  %v2937_v25 = vsel %vm2934_vm6, %v2936_v38, %v2932_v5  ;;  %vm2946_vm9 = vmor %vm2944_vm8, %vm2945_vm7  ;;  %v2975_v32 = vand.u32 2147483648, %v2962_v44  ;;  %v2973_v60 = vand.u32 2147483647, %v2962_v44 }
 0xbfc   :  { %v2941_v28 = vsub.f32 1.0, %v2940_v62  ;;  %v2994_v40 = vmul.f32 %v2937_v25, %v2910_v41  ;;  %vm2969_vm12 = vweird.f32 %v2962_v44 }
 0xbfd   :  { %v2976_v33 = vor.u32 1.1754944e-38, %v2975_v32  ;;  %vm2974_vm14 = vcmp.eq.f32.partialorder %v2973_v60, 8.507059e+37 }
 0xbfe   :  { %v2942_v4 = vmul.f32 %v4227_v15, %v2941_v28  ;;  %v2996_v51 = vadd.f32 %v2994_v40, %v2868_v22 }
 0xc00   :  { %v4229_v13 = vpop.eup %4228  ;;  %v2943_v53 = vadd.f32 %v4227_v15, %v2942_v4 }
 0xc01   :  { %v4231_v59 = vpop.eup %4230  ;;  %v2963_v45 = vadd.f32 1.0, %v4229_v13 }
 0xc02   :  { %v2965_v24 = vmul.f32 %v4231_v59, %v2962_v44  ;;  %v2947_v18 = vsel %vm2946_vm9, %v4227_v15, %v2943_v53  ;;  %vm2970_vm11 = vweird.f32 %v4231_v59 }
 0xc03   :  { %4232 = vrcp.f32 %v2963_v45  ;;  %v2952_v12 = vsel %vm2949_vm10, %v2951_v55, %v2947_v18  ;;  %vm2971_vm13 = vmor %vm2969_vm12, %vm2970_vm11  ;;  %v2988_v37 = vand.u32 2147483647, %v2963_v45  ;;  %v2990_v21 = vand.u32 2147483648, %v2963_v45 }
 0xc04   :  { %v2966_v11 = vsub.f32 1.0, %v2965_v24  ;;  %4234 = vtanh.f32 %v2996_v51  ;;  %v2995_v48 = vmul.f32 %v2952_v12, %v2912_v42  ;;  %vm2984_vm3 = vweird.f32 %v2963_v45 }
 0xc05   :  { %v2991_v27 = vor.u32 1.1754944e-38, %v2990_v21  ;;  %vm2989_vm5 = vcmp.eq.f32.partialorder %v2988_v37, 8.507059e+37 }
 0xc06   :  { %v2967_v26 = vmul.f32 %v4231_v59, %v2966_v11  ;;  %v2997_v57 = vadd.f32 %v2995_v48, %v2870_v54 }
 0xc08   :  { %v2968_v9 = vadd.f32 %v4231_v59, %v2967_v26  ;;  %4236 = vtanh.f32 %v2997_v57 }
 0xc09   :  { %v4233_v58 = vpop.eup %4232 }
 0xc0a   :  { %v2972_v20 = vsel %vm2971_vm13, %v4231_v59, %v2968_v9  ;;  %v2980_v52 = vmul.f32 %v4233_v58, %v2963_v45  ;;  %v4235_v50 = vpop.eup %4234  ;;  %vm2985_vm15 = vweird.f32 %v4233_v58 }
 0xc0b   :  { %v2977_v8 = vsel %vm2974_vm14, %v2976_v33, %v2972_v20  ;;  %vm2986_vm4 = vmor %vm2984_vm3, %vm2985_vm15 }
 0xc0c   :  { %v3000_v61 = vsub.f32 1.0, %v2977_v8  ;;  %v2981_v10 = vsub.f32 1.0, %v2980_v52  ;;  %v3004_v23 = vmul.f32 %v2977_v8, %v5475_v19 }
 0xc0e   :  { %v3002_v47 = vmul.f32 %v4235_v50, %v3000_v61  ;;  %v2982_v63 = vmul.f32 %v4233_v58, %v2981_v10  ;;  %v4237_v3 = vpop.eup %4236 }
 0xc10   :  { %v3006_v7 = vadd.f32 %v3004_v23, %v3002_v47  ;;  %v2983_v1 = vadd.f32 %v4233_v58, %v2982_v63 }
 0xc12   :  { %3008 = vst [vmem:[%s5754_s17] sm:$0xff] %v3006_v7  ;;  %v2987_v39 = vsel %vm2986_vm4, %v4233_v58, %v2983_v1 }
 0xc13   :  { %v2992_v0 = vsel %vm2989_vm5, %v2991_v27, %v2987_v39 }
 0xc14   :  { %v3001_v31 = vsub.f32 1.0, %v2992_v0  ;;  %v3005_v19 = vmul.f32 %v2992_v0, %v5477_v43 }
 0xc16   :  { %v3003_v46 = vmul.f32 %v4237_v3, %v3001_v31 }
 0xc18   :  { %v3007_v49 = vadd.f32 %v3005_v19, %v3003_v46 }
 0xc1a   :  { %3009 = vst [vmem:[%s5754_s17 + $0x8] sm:$0xff] %v3007_v49 }
 0xc1b   :  { %3014 = vsyncpa [#allocation3], 1 }
 0xc1c   :  { %3015 = vsyncpa [#allocation5], 1 }
 0xc1d   :  { %3016 = vsyncpa [#allocation8], 1 }

</bundles_post_ra>
